<compile_context>
chip_gen: v5e
topology: v5e:2x2
jax: 0.10.0
libtpu: 0.0.40
codegen_flags: <defaults>
</compile_context>

<pallas_src>
import jax
import jax.numpy as jnp
from jax.experimental import pallas as pl
from jax.experimental.pallas import tpu as pltpu


def _cbam_kernel(x_ref, w1t_ref, w2t_ref, conv_ref, out_ref):
    TB, C, HW = x_ref.shape

    x = x_ref[...].astype(jnp.float32)                      # (TB, C, HW) lane-dense

    # ---------------- channel attention ----------------
    mxp = jnp.max(x, axis=2)                                 # (TB, C) adaptive max pool
    avp = jnp.mean(x, axis=2)                                # (TB, C) adaptive avg pool

    # Fused MLP: run the max/avg branches as one (2*TB, C) batch (halves the
    # number of tiny MXU dispatches).  DEFAULT precision is sufficient here
    # (reduction dims are only C and C//ratio).
    pooled = jnp.concatenate([mxp, avp], axis=0)             # (2*TB, C)
    h = jnp.maximum(
        jnp.dot(pooled, w1t_ref[...], preferred_element_type=jnp.float32), 0.0)
    y = jnp.dot(h, w2t_ref[...], preferred_element_type=jnp.float32)  # (2*TB, C)
    ca = jax.nn.sigmoid(y[:TB] + y[TB:])                     # (TB, C)
    x_ca = x * ca[:, :, None]                                # (TB, C, HW)

    # ------------- spatial attention (conv as one MXU matmul) -------------
    sp_max = jnp.max(x_ca, axis=1)                           # (TB, HW) max over C
    sp_mean = jnp.mean(x_ca, axis=1)                         # (TB, HW) mean over C
    sp = jnp.concatenate([sp_max, sp_mean], axis=1)          # (TB, 2*HW)
    acc = jnp.dot(sp, conv_ref[...],
                  precision=jax.lax.Precision.HIGHEST,
                  preferred_element_type=jnp.float32)        # (TB, HW): 7x7 "same" conv
    sa = jax.nn.sigmoid(acc)                                 # (TB, HW)

    out_ref[...] = (x_ca * sa[:, None, :]).astype(out_ref.dtype)


def _build_conv_matrix(conv_w, H, W):
    """Bake the KxK 'same' conv (weights x zero-pad validity) into a dense
    (2*H*W, H*W) matrix: rows = flattened source pixel of the max map (first HW
    rows) then the mean map; cols = flattened output pixel."""
    K = conv_w.shape[-1]
    P = K // 2
    HW = H * W
    idx = jnp.arange(HW, dtype=jnp.int32)
    row, col = idx // W, idx % W
    off = jnp.arange(K, dtype=jnp.int32) - P
    dr = jnp.repeat(off, K)                                  # (K*K,) tap row offsets
    dc = jnp.tile(off, K)                                    # (K*K,) tap col offsets
    src_r = row[None, :] + dr[:, None]                       # (K*K, HW)
    src_c = col[None, :] + dc[:, None]
    valid = (src_r >= 0) & (src_r < H) & (src_c >= 0) & (src_c < W)
    src = jnp.clip(src_r, 0, H - 1) * W + jnp.clip(src_c, 0, W - 1)
    out_idx = jnp.broadcast_to(idx[None, :], (K * K, HW))
    cw = jnp.asarray(conv_w, jnp.float32)
    w_max = jnp.where(valid, cw[0, 0].reshape(K * K)[:, None], 0.0)   # (K*K, HW)
    w_mean = jnp.where(valid, cw[0, 1].reshape(K * K)[:, None], 0.0)  # (K*K, HW)
    zeros = jnp.zeros((HW, HW), jnp.float32)
    m_max = zeros.at[src.ravel(), out_idx.ravel()].add(w_max.ravel())
    m_mean = zeros.at[src.ravel(), out_idx.ravel()].add(w_mean.ravel())
    return jnp.concatenate([m_max, m_mean], axis=0)          # (2*HW, HW)


def _vmem_capacity_bytes():
    try:
        return int(pltpu.get_tpu_info().vmem_capacity_bytes)
    except Exception:
        return 64 * 1024 * 1024   # conservative fallback (v7x per-TC value)


def _pick_batch_tile(B, C, HW, in_bytes, vmem_cap):
    # Per grid step: 2x double-buffered in/out blocks (input dtype) plus ~3
    # full-tile f32 temporaries (x, x_ca, out) inside the kernel.
    per_image = C * HW * (4 * in_bytes + 3 * 4)
    budget = max(vmem_cap // 4, 4 * 1024 * 1024)
    max_tb = max(1, budget // per_image)
    if B >= 2:
        # Keep >= 2 grid steps so the "parallel" batch axis feeds both v7x
        # TensorCores and the pipeline has something to overlap.
        max_tb = min(max_tb, B // 2)
    divisors = [d for d in range(1, B + 1) if B % d == 0 and d <= max_tb]
    even_grid = [d for d in divisors if (B // d) % 2 == 0]
    return max(even_grid) if even_grid else max(divisors)


def cbam_pallas(x, w1, w2, conv_w, kernel_size=7, batch_tile=None):
    """x: (B, C, H, W); w1: (C//ratio, C); w2: (C, C//ratio); conv_w: (1, 2, K, K)."""
    B, C, H, W = x.shape
    Cr = w1.shape[0]
    HW = H * W
    K = conv_w.shape[-1]
    assert K == kernel_size, (K, kernel_size)

    x_flat = x.reshape(B, C, HW)                             # lane-dense spatial layout
    w1t = jnp.asarray(w1, jnp.float32).T                     # (C, Cr)  == torch W1.T
    w2t = jnp.asarray(w2, jnp.float32).T                     # (Cr, C)  == torch W2.T
    conv_mat = _build_conv_matrix(conv_w, H, W)              # (2*HW, HW)

    in_bytes = jnp.dtype(x.dtype).itemsize
    vmem_cap = _vmem_capacity_bytes()
    if batch_tile is None:
        batch_tile = _pick_batch_tile(B, C, HW, in_bytes, vmem_cap)
    assert B % batch_tile == 0, (B, batch_tile)
    tb = batch_tile

    est = (4 * tb * C * HW * in_bytes        # double-buffered in + out blocks
           + 3 * tb * C * HW * 4             # f32 temporaries inside the kernel
           + 2 * HW * HW * 4                 # baked conv matrix
           + 4 * C * Cr * 4)                 # MLP weights (+ slack)
    vmem_limit = int(min(max(32 * 1024 * 1024, 2 * est), (vmem_cap * 3) // 4))

    out_flat = pl.pallas_call(
        _cbam_kernel,
        out_shape=jax.ShapeDtypeStruct((B, C, HW), x.dtype),
        grid=(B // tb,),
        in_specs=[
            pl.BlockSpec((tb, C, HW), lambda b: (b, 0, 0)),
            pl.BlockSpec((C, Cr), lambda b: (0, 0)),
            pl.BlockSpec((Cr, C), lambda b: (0, 0)),
            pl.BlockSpec((2 * HW, HW), lambda b: (0, 0)),
        ],
        out_specs=pl.BlockSpec((tb, C, HW), lambda b: (b, 0, 0)),
        compiler_params=pltpu.CompilerParams(
            dimension_semantics=("parallel",),
            vmem_limit_bytes=vmem_limit,
        ),
    )(x_flat, w1t, w2t, conv_mat)
    return out_flat.reshape(B, C, H, W)


def cbam_ref(x, w1, w2, conv_w):
    """Pure-JAX reference with identical semantics to the PyTorch module."""
    P = conv_w.shape[-1] // 2
    mxp = jnp.max(x, axis=(2, 3))                            # (B, C)
    avp = jnp.mean(x, axis=(2, 3))                           # (B, C)

    def fc(v):
        h = jnp.maximum(jnp.dot(v, w1.T, precision=jax.lax.Precision.HIGHEST), 0.0)
        return jnp.dot(h, w2.T, precision=jax.lax.Precision.HIGHEST)

    ca = jax.nn.sigmoid(fc(mxp) + fc(avp))[:, :, None, None]
    xc = x * ca

    sp = jnp.stack([jnp.max(xc, axis=1), jnp.mean(xc, axis=1)], axis=1)  # (B, 2, H, W)
    conv = jax.lax.conv_general_dilated(
        sp, conv_w, window_strides=(1, 1), padding=[(P, P), (P, P)],
        dimension_numbers=("NCHW", "OIHW", "NCHW"),
        precision=jax.lax.Precision.HIGHEST)
    sa = jax.nn.sigmoid(conv)                                # (B, 1, H, W)
    return xc * sa


if __name__ == "__main__":
    B, C, H, W = 8, 32, 16, 16
    ratio, ksize = 8, 7
    Cr = C // ratio

    key = jax.random.PRNGKey(0)
    k1, k2, k3, k4 = jax.random.split(key, 4)
    x = jax.random.normal(k1, (B, C, H, W), jnp.float32)
    # deterministic synthetic parameters (module __init__ shapes, no bias anywhere)
    w1 = jax.random.normal(k2, (Cr, C), jnp.float32) * 0.1                   # fc[0].weight
    w2 = jax.random.normal(k3, (C, Cr), jnp.float32) * 0.1                   # fc[2].weight
    conv_w = jax.random.normal(k4, (1, 2, ksize, ksize), jnp.float32) * 0.1  # conv.weight

    # Auto batch_tile -> tb=4, grid=(2,): exercises the pipelined multi-step path
    # and keeps both TensorCores busy on dual-TC parts.
    out = cbam_pallas(x, w1, w2, conv_w, kernel_size=ksize)
    out = jax.block_until_ready(out)

    ref = cbam_ref(x, w1, w2, conv_w)
    assert out.shape == ref.shape, (out.shape, ref.shape)
    # Tolerance accounts for the channel-MLP running at DEFAULT matmul precision
    # (single bf16 MXU pass) vs the f32-exact reference; real bugs give O(0.1+) errors.
    if not jnp.allclose(out, ref, atol=5e-3, rtol=5e-3):
        max_err = jnp.max(jnp.abs(out - ref))
        raise AssertionError(f"Pallas CBAM mismatch, max abs err = {max_err}")

    print("KERNEL_OK")
</pallas_src>

<mosaic_0001>
module attributes {stable_mosaic.version = 11 : i64} {
  func.func @_cbam_kernel(%arg0: i32, %arg1: memref<4x32x256xf32, #tpu.memory_space<vmem>>, %arg2: memref<32x4xf32, #tpu.memory_space<vmem>>, %arg3: memref<4x32xf32, #tpu.memory_space<vmem>>, %arg4: memref<512x256xf32, #tpu.memory_space<vmem>>, %arg5: memref<4x32x256xf32, #tpu.memory_space<vmem>>) attributes {dimension_semantics = [#tpu.dimension_semantics<parallel>], iteration_bounds = array<i64: 2>, scalar_prefetch = 0 : i64, scratch_operands = 0 : i64, tpu.core_type = #tpu.core_type<tc>, window_params = [{transform_indices = @transform_0, window_bounds = array<i64: 4, 32, 256>}, {pipeline_mode = #tpu.pipeline_mode<synchronous>, transform_indices = @transform_1, window_bounds = array<i64: 32, 4>}, {pipeline_mode = #tpu.pipeline_mode<synchronous>, transform_indices = @transform_2, window_bounds = array<i64: 4, 32>}, {pipeline_mode = #tpu.pipeline_mode<synchronous>, transform_indices = @transform_3, window_bounds = array<i64: 512, 256>}, {transform_indices = @transform_4, window_bounds = array<i64: 4, 32, 256>}]} {
    %c0 = arith.constant 0 : index
    %c0_0 = arith.constant 0 : index
    %c0_1 = arith.constant 0 : index
    %0 = vector.load %arg1[%c0, %c0_0, %c0_1] : memref<4x32x256xf32, #tpu.memory_space<vmem>>, vector<4x32x256xf32>
    %cst = arith.constant dense<0xFF800000> : vector<4x32xf32>
    %1 = vector.multi_reduction <maximumf>, %0, %cst [2] : vector<4x32x256xf32> to vector<4x32xf32>
    %cst_2 = arith.constant dense<0.000000e+00> : vector<4x32xf32>
    %2 = vector.multi_reduction <add>, %0, %cst_2 [2] : vector<4x32x256xf32> to vector<4x32xf32>
    %cst_3 = arith.constant 2.560000e+02 : f32
    %3 = vector.broadcast %cst_3 : f32 to vector<4x32xf32>
    %4 = arith.divf %2, %3 : vector<4x32xf32>
    %5 = tpu.concatenate %1, %4 in 0 : vector<4x32xf32>, vector<4x32xf32> -> vector<8x32xf32>
    %c0_4 = arith.constant 0 : index
    %c0_5 = arith.constant 0 : index
    %6 = vector.load %arg2[%c0_4, %c0_5] : memref<32x4xf32, #tpu.memory_space<vmem>>, vector<32x4xf32>
    %cst_6 = arith.constant dense<0.000000e+00> : vector<8x4xf32>
    %7 = tpu.matmul %5, %6, %cst_6 {dimension_numbers = #tpu.dot_dimension_numbers<[1], [0], [0], [1], [0, 0, 1, 1], [], []>} : vector<8x32xf32>, vector<32x4xf32>, vector<8x4xf32> -> vector<8x4xf32>
    %cst_7 = arith.constant 0.000000e+00 : f32
    %8 = vector.broadcast %cst_7 : f32 to vector<8x4xf32>
    %9 = arith.maximumf %7, %8 : vector<8x4xf32>
    %c0_8 = arith.constant 0 : index
    %c0_9 = arith.constant 0 : index
    %10 = vector.load %arg3[%c0_8, %c0_9] : memref<4x32xf32, #tpu.memory_space<vmem>>, vector<4x32xf32>
    %cst_10 = arith.constant dense<0.000000e+00> : vector<8x32xf32>
    %11 = tpu.matmul %9, %10, %cst_10 {dimension_numbers = #tpu.dot_dimension_numbers<[1], [0], [0], [1], [0, 0, 1, 1], [], []>} : vector<8x4xf32>, vector<4x32xf32>, vector<8x32xf32> -> vector<8x32xf32>
    %12 = vector.extract_strided_slice %11 {offsets = [0, 0], sizes = [4, 32], strides = [1, 1]} : vector<8x32xf32> to vector<4x32xf32>
    %13 = vector.extract_strided_slice %11 {offsets = [4, 0], sizes = [4, 32], strides = [1, 1]} : vector<8x32xf32> to vector<4x32xf32>
    %14 = arith.addf %12, %13 : vector<4x32xf32>
    %15 = arith.negf %14 : vector<4x32xf32>
    %16 = math.exp %15 : vector<4x32xf32>
    %cst_11 = arith.constant 1.000000e+00 : f32
    %17 = vector.broadcast %cst_11 : f32 to vector<4x32xf32>
    %18 = arith.addf %17, %16 : vector<4x32xf32>
    %19 = arith.divf %17, %18 : vector<4x32xf32>
    %20 = vector.shape_cast %19 : vector<4x32xf32> to vector<4x32x1xf32>
    %21 = vector.broadcast %20 : vector<4x32x1xf32> to vector<4x32x256xf32>
    %22 = arith.mulf %0, %21 : vector<4x32x256xf32>
    %cst_12 = arith.constant dense<0xFF800000> : vector<4x256xf32>
    %23 = vector.multi_reduction <maximumf>, %22, %cst_12 [1] : vector<4x32x256xf32> to vector<4x256xf32>
    %cst_13 = arith.constant dense<0.000000e+00> : vector<4x256xf32>
    %24 = vector.multi_reduction <add>, %22, %cst_13 [1] : vector<4x32x256xf32> to vector<4x256xf32>
    %cst_14 = arith.constant 3.200000e+01 : f32
    %25 = vector.broadcast %cst_14 : f32 to vector<4x256xf32>
    %26 = arith.divf %24, %25 : vector<4x256xf32>
    %27 = tpu.concatenate %23, %26 in 1 : vector<4x256xf32>, vector<4x256xf32> -> vector<4x512xf32>
    %c0_15 = arith.constant 0 : index
    %c0_16 = arith.constant 0 : index
    %28 = vector.load %arg4[%c0_15, %c0_16] : memref<512x256xf32, #tpu.memory_space<vmem>>, vector<512x256xf32>
    %cst_17 = arith.constant dense<0.000000e+00> : vector<4x256xf32>
    %29 = tpu.matmul %27, %28, %cst_17 {dimension_numbers = #tpu.dot_dimension_numbers<[1], [0], [0], [1], [0, 0, 1, 1], [], []>, precision = #tpu.contract_precision<fp32>} : vector<4x512xf32>, vector<512x256xf32>, vector<4x256xf32> -> vector<4x256xf32>
    %30 = arith.negf %29 : vector<4x256xf32>
    %31 = math.exp %30 : vector<4x256xf32>
    %cst_18 = arith.constant 1.000000e+00 : f32
    %32 = vector.broadcast %cst_18 : f32 to vector<4x256xf32>
    %33 = arith.addf %32, %31 : vector<4x256xf32>
    %34 = arith.divf %32, %33 : vector<4x256xf32>
    %35 = vector.shape_cast %34 : vector<4x256xf32> to vector<4x1x256xf32>
    %36 = vector.broadcast %35 : vector<4x1x256xf32> to vector<4x32x256xf32>
    %37 = arith.mulf %22, %36 : vector<4x32x256xf32>
    %c0_19 = arith.constant 0 : index
    %c0_20 = arith.constant 0 : index
    %c0_21 = arith.constant 0 : index
    %38 = vector.load %arg5[%c0_19, %c0_20, %c0_21] : memref<4x32x256xf32, #tpu.memory_space<vmem>>, vector<4x32x256xf32>
    tpu.vector_store %arg5[%c0_19, %c0_20, %c0_21], %37 {strides = array<i32>} : memref<4x32x256xf32, #tpu.memory_space<vmem>>, vector<4x32x256xf32>,
    return
  }
  func.func @transform_0(%arg0: i32) -> (i32, i32, i32) {
    %c0_i32 = arith.constant 0 : i32
    %c0_i32_0 = arith.constant 0 : i32
    %c0_i32_1 = arith.constant 0 : i32
    return %arg0, %c0_i32, %c0_i32_0 : i32, i32, i32
  }
  func.func @transform_1(%arg0: i32) -> (i32, i32) {
    %c0_i32 = arith.constant 0 : i32
    %c0_i32_0 = arith.constant 0 : i32
    %c0_i32_1 = arith.constant 0 : i32
    return %c0_i32, %c0_i32_0 : i32, i32
  }
  func.func @transform_2(%arg0: i32) -> (i32, i32) {
    %c0_i32 = arith.constant 0 : i32
    %c0_i32_0 = arith.constant 0 : i32
    %c0_i32_1 = arith.constant 0 : i32
    return %c0_i32, %c0_i32_0 : i32, i32
  }
  func.func @transform_3(%arg0: i32) -> (i32, i32) {
    %c0_i32 = arith.constant 0 : i32
    %c0_i32_0 = arith.constant 0 : i32
    %c0_i32_1 = arith.constant 0 : i32
    return %c0_i32, %c0_i32_0 : i32, i32
  }
  func.func @transform_4(%arg0: i32) -> (i32, i32, i32) {
    %c0_i32 = arith.constant 0 : i32
    %c0_i32_0 = arith.constant 0 : i32
    %c0_i32_1 = arith.constant 0 : i32
    return %arg0, %c0_i32, %c0_i32_0 : i32, i32, i32
  }
}

</mosaic_0001>

<bundles_post_ra>
// kernel: tpu_custom_call.1
= control target key start
LH: loop header
LB: loop body
LE: loop exit
PB: predicated region body
PF: predicated region fallthrough
CT: control target
= control target key end

     0   :  { %9 = vsyncpa [#allocation3], 0  ;;  %s6930_s0 = inlined_call_operand.hbm [shape: f32[8,32,256], index: 0, kind: input, shape index: {}]   ;;  %s6931_s1 = inlined_call_operand.vmem [shape: f32[32,4], index: 1, kind: input, shape index: {}]   ;;  %s6932_s2 = inlined_call_operand.vmem [shape: f32[4,32], index: 2, kind: input, shape index: {}]   ;;  %s6933_s3 = inlined_call_operand.hbm [shape: f32[512,256], index: 3, kind: input, shape index: {}]   ;;  %s6934_s4 = inlined_call_operand.hbm [shape: f32[8,32,256], index: 4, kind: output, shape index: {}]  }
   0x1   :  { %11 = vsyncpa [#allocation3 + $0x1], 0 }
   0x2   :  { %12 = vsyncpa [#allocation6], 0 }
   0x3   :  { %13 = vsyncpa [#allocation4], 0 }
   0x4   :  { %15 = vsyncpa [#allocation4 + $0x1], 0  ;;  %s4306_s15 = smov 0   ;;  %s4308_s16 = smov 0  }
   0x5   :  { %s4310_s17 = smov 0   ;;  %s4312_s18 = smov 0  }
   0x6 LB: > { %s4327_s19 = sadd.s32 4294967295, %s4272_s18   ;;  %s3989_s20 = sadd.s32 4294967294, %s4272_s18   ;;  %s4272_s18 = sphi %s4312_s18, %s7401_s18   ;;  %s4268_s17 = sphi %s4310_s17, %s7400_s17   ;;  %s4264_s16 = sphi %s4308_s16, %s7399_s16   ;;  %s4260_s15 = sphi %s4306_s15, %s7398_s15  }
   0x7   : > { %p41_p0 = scmp.ne.s32.totalorder %s4264_s16, %s4260_s15  ;;  %p42_p1 = scmp.eq.s32.totalorder %s4327_s19, 0 }
   0x8   : > { %p128_p2 = scmp.eq.s32.totalorder %s4327_s19, 1  ;;  %p134_p3 = scmp.eq.s32.totalorder %s3989_s20, 1 }
   0x9   : > { %p4336_p4 = por %p42_p1, %p41_p0  ;;  %p3990_p5 = scmp.ge.s32.totalorder %s4272_s18, 1 }
   0xa   : > { %p4341_p6 = por %p134_p3, %p41_p0  ;;  %p141_p7 = scmp.lt.s32.totalorder %s4272_s18, 3 }
   0xb   : > { %s158_s25 = sshll.u32 %s6933_s3, 4  ;;  %s4274_s27 = smov [#allocation5]   ;;  %s159_s25 = int_to_ptr.hbm [resolvable:$true] %s158_s25 }
   0xc   : > { %p4349_p8 = pnand %p3990_p5, %p141_p7  ;;  %s160_s28 = sshll.u32 %s4274_s27, 4  ;;  %s161_s28 = int_to_ptr.vmem [resolvable:$true] %s160_s28 }
   0xd   : > { %s4359_s29 = sadd.s32 1, %s4272_s18   ;;  %s4275_s30 = smov 256  }
   0xe   : > { %p4025_p9 = pneg %p4349_p8  ;;  %s4276_s5 = smov 16  }
   0xf   : > { %s25_s6 = ssub.s32 %s4272_s18, %s4359_s29  ;;  %s28_s7 = sadd.s32 1, %s4268_s17 }
  0x10   : > { %p4026_p10 = pnand %p4025_p9, %p42_p1  ;;  %p26_p12 = scmp.eq.s32.totalorder %s25_s6, 0 }
  0x11   : > { %p35_p13 = scmp.ne.s32.totalorder %s4268_s17, %s4264_s16  ;;  %p36_p0 = scmp.eq.s32.totalorder %s4272_s18, 0 }
  0x12   : > { %4028 = dma.hbm_to_vmem [thread:$0]  (!%p4026_p10), %s159_s25, 16384, %s161_s28, [#allocation6], %s4275_s30, %s4275_s30, %s4276_s5  }
  0x13   : > { %s4371_s8 = scalar_select %p26_p12, %s4268_s17, %s28_s7  }
  0x14   : > { %p4375_p3 = por %p128_p2, %p35_p13  ;;  %p4038_p5 = scmp.lt.s32.totalorder %s4272_s18, 2 }
  0x15   : > { %s174_s10 = sand.u32 1, %s4268_s17   ;;  %s4014_s11 = sshll.u32 %s4272_s18, 8 }
  0x16   : > { %p37_p7 = por %p36_p0, %p35_p13  ;;  %s3993_s12 = sshll.u32 %s174_s10, 8 }
  0x17   : > { %s184_s20 = scalar_lea.hbm %s6930_s0, %s4014_s11  ;;  %s178_s24 = scalar_lea.vmem [#allocation2], %s3993_s12 }
  0x18   : > { %s185_s23 = sshll.u32 %s184_s20, 4  ;;  %s187_s25 = sshll.u32 %s178_s24, 4  ;;  %s186_s23 = int_to_ptr.hbm [resolvable:$true] %s185_s23  ;;  %s188_s25 = int_to_ptr.vmem [resolvable:$true] %s187_s25 }
  0x19   : > { %p4385_p9 = pnand %p4038_p5, %p37_p7  ;;  %s175_s28 = scalar_lea.sflag [#allocation3], %s174_s10 }
  0x1a   : > { %s4172_s6 = sshra.s32 %s186_s23, 4  ;;  %s4179_s12 = scalar_lea.hbm %s6930_s0, 512  ;;  %s4173_s6 = int_to_ptr.hbm [resolvable:$true] %s4172_s6 }
  0x1b   : > { %s4174_s7 = scalar_lea.hbm %s4173_s6, 256  ;;  %p4176_p10 = pneg %p4385_p9 }
  0x1c   : > { %p4175_p2 = scmp.ne.s32.totalorder %s4173_s6, %s4174_s7  ;;  %p4180_p0 = scmp.lt.s32.totalorder %s4173_s6, %s6930_s0 }
  0x1d   : > { %p4181_p5 = scmp.lt.s32.totalorder %s4179_s12, %s4174_s7 }
  0x1e   : > { %p4177_p12 = pnand %p4176_p10, %p4175_p2 }
  0x1f   : > { %p4182_p7 = por %p4181_p5, %p4180_p0 }
  0x20   : > { %p4178_p13 = pneg %p4177_p12 }
  0x22   : > { %p4183_p11 = pnand %p4182_p7, %p4178_p13 }
  0x24   : > { %4186 = shalt.err (!%p4183_p11)
}
  0x25   : > { %4032 = dma.hbm_to_vmem [thread:$0]  (!%p4385_p9), %s186_s23, 4096, %s188_s25, %s175_s28, %s4275_s30, %s4275_s30, %s4276_s5  }
  0x26   : > { %199 = sbr.rel (%p4349_p8) target bundleno = 1306 (0x51a), region = 36 }
  0x2b   : > { %s4405_s10 = sand.u32 1, %s4264_s16  }
  0x2c   : > { %s3998_s24 = sshll.u32 %s4405_s10, 8  ;;  %s202_s6 = scalar_lea.sflag [#allocation3], %s4405_s10 }
  0x2d   : > { %s4411_s7 = scalar_lea.vmem [#allocation2], %s3998_s24 }
  0x2e   : > { %4247 = dma.done.wait (%p4336_p4), %s202_s6, 4096  }
  0x2f   : > { %4249 = vsyncadd (%p4336_p4), %s202_s6, 4294963200 }
  0x30   : > { %4251 = dma.done.wait (%p42_p1), [#allocation6], 16384  }
  0x31   : > { %4253 = vsyncadd (%p42_p1), [#allocation6], 4294950912  ;;  %v246_v0 = vld [vmem:[%s4411_s7 + $0x40] sm:$0xff]  ;;  %v247_v1 = vld [vmem:[%s4411_s7 + $0x48] sm:$0xff]  ;;  %vm410_vm1 = vcmask 130112   ;;  %vm414_vm2 = vcmask 195712  }
  0x32   : > { %v242_v2 = vld [vmem:[%s4411_s7 + $0x20] sm:$0xff]  ;;  %v330_v3 = vadd.f32 %v247_v1, %v246_v0  ;;  %v243_v4 = vld [vmem:[%s4411_s7 + $0x28] sm:$0xff]  ;;  %v248_v9 = vld [vmem:[%s4411_s7 + $0x50] sm:$0xff]  ;;  %v282_v25 = vmax.f32 %v246_v0, %v247_v1  ;;  %v4277_v0 = vmov 256.0   ;;  %vm418_vm3 = vcmask 261312   ;;  %s6833_s12 = scalar_lea.vmem [#allocation7], %s3998_s24 }
  0x33   : > { %v238_v5 = vld [vmem:[%s4411_s7] sm:$0xff]  ;;  %v239_v6 = vld [vmem:[%s4411_s7 + $0x8] sm:$0xff]  ;;  %v324_v7 = vadd.f32 %v243_v4, %v242_v2  ;;  %v249_v10 = vld [vmem:[%s4411_s7 + $0x58] sm:$0xff]  ;;  %v276_v43 = vmax.f32 %v242_v2, %v243_v4  ;;  %4094 = vrcp.f32 %v4277_v0  ;;  %vm492_vm4 = vcmask 1045509   ;;  %s4016_s14 = sshll.u32 %s4327_s19, 8  ;;  %s3903_s19 = sshll.u32 %s6833_s12, 4  ;;  %s3904_s19 = int_to_ptr.vmem [resolvable:$true] %s3903_s19 }
  0x34   : > { %v318_v8 = vadd.f32 %v239_v6, %v238_v5  ;;  %331 = vadd.xlane.f32.xlu1 %v330_v3  ;;  %v250_v11 = vld [vmem:[%s4411_s7 + $0x60] sm:$0xff]  ;;  %v251_v12 = vld [vmem:[%s4411_s7 + $0x68] sm:$0xff]  ;;  %v240_v13 = vld [vmem:[%s4411_s7 + $0x10] sm:$0xff]  ;;  %v333_v15 = vadd.f32 %v249_v10, %v248_v9  ;;  %v270_v24 = vmax.f32 %v238_v5, %v239_v6  ;;  %v285_v27 = vmax.f32 %v248_v9, %v249_v10  ;;  %s3902_s6 = scalar_lea.hbm %s6934_s4, %s4016_s14  ;;  %s3890_s21 = scalar_lea.sflag [#allocation4], %s4405_s10 }
  0x35   : > { %325 = vadd.xlane.f32.xlu2 %v324_v7  ;;  %v241_v14 = vld [vmem:[%s4411_s7 + $0x18] sm:$0xff]  ;;  %v336_v16 = vadd.f32 %v251_v12, %v250_v11  ;;  %v256_v18 = vld [vmem:[%s4411_s7 + $0x90] sm:$0xff]  ;;  %v254_v20 = vld [vmem:[%s4411_s7 + $0x80] sm:$0xff]  ;;  %v288_v45 = vmax.f32 %v250_v11, %v251_v12  ;;  %v405_v7 = vlaneseq  ;;  %vm494_vm5 = vcmask 1046534   ;;  %s4222_s25 = scalar_lea.hbm %s6934_s4, 512 }
  0x36   : > { %319 = vadd.xlane.f32.xlu0 %v318_v8  ;;  %v321_v17 = vadd.f32 %v241_v14, %v240_v13  ;;  %v257_v19 = vld [vmem:[%s4411_s7 + $0x98] sm:$0xff]  ;;  %v255_v21 = vld [vmem:[%s4411_s7 + $0x88] sm:$0xff]  ;;  %v273_v26 = vmax.f32 %v240_v13, %v241_v14  ;;  %v252_v28 = vld [vmem:[%s4411_s7 + $0x70] sm:$0xff]  ;;  %vm441_vm6 = vcmask 1041409   ;;  %vm443_vm7 = vcmask 1042434  }
  0x37   : > { %v345_v22 = vadd.f32 %v257_v19, %v256_v18  ;;  %v342_v23 = vadd.f32 %v255_v21, %v254_v20  ;;  %v253_v29 = vld [vmem:[%s4411_s7 + $0x78] sm:$0xff]  ;;  %v244_v30 = vld [vmem:[%s4411_s7 + $0x30] sm:$0xff]  ;;  %v258_v32 = vld [vmem:[%s4411_s7 + $0xa0] sm:$0xff]  ;;  %v294_v44 = vmax.f32 %v254_v20, %v255_v21  ;;  %v297_v46 = vmax.f32 %v256_v18, %v257_v19 }
  0x38   : > { %v245_v31 = vld [vmem:[%s4411_s7 + $0x38] sm:$0xff]  ;;  %v259_v33 = vld [vmem:[%s4411_s7 + $0xa8] sm:$0xff]  ;;  %v339_v34 = vadd.f32 %v253_v29, %v252_v28  ;;  %v264_v37 = vld [vmem:[%s4411_s7 + $0xd0] sm:$0xff]  ;;  %v291_v55 = vmax.f32 %v252_v28, %v253_v29  ;;  %v4456_v11 = vand.u32 127, %v405_v7  ;;  %vm496_vm8 = vcmask 1047559  }
  0x39   : > { %v327_v35 = vadd.f32 %v245_v31, %v244_v30  ;;  %v348_v36 = vadd.f32 %v259_v33, %v258_v32  ;;  %v265_v38 = vld [vmem:[%s4411_s7 + $0xd8] sm:$0xff]  ;;  %v262_v39 = vld [vmem:[%s4411_s7 + $0xc0] sm:$0xff]  ;;  %v263_v40 = vld [vmem:[%s4411_s7 + $0xc8] sm:$0xff]  ;;  %v279_v53 = vmax.f32 %v244_v30, %v245_v31  ;;  %v300_v54 = vmax.f32 %v258_v32, %v259_v33  ;;  %v4095_v1 = vpop.eup %4094 }
  0x3a   : > { %v357_v41 = vadd.f32 %v265_v38, %v264_v37  ;;  %v354_v42 = vadd.f32 %v263_v40, %v262_v39  ;;  %v266_v47 = vld [vmem:[%s4411_s7 + $0xe0] sm:$0xff]  ;;  %v267_v48 = vld [vmem:[%s4411_s7 + $0xe8] sm:$0xff]  ;;  %v260_v49 = vld [vmem:[%s4411_s7 + $0xb0] sm:$0xff]  ;;  %v306_v56 = vmax.f32 %v262_v39, %v263_v40  ;;  %v309_v60 = vmax.f32 %v264_v37, %v265_v38 }
  0x3b   : > { %v261_v50 = vld [vmem:[%s4411_s7 + $0xb8] sm:$0xff]  ;;  %v360_v51 = vadd.f32 %v267_v48, %v266_v47  ;;  %v268_v57 = vld [vmem:[%s4411_s7 + $0xf0] sm:$0xff]  ;;  %v312_v63 = vmax.f32 %v266_v47, %v267_v48  ;;  %v367_v2 = vmul.f32 256.0, %v4095_v1  ;;  %vm371_vm0 = vweird.f32 %v4095_v1 }
  0x3c   : > { %334 = vadd.xlane.f32.xlu1 %v333_v15  ;;  %v351_v52 = vadd.f32 %v261_v50, %v260_v49  ;;  %v269_v58 = vld [vmem:[%s4411_s7 + $0xf8] sm:$0xff]  ;;  %v303_v61 = vmax.f32 %v260_v49, %v261_v50  ;;  %v4460_v13 = vadd.s32 4294967280, %v4456_v11  ;;  %v4464_v15 = vadd.s32 4294967288, %v4456_v11 }
  0x3d   : > { %337 = vadd.xlane.f32.xlu2 %v336_v16  ;;  %v363_v59 = vadd.f32 %v269_v58, %v268_v57  ;;  %v315_v62 = vmax.f32 %v268_v57, %v269_v58  ;;  %v368_v3 = vsub.f32 1.0, %v367_v2  ;;  %v4479_v37 = vadd.s32 4294967272, %v4456_v11  ;;  %v503_v57 = vld [vmem:[%s6931_s1 + $0x10] sm:$0xff]  ;;  %v502_v58 = vld [vmem:[%s6931_s1 + $0x8] sm:$0xff] }
  0x3e   : > { %322 = vadd.xlane.f32.xlu0 %v321_v17  ;;  %vm445_vm9 = vcmask 1043459   ;;  %vm499_vm10 = vcmask 1043456   ;;  %vm505_vm11 = vcmask 261120   ;;  %vm531_vm12 = vcmask 31744  }
  0x3f   : > { %v369_v4 = vmul.f32 %v4095_v1, %v368_v3 }
  0x41   : > { %v370_v5 = vadd.f32 %v4095_v1, %v369_v4 }
  0x43   : > { %v4453_v10 = vsel %vm371_vm0, %v4095_v1, %v370_v5 }
  0x44   : > { %346 = vadd.xlane.f32.xlu1 %v345_v22 }
  0x45   : > { %271 = vmax.xlane.f32.xlu2 %v270_v24 }
  0x46   : > { %343 = vadd.xlane.f32.xlu0 %v342_v23 }
  0x4c   : > { %283 = vmax.xlane.f32.xlu1 %v282_v25 }
  0x4d   : > { %286 = vmax.xlane.f32.xlu2 %v285_v27 }
  0x4e   : > { %274 = vmax.xlane.f32.xlu0 %v273_v26 }
  0x54   : > { %340 = vadd.xlane.f32.xlu1 %v339_v34 }
  0x55   : > { %349 = vadd.xlane.f32.xlu2 %v348_v36 }
  0x56   : > { %328 = vadd.xlane.f32.xlu0 %v327_v35 }
  0x5c   : > { %358 = vadd.xlane.f32.xlu1 %v357_v41 }
  0x5d   : > { %277 = vmax.xlane.f32.xlu2 %v276_v43 }
  0x5e   : > { %355 = vadd.xlane.f32.xlu0 %v354_v42 }
  0x64   : > { %295 = vmax.xlane.f32.xlu1 %v294_v44 }
  0x65   : > { %298 = vmax.xlane.f32.xlu2 %v297_v46 }
  0x66   : > { %289 = vmax.xlane.f32.xlu0 %v288_v45 }
  0x6c   : > { %361 = vadd.xlane.f32.xlu1 %v360_v51 }
  0x6d   : > { %280 = vmax.xlane.f32.xlu2 %v279_v53  ;;  %v504_v53 = vld [vmem:[%s6931_s1 + $0x18] sm:$0xff] }
  0x6e   : > { %352 = vadd.xlane.f32.xlu0 %v351_v52  ;;  %521 = vmatpush.msra.mxu0 %v504_v53 }
  0x70   : > { %522 = vmatpush.msra.mxu0 %v503_v57 }
  0x72   : > { %523 = vmatpush.msra.mxu0 %v502_v58 }
  0x74   : > { %301 = vmax.xlane.f32.xlu1 %v300_v54 }
  0x75   : > { %307 = vmax.xlane.f32.xlu2 %v306_v56 }
  0x76   : > { %292 = vmax.xlane.f32.xlu0 %v291_v55 }
  0x7c   : > { %364 = vadd.xlane.f32.xlu1 %v363_v59  ;;  %v501_v59 = vld [vmem:[%s6931_s1] sm:$0xff] }
  0x7d   : > { %304 = vmax.xlane.f32.xlu2 %v303_v61  ;;  %524 = vmatpush.msra.mxu0 %v501_v59 }
  0x7e   : > { %310 = vmax.xlane.f32.xlu0 %v309_v60 }
  0x84   : > { %316 = vmax.xlane.f32.xlu1 %v315_v62 }
  0x86   : > { %313 = vmax.xlane.f32.xlu0 %v312_v63 }
  0xa7   : > { %v332_v6 = vpop.xlane.xlu1 %331 }
  0xa8   : > { %v326_v8 = vpop.xlane.xlu2 %325  ;;  %v377_v12 = vmul.f32 %v4453_v10, %v332_v6 }
  0xa9   : > { %v320_v9 = vpop.xlane.xlu0 %319  ;;  %v375_v14 = vmul.f32 %v4453_v10, %v326_v8 }
  0xaa   : > { %v373_v16 = vmul.f32 %v4453_v10, %v320_v9  ;;  %v471_v22 = vperm.slane %v377_v12, %v4456_v11 }
  0xab   : > { %v467_v23 = vperm.slane %v375_v14, %v4460_v13 }
  0xac   : > { %v464_v25 = vperm.slane %v373_v16, %v4456_v11 }
  0xaf   : > { %v335_v17 = vpop.xlane.xlu1 %334 }
  0xb0   : > { %v378_v18 = vmul.f32 %v4453_v10, %v335_v17  ;;  %v338_v19 = vpop.xlane.xlu2 %337 }
  0xb1   : > { %v323_v20 = vpop.xlane.xlu0 %322  ;;  %v379_v36 = vmul.f32 %v4453_v10, %v338_v19 }
  0xb2   : > { %v374_v21 = vmul.f32 %v4453_v10, %v323_v20  ;;  %v472_v24 = vperm.slane %v378_v18, %v4464_v15 }
  0xb3   : > { %v474_v38 = vperm.slane %v379_v36, %v4460_v13 }
  0xb4   : > { %v465_v26 = vperm.slane %v374_v21, %v4464_v15  ;;  %v473_v27 = vsel %vm410_vm1, %v472_v24, %v471_v22 }
  0xb5   : > { %v475_v45 = vsel %vm414_vm2, %v474_v38, %v473_v27 }
  0xb6   : > { %v466_v28 = vsel %vm410_vm1, %v465_v26, %v464_v25 }
  0xb7   : > { %v468_v29 = vsel %vm414_vm2, %v467_v23, %v466_v28  ;;  %v347_v30 = vpop.xlane.xlu1 %346 }
  0xb8   : > { %v272_v32 = vpop.xlane.xlu2 %271  ;;  %v382_v0 = vmul.f32 %v4453_v10, %v347_v30 }
  0xb9   : > { %v344_v31 = vpop.xlane.xlu0 %343  ;;  %v407_v8 = vperm.slane %v272_v32, %v4456_v11 }
  0xba   : > { %v381_v1 = vmul.f32 %v4453_v10, %v344_v31  ;;  %v479_v4 = vperm.slane %v382_v0, %v4464_v15 }
  0xbc   : > { %v478_v5 = vperm.slane %v381_v1, %v4456_v11  ;;  %v530_v1 = vld [vmem:[%s6932_s2] sm:$0xf] }
  0xbd   : > { %4002 = vmatpush.msk.msra.mxu1 %vm499_vm10, %v530_v1 }
  0xbe   : > { %v480_v19 = vsel %vm410_vm1, %v479_v4, %v478_v5  ;;  %v583_v4 = vshrl.u32 %v405_v7, 7 }
  0xbf   : > { %v284_v33 = vpop.xlane.xlu1 %283 }
  0xc0   : > { %v287_v35 = vpop.xlane.xlu2 %286  ;;  %v420_v12 = vperm.slane %v284_v33, %v4456_v11  ;;  %4082 = vset.pattern.permute.xlu1 %v583_v4  ;;  %4080 = vset.pattern.permute.xlu2 %v583_v4 }
  0xc1   : > { %v275_v34 = vpop.xlane.xlu0 %274  ;;  %v421_v14 = vperm.slane %v287_v35, %v4464_v15 }
  0xc2   : > { %v409_v9 = vperm.slane %v275_v34, %v4464_v15 }
  0xc3   : > { %v422_v26 = vsel %vm410_vm1, %v421_v14, %v420_v12 }
  0xc4   : > { %v411_v22 = vsel %vm410_vm1, %v409_v9, %v407_v8 }
  0xc7   : > { %v341_v39 = vpop.xlane.xlu1 %340 }
  0xc8   : > { %v380_v40 = vmul.f32 %v4453_v10, %v341_v39  ;;  %v350_v42 = vpop.xlane.xlu2 %349 }
  0xc9   : > { %v329_v41 = vpop.xlane.xlu0 %328  ;;  %v383_v6 = vmul.f32 %v4453_v10, %v350_v42 }
  0xca   : > { %v376_v43 = vmul.f32 %v4453_v10, %v329_v41  ;;  %v476_v44 = vperm.slane %v380_v40, %v4479_v37 }
  0xcb   : > { %v481_v20 = vperm.slane %v383_v6, %v4460_v13 }
  0xcc   : > { %v469_v46 = vperm.slane %v376_v43, %v4479_v37  ;;  %v477_v47 = vsel %vm418_vm3, %v476_v44, %v475_v45 }
  0xcd   : > { %v482_v34 = vsel %vm414_vm2, %v481_v20, %v480_v19 }
  0xce   : > { %v470_v48 = vsel %vm418_vm3, %v469_v46, %v468_v29 }
  0xcf   : > { %v4489_v49 = vsel %vm492_vm4, %v477_v47, %v470_v48  ;;  %v359_v50 = vpop.xlane.xlu1 %358 }
  0xd0   : > { %v278_v52 = vpop.xlane.xlu2 %277  ;;  %v386_v16 = vmul.f32 %v4453_v10, %v359_v50 }
  0xd1   : > { %v356_v51 = vpop.xlane.xlu0 %355  ;;  %v413_v23 = vperm.slane %v278_v52, %v4460_v13 }
  0xd2   : > { %v385_v17 = vmul.f32 %v4453_v10, %v356_v51  ;;  %v486_v27 = vperm.slane %v386_v16, %v4464_v15 }
  0xd3   : > { %v415_v38 = vsel %vm414_vm2, %v413_v23, %v411_v22 }
  0xd4   : > { %v485_v30 = vperm.slane %v385_v17, %v4456_v11 }
  0xd6   : > { %v487_v45 = vsel %vm410_vm1, %v486_v27, %v485_v30  ;;  %v602_v30 = vadd.s32 24, %v583_v4 }
  0xd7   : > { %v296_v54 = vpop.xlane.xlu1 %295 }
  0xd8   : > { %v299_v56 = vpop.xlane.xlu2 %298  ;;  %v427_v31 = vperm.slane %v296_v54, %v4456_v11 }
  0xd9   : > { %v290_v55 = vpop.xlane.xlu0 %289  ;;  %v428_v33 = vperm.slane %v299_v56, %v4464_v15 }
  0xda   : > { %v423_v32 = vperm.slane %v290_v55, %v4460_v13 }
  0xdb   : > { %v429_v47 = vsel %vm410_vm1, %v428_v33, %v427_v31  ;;  %v934_v31 = vld [vmem:[#allocation5 + $0xf0] sm:$0xff]  ;;  %v932_v33 = vld [vmem:[#allocation5 + $0xe0] sm:$0xff] }
  0xdc   : > { %v424_v46 = vsel %vm414_vm2, %v423_v32, %v422_v26  ;;  %v4563_v32 = vand.u32 4294901760, %v934_v31 }
  0xde   : > { %1229 = vmatpush.msrb.mxu0 %v4563_v32  ;;  %1033 = vmatpush.msra.mxu2 %v4563_v32 }
  0xdf   : > { %v362_v60 = vpop.xlane.xlu1 %361 }
  0xe0   : > { %v281_v62 = vpop.xlane.xlu2 %280  ;;  %v387_v24 = vmul.f32 %v4453_v10, %v362_v60 }
  0xe1   : > { %v353_v61 = vpop.xlane.xlu0 %352  ;;  %v417_v41 = vperm.slane %v281_v62, %v4479_v37 }
  0xe2   : > { %v384_v25 = vmul.f32 %v4453_v10, %v353_v61 }
  0xe3   : > { %v419_v56 = vsel %vm418_vm3, %v417_v41, %v415_v38 }
  0xe4   : > { %v483_v39 = vperm.slane %v384_v25, %v4479_v37 }
  0xe7   : > { %v302_v63 = vpop.xlane.xlu1 %301 }
  0xe8   : > { %v308_v3 = vpop.xlane.xlu2 %307  ;;  %v430_v35 = vperm.slane %v302_v63, %v4460_v13 }
  0xe9   : > { %v293_v2 = vpop.xlane.xlu0 %292  ;;  %v434_v42 = vperm.slane %v308_v3, %v4456_v11 }
  0xea   : > { %v425_v36 = vperm.slane %v293_v2, %v4479_v37  ;;  %v431_v50 = vsel %vm414_vm2, %v430_v35, %v429_v47  ;;  %v4568_v35 = vand.u32 4294901760, %v932_v33 }
  0xec   : > { %v426_v51 = vsel %vm418_vm3, %v425_v36, %v424_v46  ;;  %v930_v36 = vld [vmem:[#allocation5 + $0xd0] sm:$0xff]  ;;  %1231 = vmatpush.msrb.mxu0 %v4568_v35  ;;  %1035 = vmatpush.msra.mxu2 %v4568_v35 }
  0xed   : > { %v442_v59 = vsel %vm441_vm6, %v426_v51, %v419_v56  ;;  %v922_v56 = vld [vmem:[#allocation5 + $0x90] sm:$0xff] }
  0xef   : > { %v365_v18 = vpop.xlane.xlu1 %364 }
  0xf0   : > { %v388_v28 = vmul.f32 %v4453_v10, %v365_v18  ;;  %v305_v29 = vpop.xlane.xlu2 %304  ;;  %v488_v10 = vperm.slane %v387_v24, %v4460_v13 }
  0xf1   : > { %v311_v21 = vpop.xlane.xlu0 %310  ;;  %v432_v40 = vperm.slane %v305_v29, %v4479_v37  ;;  %v596_v29 = vadd.s32 16, %v583_v4 }
  0xf2   : > { %v490_v43 = vperm.slane %v388_v28, %v4479_v37  ;;  %v435_v44 = vperm.slane %v311_v21, %v4464_v15  ;;  %v489_v11 = vsel %vm414_vm2, %v488_v10, %v487_v45  ;;  %v484_v15 = vsel %vm418_vm3, %v483_v39, %v482_v34  ;;  %v926_v45 = vld [vmem:[#allocation5 + $0xb0] sm:$0xff] }
  0xf3   : > { %v433_v54 = vsel %vm418_vm3, %v432_v40, %v431_v50  ;;  %v495_v62 = vsel %vm494_vm5, %v484_v15, %v4489_v49  ;;  %v590_v49 = vadd.s32 8, %v583_v4  ;;  %v4566_v34 = vsub.f32 %v934_v31, %v4563_v32  ;;  %v928_v40 = vld [vmem:[#allocation5 + $0xc0] sm:$0xff] }
  0xf4   : > { %v436_v57 = vsel %vm410_vm1, %v435_v44, %v434_v42  ;;  %v491_v58 = vsel %vm418_vm3, %v490_v43, %v489_v11  ;;  %v444_v61 = vsel %vm443_vm7, %v433_v54, %v442_v59  ;;  %v4574_v10 = vsub.f32 %v932_v33, %v4568_v35  ;;  %v908_v31 = vld [vmem:[#allocation5 + $0x20] sm:$0xff] }
  0xf5   : > { %v497_v63 = vsel %vm496_vm8, %v491_v58, %v495_v62  ;;  %4081 = vset.pattern.permute.xlu0 %v590_v49  ;;  %v1075_v38 = vand.u32 4294901760, %v4566_v34  ;;  %1176 = vmatpush.msrb.mxu1 %v4566_v34  ;;  %v4577_v39 = vand.u32 4294901760, %v930_v36  ;;  %v4589_v44 = vand.u32 4294901760, %v928_v40 }
  0xf6   : > { %v1081_v42 = vand.u32 4294901760, %v4574_v10  ;;  %v4602_v51 = vand.u32 4294901760, %v926_v45 }
  0xf7   : > { %v317_v48 = vpop.xlane.xlu1 %316  ;;  %v1076_v41 = vsub.f32 %v4566_v34, %v1075_v38  ;;  %v4586_v43 = vsub.f32 %v930_v36, %v4577_v39  ;;  %1179 = vmatpush.msrb.mxu1 %v4574_v10  ;;  %1233 = vmatpush.msrb.mxu0 %v4577_v39  ;;  %v4598_v50 = vsub.f32 %v928_v40, %v4589_v44 }
  0xf8   : > { %v439_v53 = vperm.slane %v317_v48, %v4479_v37  ;;  %1037 = vmatpush.msra.mxu2 %v4577_v39  ;;  %v1082_v47 = vsub.f32 %v4574_v10, %v1081_v42 }
  0xf9   : > { %v314_v52 = vpop.xlane.xlu0 %313  ;;  %v1077_v46 = vand.u32 4294901760, %v1076_v41  ;;  %v1087_v48 = vand.u32 4294901760, %v4586_v43  ;;  %1182 = vmatpush.msrb.mxu1 %v4586_v43  ;;  %1235 = vmatpush.msrb.mxu0 %v4589_v44  ;;  %v1093_v15 = vand.u32 4294901760, %v4598_v50  ;;  %v4696_v41 = vand.u32 4294901760, %v908_v31 }
  0xfa   : > { %v437_v55 = vperm.slane %v314_v52, %v4460_v13  ;;  %v924_v52 = vld [vmem:[#allocation5 + $0xa0] sm:$0xff]  ;;  %1039 = vmatpush.msra.mxu2 %v4589_v44 }
  0xfb   : > { %1078 = vmatpush.msra.mxu3 %v1077_v46  ;;  %v1088_v11 = vsub.f32 %v4586_v43, %v1087_v48  ;;  %1185 = vmatpush.msrb.mxu1 %v4598_v50  ;;  %v4610_v54 = vand.u32 4294901760, %v924_v52  ;;  %v1094_v58 = vsub.f32 %v4598_v50, %v1093_v15  ;;  %v906_v46 = vld [vmem:[#allocation5 + $0x10] sm:$0xff] }
  0xfc   : > { %v438_v37 = vsel %vm414_vm2, %v437_v55, %v436_v57  ;;  %v4613_v55 = vsub.f32 %v926_v45, %v4602_v51  ;;  %1237 = vmatpush.msrb.mxu0 %v4602_v51  ;;  %1041 = vmatpush.msra.mxu2 %v4602_v51 }
  0xfd   : > { %v440_v60 = vsel %vm418_vm3, %v439_v53, %v438_v37  ;;  %v1083_v53 = vand.u32 4294901760, %v1082_v47  ;;  %v1089_v57 = vand.u32 4294901760, %v1088_v11  ;;  %v4622_v37 = vsub.f32 %v924_v52, %v4610_v54 }
  0xfe   : > { %v446_v13 = vsel %vm445_vm9, %v440_v60, %v444_v61  ;;  %v1099_v59 = vand.u32 4294901760, %v4613_v55  ;;  %1188 = vmatpush.msrb.mxu1 %v4613_v55  ;;  %v4625_v60 = vand.u32 4294901760, %v922_v56  ;;  %v920_v61 = vld [vmem:[#allocation5 + $0x80] sm:$0xff]  ;;  %1239 = vmatpush.msrb.mxu0 %v4610_v54  ;;  %v1095_v62 = vand.u32 4294901760, %v1094_v58 }
  0xff   : > { %v500_v0 = vsel %vm499_vm10, %v446_v13, %v497_v63  ;;  %1084 = vmatpush.msra.mxu3 %v1083_v53  ;;  %v4628_v13 = vand.u32 4294901760, %v920_v61  ;;  %1043 = vmatpush.msra.mxu2 %v4610_v54  ;;  %v904_v58 = vld [vmem:[#allocation5] sm:$0xff] }
 0x100   : > { %4001 = vmatmul.msk.f32.vlgmr.msra.gmra.mxu0 %vm505_vm11, %v500_v0  ;;  %v1100_v63 = vsub.f32 %v4613_v55, %v1099_v59  ;;  %v1105_v0 = vand.u32 4294901760, %v4622_v37  ;;  %v4636_v1 = vsub.f32 %v922_v56, %v4625_v60  ;;  %1191 = vmatpush.msrb.mxu1 %v4622_v37  ;;  %v4708_v56 = vsub.f32 %v908_v31, %v4696_v41 }
 0x101   : > { %1090 = vmatpush.msra.mxu3 %v1089_v57  ;;  %1241 = vmatpush.msrb.mxu0 %v4625_v60  ;;  %v4710_v57 = vand.u32 4294901760, %v906_v46 }
 0x102   : > { %1045 = vmatpush.msra.mxu2 %v4625_v60  ;;  %1194 = vmatpush.msrb.mxu1 %v4636_v1 }
 0x103   : > { %1096 = vmatpush.msra.mxu3 %v1095_v62  ;;  %1243 = vmatpush.msrb.mxu0 %v4628_v13 }
 0x104   : > { %1047 = vmatpush.msra.mxu2 %v4628_v13 }
 0x17d   : > { %v526_v2 = vpop.f32.mrf.mxu0 }
 0x17e   : > { %v529_v3 = vmax.f32 %v526_v2, 0.0  ;;  %v918_v2 = vld [vmem:[#allocation5 + $0x70] sm:$0xff] }
 0x180   : > { %4003 = vmatmul.msk.f32.vlgmr.msra.gmra.mxu1 %vm531_vm12, %v529_v3  ;;  %v4641_v3 = vsub.f32 %v920_v61, %v4628_v13  ;;  %vm3801_vm12 = vcmask 1040384  }
 0x182   : > { %1197 = vmatpush.msrb.mxu1 %v4641_v3 }
 0x1fd   : > { %v555_v5 = vpop.f32.mrf.mxu1 }
 0x1fe   : > { %v559_v6 = vrot.slane %v555_v5, 4 }
 0x200   : > { %v561_v8 = vadd.f32 %v559_v6, %v555_v5  ;;  %v1106_v5 = vsub.f32 %v4622_v37, %v1105_v0  ;;  %v1111_v6 = vand.u32 4294901760, %v4636_v1 }
 0x202   : > { %v4004_v9 = vmul.f32 -1.442695, %v561_v8  ;;  %v916_v8 = vld [vmem:[#allocation5 + $0x60] sm:$0xff] }
 0x204   : > { %4096 = vpow2.f32 %v4004_v9  ;;  %v1117_v9 = vand.u32 4294901760, %v4641_v3 }
 0x20a   : > { %v4097_v12 = vpop.eup %4096 }
 0x20b   : > { %v565_v14 = vadd.f32 1.0, %v4097_v12 }
 0x20d   : > { %4098 = vrcp.f32 %v565_v14  ;;  %v577_v19 = vand.u32 2147483648, %v565_v14  ;;  %v575_v21 = vand.u32 2147483647, %v565_v14  ;;  %vm571_vm14 = vweird.f32 %v565_v14 }
 0x20f   : > { %v578_v22 = vor.u32 1.1754944e-38, %v577_v19  ;;  %vm576_vm0 = vcmp.eq.f32.partialorder %v575_v21, 8.507059e+37  ;;  %v912_v21 = vld [vmem:[#allocation5 + $0x40] sm:$0xff] }
 0x213   : > { %v4099_v16 = vpop.eup %4098 }
 0x214   : > { %v567_v17 = vmul.f32 %v4099_v16, %v565_v14  ;;  %vm572_vm13 = vweird.f32 %v4099_v16  ;;  %v4657_v14 = vand.u32 4294901760, %v916_v8 }
 0x215   : > { %vm573_vm15 = vmor %vm571_vm14, %vm572_vm13 }
 0x216   : > { %v568_v18 = vsub.f32 1.0, %v567_v17  ;;  %v1112_v17 = vsub.f32 %v4636_v1, %v1111_v6 }
 0x218   : > { %v569_v20 = vmul.f32 %v4099_v16, %v568_v18  ;;  %v1118_v18 = vsub.f32 %v4641_v3, %v1117_v9  ;;  %v948_v3 = vld [vmem:[#allocation5 + $0x160] sm:$0xff] }
 0x21a   : > { %v570_v7 = vadd.f32 %v4099_v16, %v569_v20  ;;  %v914_v20 = vld [vmem:[#allocation5 + $0x50] sm:$0xff] }
 0x21c   : > { %v574_v23 = vsel %vm573_vm15, %v4099_v16, %v570_v7  ;;  %v1107_v16 = vand.u32 4294901760, %v1106_v5  ;;  %v1113_v7 = vand.u32 4294901760, %v1112_v17  ;;  %v6938_v5 = vand.u32 4294901760, %v4708_v56 }
 0x21d   : > { %v579_v24 = vsel %vm576_vm0, %v578_v22, %v574_v23  ;;  %v1119_v22 = vand.u32 4294901760, %v1118_v18 }
 0x21e   : > { %v606_v25 = vperm.slane %v579_v24, 1  ;;  %v581_v26 = vperm.slane %v579_v24, 0  ;;  %v631_v27 = vperm.slane %v579_v24, 2  ;;  %v656_v28 = vperm.slane %v579_v24, 3 }
 0x21f   : > { %v4673_v24 = vsub.f32 %v916_v8, %v4657_v14  ;;  %v4728_v8 = vsub.f32 %v906_v46, %v4710_v57 }
 0x220   : > { %611 = vperm.xlu1 %4082, %v606_v25   ;;  %592 = vperm.xlu0 %4081, %v581_v26  }
 0x221   : > { %586 = vperm.xlu2 %4080, %v581_v26  }
 0x228   : > { %4085 = vset.pattern.permute.xlu1 %v590_v49  ;;  %4088 = vset.pattern.permute.xlu0 %v583_v4 }
 0x229   : > { %4083 = vset.pattern.permute.xlu2 %v590_v49 }
 0x230   : > { %642 = vperm.xlu1 %4085, %v631_v27   ;;  %661 = vperm.xlu0 %4088, %v656_v28  }
 0x231   : > { %617 = vperm.xlu2 %4083, %v606_v25  }
 0x238   : > { %4087 = vset.pattern.permute.xlu1 %v596_v29  ;;  %4092 = vset.pattern.permute.xlu0 %v596_v29 }
 0x239   : > { %4084 = vset.pattern.permute.xlu2 %v583_v4  ;;  %v4643_v4 = vand.u32 4294901760, %v918_v2 }
 0x23b   : > { %v4654_v12 = vsub.f32 %v918_v2, %v4643_v4  ;;  %1245 = vmatpush.msrb.mxu0 %v4643_v4  ;;  %1049 = vmatpush.msra.mxu2 %v4643_v4  ;;  %v966_v2 = vld [vmem:[#allocation5 + $0x1f0] sm:$0xff] }
 0x23d   : > { %v1123_v19 = vand.u32 4294901760, %v4654_v12  ;;  %1200 = vmatpush.msrb.mxu1 %v4654_v12  ;;  %1247 = vmatpush.msrb.mxu0 %v4657_v14 }
 0x23e   : > { %1051 = vmatpush.msra.mxu2 %v4657_v14 }
 0x23f   : > { %v1124_v23 = vsub.f32 %v4654_v12, %v1123_v19  ;;  %1203 = vmatpush.msrb.mxu1 %v4673_v24  ;;  %v946_v12 = vld [vmem:[#allocation5 + $0x150] sm:$0xff] }
 0x240   : > { %623 = vperm.xlu1 %4087, %v606_v25   ;;  %673 = vperm.xlu0 %4092, %v656_v28  }
 0x241   : > { %636 = vperm.xlu2 %4084, %v631_v27  }
 0x248   : > { %648 = vperm.xlu1 %4087, %v631_v27   ;;  %4093 = vset.pattern.permute.xlu0 %v602_v30 }
 0x249   : > { %4086 = vset.pattern.permute.xlu2 %v596_v29  ;;  %v1125_v29 = vand.u32 4294901760, %v1124_v23 }
 0x250   : > { %4091 = vset.pattern.permute.xlu1 %v602_v30 }
 0x251   : > { %598 = vperm.xlu2 %4086, %v581_v26  }
 0x258   : > { %629 = vperm.xlu1 %4091, %v606_v25   ;;  %v910_v25 = vld [vmem:[#allocation5 + $0x30] sm:$0xff] }
 0x259   : > { %4089 = vset.pattern.permute.xlu2 %v590_v49  ;;  %v1101_v49 = vand.u32 4294901760, %v1100_v63  ;;  %v4721_v63 = vand.u32 4294901760, %v904_v58 }
 0x25b   : > { %1102 = vmatpush.msra.mxu3 %v1101_v49 }
 0x25d   : > { %1108 = vmatpush.msra.mxu3 %v1107_v16  ;;  %v4731_v16 = vand.u32 4294901760, %v966_v2 }
 0x25f   : > { %1114 = vmatpush.msra.mxu3 %v1113_v7  ;;  %v6936_v7 = vand.u32 4294901760, %v4728_v8 }
 0x260   : > { %679 = vperm.xlu1 %4091, %v656_v28  }
 0x261   : > { %667 = vperm.xlu2 %4089, %v656_v28   ;;  %v4681_v28 = vand.u32 4294901760, %v910_v25  ;;  %1120 = vmatpush.msra.mxu3 %v1119_v22 }
 0x263   : > { %v4693_v40 = vsub.f32 %v910_v25, %v4681_v28  ;;  %1126 = vmatpush.msra.mxu3 %v1125_v29  ;;  %v4749_v29 = vsub.f32 %v966_v2, %v4731_v16 }
 0x265   : > { %v1147_v11 = vand.u32 4294901760, %v4693_v40  ;;  %v6937_v2 = vand.u32 4294901760, %v4749_v29 }
 0x267   : > { %v1148_v49 = vsub.f32 %v4693_v40, %v1147_v11 }
 0x269   : > { %4090 = vset.pattern.permute.xlu2 %v602_v30  ;;  %v1129_v30 = vand.u32 4294901760, %v4673_v24  ;;  %v1149_v22 = vand.u32 4294901760, %v1148_v49 }
 0x26b   : > { %v1130_v45 = vsub.f32 %v4673_v24, %v1129_v30 }
 0x26d   : > { %v1131_v53 = vand.u32 4294901760, %v1130_v45  ;;  %v1160_v45 = vsub.f32 %v4728_v8, %v6936_v7 }
 0x26f   : > { %1132 = vmatpush.msra.mxu3 %v1131_v53  ;;  %v964_v53 = vld [vmem:[#allocation5 + $0x1e0] sm:$0xff] }
 0x271   : > { %604 = vperm.xlu2 %4090, %v581_v26   ;;  %v4677_v26 = vand.u32 4294901760, %v914_v20 }
 0x273   : > { %v4687_v33 = vsub.f32 %v914_v20, %v4677_v26  ;;  %1249 = vmatpush.msrb.mxu0 %v4677_v26  ;;  %1053 = vmatpush.msra.mxu2 %v4677_v26  ;;  %v4735_v20 = vsub.f32 %v904_v58, %v4721_v63  ;;  %v1161_v58 = vand.u32 4294901760, %v1160_v45  ;;  %v1417_v45 = vsub.f32 %v4749_v29, %v6937_v2 }
 0x275   : > { %v1135_v47 = vand.u32 4294901760, %v4687_v33  ;;  %1206 = vmatpush.msrb.mxu1 %v4687_v33  ;;  %v6935_v23 = vand.u32 4294901760, %v4735_v20 }
 0x277   : > { %v1136_v61 = vsub.f32 %v4687_v33, %v1135_v47  ;;  %v1166_v46 = vsub.f32 %v4735_v20, %v6935_v23  ;;  %v4111_v33 = vld [vmem:[%s4411_s7 + $0x8] sm:$0xff] }
 0x279   : > { %654 = vperm.xlu2 %4090, %v631_v27   ;;  %v4679_v27 = vand.u32 4294901760, %v912_v21  ;;  %v1137_v17 = vand.u32 4294901760, %v1136_v61  ;;  %v4760_v61 = vand.u32 4294901760, %v964_v53 }
 0x27b   : > { %v4690_v36 = vsub.f32 %v912_v21, %v4679_v27  ;;  %1251 = vmatpush.msrb.mxu0 %v4679_v27  ;;  %1055 = vmatpush.msra.mxu2 %v4679_v27  ;;  %v1154_v21 = vsub.f32 %v4708_v56, %v6938_v5  ;;  %v4745_v25 = vpop.permute.xlu2 %586  ;;  %v958_v5 = vld [vmem:[#allocation5 + $0x1b0] sm:$0xff] }
 0x27c   : > { %1138 = vmatpush.msra.mxu3 %v1137_v17 }
 0x27d   : > { %v1141_v52 = vand.u32 4294901760, %v4690_v36  ;;  %1209 = vmatpush.msrb.mxu1 %v4690_v36  ;;  %1253 = vmatpush.msrb.mxu0 %v4681_v28  ;;  %v1155_v31 = vand.u32 4294901760, %v1154_v21  ;;  %v4770_v21 = vsub.f32 %v964_v53, %v4760_v61  ;;  %v1418_v53 = vand.u32 4294901760, %v1417_v45 }
 0x27e   : > { %1057 = vmatpush.msra.mxu2 %v4681_v28 }
 0x27f   : > { %v1142_v62 = vsub.f32 %v4690_v36, %v1141_v52  ;;  %1212 = vmatpush.msrb.mxu1 %v4693_v40  ;;  %1255 = vmatpush.msrb.mxu0 %v4696_v41  ;;  %v4113_v36 = vld [vmem:[%s4411_s7 + $0x40] sm:$0xff] }
 0x280   : > { %1059 = vmatpush.msra.mxu2 %v4696_v41 }
 0x281   : > { %v1143_v18 = vand.u32 4294901760, %v1142_v62  ;;  %1215 = vmatpush.msrb.mxu1 %v4708_v56  ;;  %1257 = vmatpush.msrb.mxu0 %v4710_v57  ;;  %v962_v62 = vld [vmem:[#allocation5 + $0x1d0] sm:$0xff] }
 0x282   : > { %1061 = vmatpush.msra.mxu2 %v4710_v57  ;;  %v4765_v49 = vand.u32 4294901760, %v962_v62 }
 0x283   : > { %1144 = vmatpush.msra.mxu3 %v1143_v18  ;;  %1218 = vmatpush.msrb.mxu1 %v4728_v8  ;;  %v1167_v18 = vand.u32 4294901760, %v1166_v46 }
 0x284   : > { %1259 = vmatpush.msrb.mxu0 %v4721_v63  ;;  %1063 = vmatpush.msra.mxu2 %v4721_v63  ;;  %v4780_v7 = vsub.f32 %v962_v62, %v4765_v49 }
 0x285   : > { %1150 = vmatpush.msra.mxu3 %v1149_v22  ;;  %1221 = vmatpush.msrb.mxu1 %v4735_v20  ;;  %v960_v22 = vld [vmem:[#allocation5 + $0x1c0] sm:$0xff] }
 0x286   : > { %v4777_v23 = vand.u32 4294901760, %v960_v22  ;;  %1270 = vmatpush.msrb.mxu2 %v1075_v38  ;;  %v6948_v2 = vand.u32 4294901760, %v4780_v7  ;;  %1419 = vmatpush.msra.mxu0 %v1418_v53 }
 0x287   : > { %1374 = vmatpush.msra.mxu1 %v4731_v16  ;;  %1156 = vmatpush.msra.mxu3 %v1155_v31  ;;  %v6949_v31 = vand.u32 4294901760, %v4770_v21 }
 0x288   : > { %1274 = vmatpush.msrb.mxu2 %v1081_v42  ;;  %v1429_v34 = vsub.f32 %v4780_v7, %v6948_v2  ;;  %v4799_v38 = vsub.f32 %v960_v22, %v4777_v23 }
 0x289   : > { %1376 = vmatpush.msra.mxu1 %v4760_v61  ;;  %1162 = vmatpush.msra.mxu3 %v1161_v58  ;;  %v1423_v62 = vsub.f32 %v4770_v21, %v6949_v31  ;;  %v4802_v58 = vand.u32 4294901760, %v958_v5 }
 0x28a   : > { %v6947_v10 = vand.u32 4294901760, %v4799_v38  ;;  %1278 = vmatpush.msrb.mxu2 %v1087_v48  ;;  %v1430_v42 = vand.u32 4294901760, %v1429_v34  ;;  %v4878_v34 = vand.u32 4294901760, %v948_v3 }
 0x28b   : > { %v4785_v46 = vpop.permute.xlu2 %617  ;;  %1378 = vmatpush.msra.mxu1 %v4765_v49  ;;  %1168 = vmatpush.msra.mxu3 %v1167_v18  ;;  %v1424_v18 = vand.u32 4294901760, %v1423_v62  ;;  %v4829_v50 = vsub.f32 %v958_v5, %v4802_v58  ;;  %v950_v5 = vld [vmem:[#allocation5 + $0x170] sm:$0xff] }
 0x28c   : > { %v1435_v22 = vsub.f32 %v4799_v38, %v6947_v10  ;;  %1282 = vmatpush.msrb.mxu2 %v1093_v15  ;;  %v954_v15 = vld [vmem:[#allocation5 + $0x190] sm:$0xff]  ;;  %v4867_v53 = vand.u32 4294901760, %v950_v5  ;;  %7116 = vst [vmem:[#allocation13_spill] sm:$0xff] %v4878_v34 }
 0x28d   : > { %1337 = vmatpush.msrb.mxu3 %v4563_v32  ;;  %1380 = vmatpush.msra.mxu1 %v4777_v23  ;;  %v4838_v55 = vand.u32 4294901760, %v954_v15 }
 0x28e   : > { %1425 = vmatpush.msra.mxu0 %v1424_v18  ;;  %v1436_v43 = vand.u32 4294901760, %v1435_v22  ;;  %1286 = vmatpush.msrb.mxu2 %v1099_v59  ;;  %v952_v59 = vld [vmem:[#allocation5 + $0x180] sm:$0xff]  ;;  %7114 = vst [vmem:[#allocation11_spill] sm:$0xff] %v4867_v53  ;;  %v4884_v24 = vsub.f32 %v950_v5, %v4867_v53 }
 0x28f   : > { %1339 = vmatpush.msrb.mxu3 %v4568_v35  ;;  %1382 = vmatpush.msra.mxu1 %v4802_v58  ;;  %v4853_v1 = vand.u32 4294901760, %v952_v59  ;;  %v944_v18 = vld [vmem:[#allocation5 + $0x140] sm:$0xff] }
 0x290   : > { %1431 = vmatpush.msra.mxu0 %v1430_v42  ;;  %1290 = vmatpush.msrb.mxu2 %v1105_v0  ;;  %7117 = vst [vmem:[#allocation14_spill] sm:$0xff] %v4884_v24 }
 0x291   : > { %1341 = vmatpush.msrb.mxu3 %v4577_v39  ;;  %v956_v39 = vld [vmem:[#allocation5 + $0x1a0] sm:$0xff]  ;;  %v4876_v62 = vsub.f32 %v952_v59, %v4853_v1 }
 0x292   : > { %v4767_v17 = vpop.permute.xlu1 %611  ;;  %1437 = vmatpush.msra.mxu0 %v1436_v43  ;;  %v4826_v48 = vand.u32 4294901760, %v956_v39  ;;  %1294 = vmatpush.msrb.mxu2 %v1111_v6  ;;  %v4856_v6 = vsub.f32 %v954_v15, %v4838_v55  ;;  %v4110_v15 = vld [vmem:[%s4411_s7] sm:$0xff] }
 0x293   : > { %1343 = vmatpush.msrb.mxu3 %v4589_v44  ;;  %7115 = vst [vmem:[#allocation12_spill] sm:$0xff] %v4876_v62  ;;  %v6940_v43 = vand.u32 4294901760, %v4876_v62  ;;  %v4901_v59 = vmul.f32 %v4110_v15, %v4745_v25 }
 0x294   : > { %1384 = vmatpush.msra.mxu1 %v4826_v48  ;;  %1298 = vmatpush.msrb.mxu2 %v1117_v9  ;;  %v6942_v45 = vand.u32 4294901760, %v4856_v6 }
 0x295   : > { %1345 = vmatpush.msrb.mxu3 %v4602_v51  ;;  %v6946_v51 = vand.u32 4294901760, %v4829_v50  ;;  %7121 = vst [vmem:[#allocation18_spill] sm:$0xff] %v4901_v59 }
 0x296   : > { %1386 = vmatpush.msra.mxu1 %v4838_v55  ;;  %1302 = vmatpush.msrb.mxu2 %v1123_v19  ;;  %v1453_v19 = vsub.f32 %v4856_v6, %v6942_v45  ;;  %v4117_v45 = vld [vmem:[%s4411_s7 + $0x18] sm:$0xff] }
 0x297   : > { %1347 = vmatpush.msrb.mxu3 %v4610_v54  ;;  %v4841_v54 = vsub.f32 %v956_v39, %v4826_v48  ;;  %v1441_v0 = vsub.f32 %v4829_v50, %v6946_v51  ;;  %v4897_v39 = vand.u32 4294901760, %v944_v18 }
 0x298   : > { %1388 = vmatpush.msra.mxu1 %v4853_v1  ;;  %1306 = vmatpush.msrb.mxu2 %v1129_v30  ;;  %v4886_v30 = vand.u32 4294901760, %v946_v12  ;;  %v1454_v22 = vand.u32 4294901760, %v1453_v19  ;;  %v4114_v19 = vld [vmem:[%s4411_s7 + $0x48] sm:$0xff] }
 0x299   : > { %1349 = vmatpush.msrb.mxu3 %v4625_v60  ;;  %v6943_v60 = vand.u32 4294901760, %v4841_v54  ;;  %v1442_v9 = vand.u32 4294901760, %v1441_v0  ;;  %7120 = vst [vmem:[#allocation17_spill] sm:$0xff] %v4897_v39  ;;  %v6939_v0 = vand.u32 4294901760, %v4884_v24 }
 0x29a   : > { %1390 = vmatpush.msra.mxu1 %v4867_v53  ;;  %7118 = vst [vmem:[#allocation15_spill] sm:$0xff] %v4886_v30  ;;  %1310 = vmatpush.msrb.mxu2 %v1135_v47  ;;  %v4905_v47 = vmul.f32 %v4111_v33, %v4745_v25  ;;  %v4910_v5 = vsub.f32 %v946_v12, %v4886_v30 }
 0x29b   : > { %v4817_v35 = vpop.permute.xlu2 %636  ;;  %1351 = vmatpush.msrb.mxu3 %v4628_v13  ;;  %v1447_v13 = vsub.f32 %v4841_v54, %v6943_v60  ;;  %1443 = vmatpush.msra.mxu0 %v1442_v9  ;;  %v4112_v9 = vld [vmem:[%s4411_s7 + $0x50] sm:$0xff]  ;;  %v1459_v25 = vsub.f32 %v4876_v62, %v6940_v43  ;;  %v4926_v12 = vsub.f32 %v944_v18, %v4897_v39  ;;  %v4941_v18 = vld [vmem:[#allocation5 + $0x120] sm:$0xff] }
 0x29c   : > { %1392 = vmatpush.msra.mxu1 %v4878_v34  ;;  %7122 = vst [vmem:[#allocation19_spill] sm:$0xff] %v4905_v47  ;;  %1314 = vmatpush.msrb.mxu2 %v1141_v52  ;;  %v4930_v52 = vmul.f32 %v4113_v36, %v4767_v17  ;;  %v1465_v15 = vsub.f32 %v4884_v24, %v6939_v0  ;;  %v6945_v33 = vand.u32 4294901760, %v4910_v5  ;;  %v4116_v43 = vld [vmem:[%s4411_s7 + $0x10] sm:$0xff] }
 0x29d   : > { %1353 = vmatpush.msrb.mxu3 %v4643_v4  ;;  %v1448_v4 = vand.u32 4294901760, %v1447_v13  ;;  %7123 = vst [vmem:[#allocation20_spill] sm:$0xff] %v4910_v5  ;;  %v4918_v13 = vmul.f32 %v4112_v9, %v4785_v46  ;;  %v1460_v9 = vand.u32 4294901760, %v1459_v25 }
 0x29e   : > { %1394 = vmatpush.msra.mxu1 %v4886_v30  ;;  %7125 = vst [vmem:[#allocation22_spill] sm:$0xff] %v4926_v12  ;;  %1318 = vmatpush.msrb.mxu2 %v1147_v11  ;;  %v1466_v11 = vand.u32 4294901760, %v1465_v15  ;;  %v1477_v25 = vsub.f32 %v4910_v5, %v6945_v33  ;;  %v4974_v15 = vand.u32 4294901760, %v4941_v18  ;;  %v4120_v33 = vld [vmem:[%s4411_s7 + $0x28] sm:$0xff]  ;;  %v4134_v30 = vld [vmem:[%s4411_s7 + $0x80] sm:$0xff] }
 0x29f   : > { %1355 = vmatpush.msrb.mxu3 %v4657_v14  ;;  %1449 = vmatpush.msra.mxu0 %v1448_v4  ;;  %7124 = vst [vmem:[#allocation21_spill] sm:$0xff] %v4918_v13  ;;  %v593_v4 = vpop.permute.xlu0 %592  ;;  %v5073_v24 = vmul.f32 %v4134_v30, %v4817_v35 }
 0x2a0   : > { %7126 = vst [vmem:[#allocation23_spill] sm:$0xff] %v4930_v52  ;;  %1396 = vmatpush.msra.mxu1 %v4897_v39  ;;  %v4958_v40 = vmul.f32 %v4116_v43, %v593_v4  ;;  %v4967_v60 = vmul.f32 %v4117_v45, %v593_v4  ;;  %v4118_v45 = vld [vmem:[%s4411_s7 + $0x20] sm:$0xff]  ;;  %v1478_v2 = vand.u32 4294901760, %v1477_v25 }
 0x2a1   : > { %1357 = vmatpush.msrb.mxu3 %v4677_v26  ;;  %v4895_v26 = vsub.f32 %v948_v3, %v4878_v34  ;;  %v4912_v3 = vld [vmem:[#allocation5 + $0x130] sm:$0xff]  ;;  %1455 = vmatpush.msra.mxu0 %v1454_v22  ;;  %v4934_v22 = vmul.f32 %v4114_v19, %v4767_v17  ;;  %v4115_v19 = vld [vmem:[%s4411_s7 + $0x58] sm:$0xff]  ;;  %7133 = vst [vmem:[#allocation29_spill] sm:$0xff] %v4974_v15 }
 0x2a2   : > { %v4808_v32 = vpop.permute.xlu1 %642  ;;  %v4950_v36 = vand.u32 4294901760, %v4912_v3  ;;  %v4955_v0 = vmul.f32 %v4115_v19, %v4785_v46  ;;  %7130 = vst [vmem:[#allocation27_spill] sm:$0xff] %v4958_v40  ;;  %v7136_v19 = vand.u32 4294901760, %v4728_v8  ;;  %v713_v8 = vmax.f32 %v4901_v59, %v4958_v40 }
 0x2a3   : > { %7119 = vst [vmem:[#allocation16_spill] sm:$0xff] %v4895_v26  ;;  %1359 = vmatpush.msrb.mxu3 %v4679_v27  ;;  %v6941_v27 = vand.u32 4294901760, %v4895_v26  ;;  %1461 = vmatpush.msra.mxu0 %v1460_v9  ;;  %v722_v25 = vmax.f32 %v4905_v47, %v4967_v60  ;;  %v4132_v47 = vld [vmem:[%s4411_s7 + $0xe0] sm:$0xff] }
 0x2a4   : > { %7127 = vst [vmem:[#allocation24_spill] sm:$0xff] %v4934_v22  ;;  %1398 = vmatpush.msra.mxu1 %v4950_v36 }
 0x2a5   : > { %1361 = vmatpush.msrb.mxu3 %v4681_v28  ;;  %v1471_v17 = vsub.f32 %v4895_v26, %v6941_v27  ;;  %7128 = vst [vmem:[#allocation25_spill] sm:$0xff] %v4950_v36  ;;  %v6944_v28 = vand.u32 4294901760, %v4926_v12  ;;  %v7131_v27 = vand.u32 4294901760, %v4708_v56  ;;  %v731_v56 = vmax.f32 %v4930_v52, %v4918_v13  ;;  %1467 = vmatpush.msra.mxu0 %v1466_v11 }
 0x2a6   : > { %7129 = vst [vmem:[#allocation26_spill] sm:$0xff] %v4955_v0  ;;  %1400 = vmatpush.msra.mxu1 %v4974_v15  ;;  %v7141_v11 = vand.u32 4294901760, %v4735_v20 }
 0x2a7   : > { %1363 = vmatpush.msrb.mxu3 %v4696_v41  ;;  %1322 = vmatpush.msrb.mxu2 %v7131_v27  ;;  %7132 = vst [vmem:[#allocation28_spill] sm:$0xff] %v4967_v60  ;;  %v1472_v46 = vand.u32 4294901760, %v1471_v17  ;;  %v1483_v43 = vsub.f32 %v4926_v12, %v6944_v28  ;;  %v4976_v41 = vld [vmem:[#allocation5 + $0x110] sm:$0xff]  ;;  %v4119_v27 = vld [vmem:[%s4411_s7 + $0x60] sm:$0xff]  ;;  %v740_v28 = vmax.f32 %v4934_v22, %v4955_v0  ;;  %v4125_v22 = vld [vmem:[%s4411_s7 + $0x38] sm:$0xff]  ;;  %v662_v12 = vpop.permute.xlu0 %661 }
 0x2a8   : > { %7152 = vst [vmem:[#allocation46_spill] sm:$0xff] %v5073_v24 }
 0x2a9   : > { %1365 = vmatpush.msrb.mxu3 %v4710_v57  ;;  %1326 = vmatpush.msrb.mxu2 %v7136_v19  ;;  %v5002_v57 = vld [vmem:[#allocation5 + $0x100] sm:$0xff]  ;;  %v4122_v19 = vld [vmem:[%s4411_s7 + $0x70] sm:$0xff] }
 0x2aa   : > { %1473 = vmatpush.msra.mxu0 %v1472_v46  ;;  %v5030_v20 = vand.u32 4294901760, %v5002_v57 }
 0x2ab   : > { %v4845_v37 = vpop.permute.xlu2 %598  ;;  %1367 = vmatpush.msrb.mxu3 %v4721_v63  ;;  %1330 = vmatpush.msrb.mxu2 %v7141_v11 }
 0x2ac   : > { %v4982_v4 = vmul.f32 %v4118_v45, %v4845_v37  ;;  %v4995_v51 = vmul.f32 %v4120_v33, %v4845_v37  ;;  %v4121_v45 = vld [vmem:[%s4411_s7 + $0x68] sm:$0xff]  ;;  %v4123_v37 = vld [vmem:[%s4411_s7 + $0x30] sm:$0xff]  ;;  %1479 = vmatpush.msra.mxu0 %v1478_v2 }
 0x2ae   : > { %7134 = vst [vmem:[#allocation30_spill] sm:$0xff] %v4982_v4  ;;  %v714_v63 = vmax.f32 %v713_v8, %v4982_v4  ;;  %v4126_v8 = vld [vmem:[%s4411_s7 + $0xd0] sm:$0xff] }
 0x2af   : > { %7137 = vst [vmem:[#allocation32_spill] sm:$0xff] %v4995_v51 }
 0x2b2   : > { %v4831_v44 = vpop.permute.xlu1 %623 }
 0x2b3   : > { %v4986_v9 = vmul.f32 %v4119_v27, %v4831_v44  ;;  %v4999_v10 = vmul.f32 %v4121_v45, %v4831_v44  ;;  %v5014_v44 = vand.u32 4294901760, %v4976_v41  ;;  %v4124_v45 = vld [vmem:[%s4411_s7 + $0x78] sm:$0xff] }
 0x2b5   : > { %7135 = vst [vmem:[#allocation31_spill] sm:$0xff] %v4986_v9  ;;  %v732_v5 = vmax.f32 %v731_v56, %v4986_v9  ;;  %1402 = vmatpush.msra.mxu1 %v5014_v44 }
 0x2b6   : > { %7138 = vst [vmem:[#allocation33_spill] sm:$0xff] %v4999_v10 }
 0x2b7   : > { %1404 = vmatpush.msra.mxu1 %v5030_v20 }
 0x2ba   : > { %v4880_v14 = vpop.permute.xlu1 %648 }
 0x2bb   : > { %v4890_v42 = vpop.permute.xlu2 %667 }
 0x2bc   : > { %v5041_v11 = vmul.f32 %v4126_v8, %v4890_v42 }
 0x2be   : > { %7144 = vst [vmem:[#allocation38_spill] sm:$0xff] %v5041_v11 }
 0x2ca   : > { %v630_v17 = vpop.permute.xlu1 %629 }
 0x2cb   : > { %v605_v27 = vpop.permute.xlu2 %604  ;;  %v5007_v31 = vmul.f32 %v4122_v19, %v630_v17  ;;  %v5021_v0 = vmul.f32 %v4124_v45, %v630_v17  ;;  %v723_v17 = vmax.f32 %v722_v25, %v4995_v51  ;;  %v4128_v45 = vld [vmem:[%s4411_s7 + $0xc0] sm:$0xff] }
 0x2cc   : > { %v5010_v33 = vmul.f32 %v4123_v37, %v605_v27  ;;  %v5024_v19 = vmul.f32 %v4125_v22, %v605_v27  ;;  %v1484_v37 = vand.u32 4294901760, %v1483_v43  ;;  %v741_v22 = vmax.f32 %v740_v28, %v4999_v10  ;;  %v4127_v28 = vld [vmem:[%s4411_s7 + $0xd8] sm:$0xff] }
 0x2cd   : > { %7139 = vst [vmem:[#allocation34_spill] sm:$0xff] %v5007_v31  ;;  %v733_v46 = vmax.f32 %v732_v5, %v5007_v31  ;;  %v5045_v2 = vmul.f32 %v4127_v28, %v4890_v42  ;;  %v4130_v28 = vld [vmem:[%s4411_s7 + $0x90] sm:$0xff] }
 0x2ce   : > { %7140 = vst [vmem:[#allocation35_spill] sm:$0xff] %v5010_v33  ;;  %v715_v43 = vmax.f32 %v714_v63, %v5010_v33  ;;  %v742_v56 = vmax.f32 %v741_v22, %v5021_v0  ;;  %v724_v27 = vmax.f32 %v723_v17, %v5024_v19  ;;  %1485 = vmatpush.msra.mxu0 %v1484_v37  ;;  %v4129_v22 = vld [vmem:[%s4411_s7 + $0xc8] sm:$0xff] }
 0x2cf   : > { %7142 = vst [vmem:[#allocation36_spill] sm:$0xff] %v5021_v0  ;;  %v734_v5 = vrot.slane %v733_v46, 4  ;;  %v5048_v63 = vmul.f32 %v4128_v45, %v662_v12  ;;  %v5051_v17 = vmul.f32 %v4129_v22, %v662_v12  ;;  %v674_v0 = vpop.permute.xlu0 %673  ;;  %v5059_v10 = vmul.f32 %v4130_v28, %v4808_v32  ;;  %v4131_v45 = vld [vmem:[%s4411_s7 + $0x98] sm:$0xff] }
 0x2d0   : > { %7143 = vst [vmem:[#allocation37_spill] sm:$0xff] %v5024_v19  ;;  %v716_v25 = vrot.slane %v715_v43, 4  ;;  %v743_v37 = vrot.slane %v742_v56, 4  ;;  %v725_v19 = vrot.slane %v724_v27, 4  ;;  %v5063_v12 = vmul.f32 %v4131_v45, %v4808_v32  ;;  %v4135_v32 = vld [vmem:[%s4411_s7 + $0x88] sm:$0xff] }
 0x2d1   : > { %7145 = vst [vmem:[#allocation39_spill] sm:$0xff] %v5045_v2  ;;  %v767_v8 = vmax.f32 %v5048_v63, %v5041_v11  ;;  %v776_v42 = vmax.f32 %v5051_v17, %v5045_v2  ;;  %v735_v22 = vmax.f32 %v733_v46, %v734_v5  ;;  %v5066_v39 = vmul.f32 %v4132_v47, %v674_v0  ;;  %v4133_v2 = vld [vmem:[%s4411_s7 + $0xe8] sm:$0xff]  ;;  %v4136_v46 = vld [vmem:[%s4411_s7 + $0xa0] sm:$0xff] }
 0x2d2   : > { %7146 = vst [vmem:[#allocation40_spill] sm:$0xff] %v5048_v63  ;;  %v717_v51 = vmax.f32 %v715_v43, %v716_v25  ;;  %v680_v60 = vpop.permute.xlu1 %679  ;;  %v744_v26 = vmax.f32 %v742_v56, %v743_v37  ;;  %v726_v28 = vmax.f32 %v724_v27, %v725_v19  ;;  %v5077_v45 = vmul.f32 %v4135_v32, %v4817_v35  ;;  %v4137_v5 = vld [vmem:[%s4411_s7 + $0xa8] sm:$0xff]  ;;  %v4139_v19 = vld [vmem:[%s4411_s7 + $0xf8] sm:$0xff] }
 0x2d3   : > { %7147 = vst [vmem:[#allocation41_spill] sm:$0xff] %v5051_v17  ;;  %v5069_v17 = vmul.f32 %v4133_v2, %v674_v0  ;;  %v5081_v43 = vmul.f32 %v4136_v46, %v4880_v14  ;;  %v5085_v47 = vmul.f32 %v4137_v5, %v4880_v14  ;;  %v4138_v0 = vld [vmem:[%s4411_s7 + $0xf0] sm:$0xff]  ;;  %v5091_v56 = vmul.f32 %v4139_v19, %v680_v60  ;;  %v655_v27 = vpop.permute.xlu2 %654 }
 0x2d4   : > { %7148 = vst [vmem:[#allocation42_spill] sm:$0xff] %v5059_v10  ;;  %v5088_v2 = vmul.f32 %v4138_v0, %v680_v60  ;;  %v768_v30 = vmax.f32 %v767_v8, %v5066_v39  ;;  %v749_v25 = vmax.f32 %v5073_v24, %v5059_v10  ;;  %v758_v14 = vmax.f32 %v5077_v45, %v5063_v12 }
 0x2d5   : > { %7149 = vst [vmem:[#allocation43_spill] sm:$0xff] %v5063_v12  ;;  %v777_v35 = vmax.f32 %v776_v42, %v5069_v17  ;;  %v736_v37 = vrot.slane %v735_v22, 2  ;;  %v718_v32 = vrot.slane %v717_v51, 2  ;;  %v745_v46 = vrot.slane %v744_v26, 2  ;;  %v4140_v42 = vld [vmem:[%s4411_s7 + $0xb0] sm:$0xff] }
 0x2d6   : > { %7150 = vst [vmem:[#allocation44_spill] sm:$0xff] %v5066_v39  ;;  %v727_v5 = vrot.slane %v726_v28, 2  ;;  %v769_v0 = vmax.f32 %v768_v30, %v5088_v2  ;;  %v750_v19 = vmax.f32 %v749_v25, %v5081_v43  ;;  %v759_v8 = vmax.f32 %v758_v14, %v5085_v47  ;;  %v4141_v39 = vld [vmem:[%s4411_s7 + $0xb8] sm:$0xff]  ;;  %s3905_s7 = sshll.u32 %s3902_s6, 4  ;;  %s3906_s7 = int_to_ptr.hbm [resolvable:$true] %s3905_s7 }
 0x2d7   : > { %7151 = vst [vmem:[#allocation45_spill] sm:$0xff] %v5069_v17  ;;  %v778_v60 = vmax.f32 %v777_v35, %v5091_v56  ;;  %v5104_v17 = vmul.f32 %v4140_v42, %v655_v27  ;;  %v5107_v34 = vmul.f32 %v4141_v39, %v655_v27  ;;  %v737_v53 = vmax.f32 %v735_v22, %v736_v37  ;;  %s4216_s26 = sshra.s32 %s3906_s7, 4  ;;  %s4217_s26 = int_to_ptr.hbm [resolvable:$true] %s4216_s26 }
 0x2d8   : > { %7153 = vst [vmem:[#allocation47_spill] sm:$0xff] %v5077_v45  ;;  %v770_v62 = vrot.slane %v769_v0, 4  ;;  %v5111_v45 = vsub.f32 %v4912_v3, %v4950_v36  ;;  %v719_v30 = vmax.f32 %v717_v51, %v718_v32  ;;  %v728_v14 = vmax.f32 %v726_v28, %v727_v5  ;;  %s4218_s30 = scalar_lea.hbm %s4217_s26, 256  ;;  %p4223_p11 = scmp.lt.s32.totalorder %s4217_s26, %s6934_s4 }
 0x2d9   : > { %7154 = vst [vmem:[#allocation48_spill] sm:$0xff] %v5081_v43  ;;  %v779_v12 = vrot.slane %v778_v60, 4  ;;  %v751_v35 = vmax.f32 %v750_v19, %v5104_v17  ;;  %v760_v25 = vmax.f32 %v759_v8, %v5107_v34  ;;  %v5118_v3 = vsub.f32 %v4941_v18, %v4974_v15  ;;  %p4219_p1 = scmp.ne.s32.totalorder %s4217_s26, %s4218_s30  ;;  %p4224_p9 = scmp.lt.s32.totalorder %s4222_s25, %s4218_s30 }
 0x2da   : > { %7155 = vst [vmem:[#allocation49_spill] sm:$0xff] %v5085_v47  ;;  %v771_v47 = vmax.f32 %v769_v0, %v770_v62  ;;  %v7014_v33 = vand.u32 4294901760, %v5111_v45  ;;  %v738_v22 = vrot.slane %v737_v53, 1  ;;  %v720_v51 = vrot.slane %v719_v30, 1 }
 0x2db   : > { %7156 = vst [vmem:[#allocation50_spill] sm:$0xff] %v5088_v2  ;;  %v780_v42 = vmax.f32 %v778_v60, %v779_v12  ;;  %v752_v2 = vrot.slane %v751_v35, 4  ;;  %v761_v43 = vrot.slane %v760_v25, 4  ;;  %v729_v8 = vrot.slane %v728_v14, 1  ;;  %p4220_p4 = pnand %p4219_p1, %p4375_p3  ;;  %p4225_p2 = por %p4224_p9, %p4223_p11 }
 0x2dc   : > { %7157 = vst [vmem:[#allocation51_spill] sm:$0xff] %v5091_v56  ;;  %v746_v56 = vmax.f32 %v744_v26, %v745_v46  ;;  %v772_v39 = vrot.slane %v771_v47, 2  ;;  %v1489_v0 = vsub.f32 %v5111_v45, %v7014_v33  ;;  %v7019_v60 = vand.u32 4294901760, %v5118_v3 }
 0x2dd   : > { %7158 = vst [vmem:[#allocation52_spill] sm:$0xff] %v5104_v17  ;;  %v781_v27 = vrot.slane %v780_v42, 2  ;;  %v753_v37 = vmax.f32 %v751_v35, %v752_v2  ;;  %v762_v32 = vmax.f32 %v760_v25, %v761_v43  ;;  %v739_v18 = vmax.f32 %v737_v53, %v738_v22  ;;  %p4221_p8 = pneg %p4220_p4 }
 0x2de   : > { %7159 = vst [vmem:[#allocation53_spill] sm:$0xff] %v5107_v34  ;;  %v747_v19 = vrot.slane %v746_v56, 1  ;;  %v773_v26 = vmax.f32 %v771_v47, %v772_v39  ;;  %v721_v34 = vmax.f32 %v719_v30, %v720_v51  ;;  %v730_v43 = vmax.f32 %v728_v14, %v729_v8 }
 0x2df   : > { %7160 = vst [vmem:[#allocation54_spill] sm:$0xff] %v5111_v45  ;;  %v782_v28 = vmax.f32 %v780_v42, %v781_v27  ;;  %v754_v62 = vrot.slane %v753_v37, 2  ;;  %v763_v12 = vrot.slane %v762_v32, 2  ;;  %v1490_v39 = vand.u32 4294901760, %v1489_v0  ;;  %p4226_p10 = pnand %p4225_p2, %p4221_p8 }
 0x2e0   : > { %v774_v46 = vrot.slane %v773_v26, 1  ;;  %v748_v2 = vmax.f32 %v746_v56, %v747_v19  ;;  %v1495_v27 = vsub.f32 %v5118_v3, %v7019_v60  ;;  %v880_v17 = vsel %vm441_vm6, %v739_v18, %v721_v34 }
 0x2e1   : > { %v783_v5 = vrot.slane %v782_v28, 1  ;;  %v755_v15 = vmax.f32 %v753_v37, %v754_v62  ;;  %v764_v36 = vmax.f32 %v762_v32, %v763_v12  ;;  %1491 = vmatpush.msra.mxu0 %v1490_v39  ;;  %v5131_v56 = vsub.f32 %v4976_v41, %v5014_v44  ;;  %v994_v39 = vld [vmem:[#allocation5 + $0x2d0] sm:$0xff] }
 0x2e2   : > { %v775_v47 = vmax.f32 %v773_v26, %v774_v46  ;;  %v883_v53 = vsel %vm441_vm6, %v748_v2, %v730_v43  ;;  %v1496_v30 = vand.u32 4294901760, %v1495_v27  ;;  %v5135_v14 = vsub.f32 %v5002_v57, %v5030_v20 }
 0x2e3   : > { %v756_v35 = vrot.slane %v755_v15, 1  ;;  %v765_v25 = vrot.slane %v764_v36, 1  ;;  %v784_v42 = vmax.f32 %v782_v28, %v783_v5  ;;  %v7167_v62 = vand.u32 4294901760, %v4749_v29 }
 0x2e4   : > { %1497 = vmatpush.msra.mxu0 %v1496_v30  ;;  %v7168_v46 = vand.u32 4294901760, %v4770_v21  ;;  %v7170_v18 = vand.u32 4294901760, %v4780_v7  ;;  %v4278_v2 = vmov 32.0   ;;  %v7172_v43 = vand.u32 4294901760, %v4799_v38 }
 0x2e5   : > { %v757_v33 = vmax.f32 %v755_v15, %v756_v35  ;;  %v766_v45 = vmax.f32 %v764_v36, %v765_v25  ;;  %v7018_v36 = vand.u32 4294901760, %v5131_v56  ;;  %v7017_v15 = vand.u32 4294901760, %v5135_v14  ;;  %v998_v35 = vld [vmem:[#allocation5 + $0x2f0] sm:$0xff] }
 0x2e6   : > { %4100 = vrcp.f32 %v4278_v2  ;;  %v821_v27 = vadd.f32 %v5059_v10, %v5073_v24 }
 0x2e7   : > { %v881_v22 = vsel %vm443_vm7, %v757_v33, %v880_v17  ;;  %v884_v51 = vsel %vm443_vm7, %v766_v45, %v883_v53  ;;  %v1501_v57 = vsub.f32 %v5131_v56, %v7018_v36  ;;  %v1507_v33 = vsub.f32 %v5135_v14, %v7017_v15 }
 0x2e8   : > { %v882_v34 = vsel %vm445_vm9, %v775_v47, %v881_v22  ;;  %v885_v37 = vsel %vm445_vm9, %v784_v42, %v884_v51  ;;  %v7174_v42 = vand.u32 4294901760, %v4841_v54  ;;  %v839_v53 = vadd.f32 %v5041_v11, %v5048_v63  ;;  %v7176_v51 = vld [vmem:[#allocation35_spill] sm:$0xff]  ;;  %v7200_v63 = vld [vmem:[#allocation28_spill] sm:$0xff] }
 0x2e9   : > { %v5143_v32 = vand.u32 4294901760, %v882_v34  ;;  %v5145_v41 = vand.u32 4294901760, %v885_v37  ;;  %v1502_v19 = vand.u32 4294901760, %v1501_v57  ;;  %v1508_v8 = vand.u32 4294901760, %v1507_v33  ;;  %v7178_v57 = vld [vmem:[#allocation48_spill] sm:$0xff]  ;;  %v7199_v11 = vld [vmem:[#allocation19_spill] sm:$0xff] }
 0x2ea   : > { %v7175_v22 = vand.u32 4294901760, %v4856_v6  ;;  %v822_v33 = vadd.f32 %v821_v27, %v7178_v57  ;;  %v7187_v27 = vld [vmem:[#allocation50_spill] sm:$0xff] }
 0x2eb   : > { %7161 = vst [vmem:[#allocation55_spill] sm:$0xff] %v5143_v32  ;;  %1170 = vmatmul.f32.vlgmr.msra.gmra.mxu3 %v5143_v32  ;;  %v5155_v17 = vsub.f32 %v882_v34, %v5143_v32  ;;  %v5158_v45 = vsub.f32 %v885_v37, %v5145_v41  ;;  %1503 = vmatpush.msra.mxu0 %v1502_v19  ;;  %v7177_v37 = vld [vmem:[#allocation11_spill] sm:$0xff]  ;;  %v7179_v19 = vld [vmem:[#allocation12_spill] sm:$0xff] }
 0x2ec   : > { %7162 = vst [vmem:[#allocation56_spill] sm:$0xff] %v5145_v41  ;;  %1570 = vmatpush.msra.mxu3 %v4731_v16  ;;  %v5208_v25 = vpop.eup %4100 }
 0x2ed   : > { %7163 = vst [vmem:[#allocation57_spill] sm:$0xff] %v5155_v17  ;;  %1224 = vmatmul.f32.vlgmr.msrb.gmra.mxu1 %v5155_v17  ;;  %v5163_v26 = vand.u32 4294901760, %v5155_v17  ;;  %v5166_v28 = vand.u32 4294901760, %v5158_v45  ;;  %1509 = vmatpush.msra.mxu0 %v1508_v8  ;;  %v7180_v8 = vand.u32 4294901760, %v7179_v19  ;;  %vm862_vm1 = vweird.f32 %v5208_v25 }
 0x2ee   : > { %7164 = vst [vmem:[#allocation58_spill] sm:$0xff] %v5158_v45  ;;  %1572 = vmatpush.msra.mxu3 %v4760_v61  ;;  %1611 = vmatpush.msrb.mxu1 %v7167_v62 }
 0x2ef   : > { %7165 = vst [vmem:[#allocation59_spill] sm:$0xff] %v5163_v26  ;;  %1263 = vmatmul.f32.vlgmr.msrb.gmra.mxu0 %v5163_v26  ;;  %v1067_v12 = vsub.f32 %v5155_v17, %v5163_v26  ;;  %v1408_v0 = vsub.f32 %v5158_v45, %v5166_v28 }
 0x2f0   : > { %7166 = vst [vmem:[#allocation60_spill] sm:$0xff] %v5166_v28  ;;  %1574 = vmatpush.msra.mxu3 %v4765_v49  ;;  %1615 = vmatpush.msrb.mxu1 %v7168_v46  ;;  %v7181_v46 = vld [vmem:[#allocation13_spill] sm:$0xff] }
 0x2f1   : > { %1678 = vmatpush.msrb.mxu0 %v4731_v16  ;;  %v5178_v5 = vand.u32 4294901760, %v1067_v12  ;;  %v5190_v16 = vand.u32 4294901760, %v1408_v0  ;;  %v992_v12 = vld [vmem:[#allocation5 + $0x2c0] sm:$0xff] }
 0x2f2   : > { %1576 = vmatpush.msra.mxu3 %v4777_v23  ;;  %1619 = vmatpush.msrb.mxu1 %v7170_v18  ;;  %v7182_v18 = vld [vmem:[#allocation44_spill] sm:$0xff] }
 0x2f3   : > { %7169 = vst [vmem:[#allocation61_spill] sm:$0xff] %v5178_v5  ;;  %1680 = vmatpush.msrb.mxu0 %v4760_v61  ;;  %1069 = vmatmul.f32.vlgmr.msra.gmra.mxu2 %v5178_v5  ;;  %v7173_v61 = vand.u32 4294901760, %v4829_v50  ;;  %v840_v2 = vadd.f32 %v839_v53, %v7182_v18 }
 0x2f4   : > { %1369 = vmatmul.f32.vlgmr.msrb.gmra.mxu3 %v5143_v32  ;;  %1517 = vmatpush.msra.mxu2 %v4749_v29  ;;  %7171 = vst [vmem:[#allocation62_spill] sm:$0xff] %v5190_v16  ;;  %v803_v29 = vadd.f32 %v4918_v13, %v4930_v52  ;;  %v7207_v52 = vld [vmem:[#allocation47_spill] sm:$0xff] }
 0x2f5   : > { %1578 = vmatpush.msra.mxu3 %v4802_v58  ;;  %1623 = vmatpush.msrb.mxu1 %v7172_v43  ;;  %v7183_v43 = vld [vmem:[#allocation52_spill] sm:$0xff]  ;;  %v841_v53 = vadd.f32 %v840_v2, %v7187_v27 }
 0x2f6   : > { %1682 = vmatpush.msrb.mxu0 %v4765_v49  ;;  %1410 = vmatmul.f32.vlgmr.msra.gmra.mxu1 %v5190_v16  ;;  %v785_v49 = vadd.f32 %v4958_v40, %v4901_v59  ;;  %v804_v47 = vadd.f32 %v803_v29, %v4986_v9 }
 0x2f7   : > { %1520 = vmatpush.msra.mxu2 %v4770_v21  ;;  %1580 = vmatpush.msra.mxu3 %v4826_v48  ;;  %v996_v21 = vld [vmem:[#allocation5 + $0x2e0] sm:$0xff] }
 0x2f8   : > { %1627 = vmatpush.msrb.mxu1 %v7173_v61  ;;  %1684 = vmatpush.msrb.mxu0 %v4777_v23  ;;  %v5214_v23 = vand.u32 4294901760, %v998_v35  ;;  %v805_v30 = vadd.f32 %v804_v47, %v5007_v31  ;;  %v823_v61 = vadd.f32 %v822_v33, %v7183_v43  ;;  %v794_v43 = vadd.f32 %v7200_v63, %v7199_v11 }
 0x2f9   : > { %1523 = vmatpush.msra.mxu2 %v4780_v7  ;;  %1511 = vmatmul.f32.vlgmr.msra.gmra.mxu0 %v5145_v41  ;;  %v786_v7 = vadd.f32 %v785_v49, %v4982_v4  ;;  %v990_v49 = vld [vmem:[#allocation5 + $0x2b0] sm:$0xff] }
 0x2fa   : > { %1582 = vmatpush.msra.mxu3 %v4838_v55  ;;  %1631 = vmatpush.msrb.mxu1 %v7174_v42  ;;  %v5238_v62 = vsub.f32 %v998_v35, %v5214_v23  ;;  %v806_v0 = vrot.slane %v805_v30, 4  ;;  %v824_v2 = vrot.slane %v823_v61, 4 }
 0x2fb   : > { %1686 = vmatpush.msrb.mxu0 %v4802_v58  ;;  %1526 = vmatpush.msra.mxu2 %v4799_v38  ;;  %v5227_v58 = vand.u32 4294901760, %v996_v21  ;;  %v858_v38 = vmul.f32 32.0, %v5208_v25  ;;  %v787_v34 = vadd.f32 %v786_v7, %v7176_v51  ;;  %v5254_v7 = vand.u32 4294901760, %v992_v12 }
 0x2fc   : > { %1584 = vmatpush.msra.mxu3 %v4853_v1  ;;  %1635 = vmatpush.msrb.mxu1 %v7175_v22  ;;  %v807_v15 = vadd.f32 %v806_v0, %v805_v30  ;;  %v984_v30 = vld [vmem:[#allocation5 + $0x280] sm:$0xff]  ;;  %v842_v0 = vrot.slane %v841_v53, 4  ;;  %v825_v57 = vadd.f32 %v824_v2, %v823_v61 }
 0x2fd   : > { %1688 = vmatpush.msrb.mxu0 %v4826_v48  ;;  %1332 = vmatmul.f32.vlgmr.msrb.gmra.mxu2 %v5143_v32  ;;  %v5240_v48 = vand.u32 4294901760, %v994_v39  ;;  %v5250_v35 = vsub.f32 %v996_v21, %v5227_v58  ;;  %v859_v47 = vsub.f32 1.0, %v858_v38  ;;  %v788_v42 = vrot.slane %v787_v34, 4  ;;  %v988_v38 = vld [vmem:[#allocation5 + $0x2a0] sm:$0xff] }
 0x2fe   : > { %1586 = vmatpush.msra.mxu3 %v7177_v37  ;;  %1529 = vmatpush.msra.mxu2 %v4829_v50  ;;  %v7184_v50 = vld [vmem:[#allocation14_spill] sm:$0xff]  ;;  %v5276_v33 = vsub.f32 %v992_v12, %v5254_v7  ;;  %v5278_v27 = vand.u32 4294901760, %v988_v38  ;;  %v5305_v9 = vand.u32 4294901760, %v984_v30  ;;  %v7208_v61 = vld [vmem:[#allocation43_spill] sm:$0xff] }
 0x2ff   : > { %1639 = vmatpush.msrb.mxu1 %v7180_v8  ;;  %1690 = vmatpush.msrb.mxu0 %v4838_v55  ;;  %v7185_v29 = vand.u32 4294901760, %v7184_v50  ;;  %v7186_v55 = vld [vmem:[#allocation15_spill] sm:$0xff]  ;;  %v5262_v21 = vsub.f32 %v994_v39, %v5240_v48  ;;  %v5266_v8 = vand.u32 4294901760, %v990_v49  ;;  %v860_v39 = vmul.f32 %v5208_v25, %v859_v47  ;;  %v7198_v12 = vld [vmem:[#allocation26_spill] sm:$0xff] }
 0x300   : > { %1588 = vmatpush.msra.mxu3 %v7181_v46  ;;  %1532 = vmatpush.msra.mxu2 %v4841_v54  ;;  %v7188_v54 = vld [vmem:[#allocation16_spill] sm:$0xff]  ;;  %v789_v60 = vadd.f32 %v788_v42, %v787_v34  ;;  %v7204_v24 = vand.u32 4294901760, %v5250_v35  ;;  %v830_v51 = vadd.f32 %v7208_v61, %v7207_v52  ;;  %v7213_v52 = vand.u32 4294901760, %v5135_v14 }
 0x301   : > { %1643 = vmatpush.msrb.mxu1 %v7185_v29  ;;  %1692 = vmatpush.msrb.mxu0 %v4853_v1  ;;  %v7189_v22 = vand.u32 4294901760, %v7188_v54  ;;  %v7190_v1 = vld [vmem:[#allocation17_spill] sm:$0xff]  ;;  %v7197_v42 = vld [vmem:[#allocation24_spill] sm:$0xff]  ;;  %v7206_v2 = vand.u32 4294901760, %v5262_v21 }
 0x302   : > { %1590 = vmatpush.msra.mxu3 %v7186_v55  ;;  %1535 = vmatpush.msra.mxu2 %v4856_v6  ;;  %v986_v29 = vld [vmem:[#allocation5 + $0x290] sm:$0xff]  ;;  %v7191_v6 = vld [vmem:[#allocation20_spill] sm:$0xff]  ;;  %v812_v18 = vadd.f32 %v7198_v12, %v7197_v42  ;;  %v1764_v31 = vsub.f32 %v5250_v35, %v7204_v24  ;;  %v790_v13 = vrot.slane %v789_v60, 2  ;;  %v7205_v24 = vand.u32 4294901760, %v5118_v3  ;;  %v980_v42 = vld [vmem:[#allocation5 + $0x260] sm:$0xff] }
 0x303   : > { %1647 = vmatpush.msrb.mxu1 %v7189_v22  ;;  %1694 = vmatpush.msrb.mxu0 %v7177_v37  ;;  %v7192_v36 = vand.u32 4294901760, %v7191_v6  ;;  %v7193_v37 = vld [vmem:[#allocation25_spill] sm:$0xff]  ;;  %v7196_v22 = vand.u32 4294901760, %v5238_v62  ;;  %v5287_v47 = vand.u32 4294901760, %v986_v29 }
 0x304   : > { %1592 = vmatpush.msra.mxu3 %v7190_v1  ;;  %1538 = vmatpush.msra.mxu2 %v7179_v19  ;;  %v7194_v19 = vld [vmem:[#allocation22_spill] sm:$0xff]  ;;  %v982_v12 = vld [vmem:[#allocation5 + $0x270] sm:$0xff] }
 0x305   : > { %1651 = vmatpush.msrb.mxu1 %v7192_v36  ;;  %1696 = vmatpush.msrb.mxu0 %v7181_v46  ;;  %v7195_v36 = vand.u32 4294901760, %v7194_v19  ;;  %v1758_v34 = vsub.f32 %v5238_v62, %v7196_v22  ;;  %v808_v22 = vrot.slane %v807_v15, 2  ;;  %v7202_v46 = vld [vmem:[#allocation54_spill] sm:$0xff] }
 0x306   : > { %1594 = vmatpush.msra.mxu3 %v7193_v37  ;;  %1541 = vmatpush.msra.mxu2 %v7184_v50  ;;  %v7201_v50 = vld [vmem:[#allocation29_spill] sm:$0xff]  ;;  %v7203_v10 = vand.u32 4294901760, %v7202_v46 }
 0x307   : > { %1655 = vmatpush.msrb.mxu1 %v7195_v36  ;;  %1698 = vmatpush.msrb.mxu0 %v7186_v55  ;;  %v5297_v36 = vsub.f32 %v990_v49, %v5266_v8  ;;  %v861_v55 = vadd.f32 %v5208_v25, %v860_v39  ;;  %v5312_v49 = vsub.f32 %v988_v38, %v5278_v27  ;;  %v7209_v38 = vld [vmem:[#allocation32_spill] sm:$0xff] }
 0x308   : > { %1596 = vmatpush.msra.mxu3 %v7201_v50  ;;  %1544 = vmatpush.msra.mxu2 %v7188_v54  ;;  %v1759_v54 = vand.u32 4294901760, %v1758_v34  ;;  %v1770_v39 = vsub.f32 %v5262_v21, %v7206_v2  ;;  %v5326_v4 = vadd.f32 %v794_v43, %v7209_v38  ;;  %v826_v34 = vrot.slane %v825_v57, 2  ;;  %v978_v43 = vld [vmem:[#allocation5 + $0x250] sm:$0xff] }
 0x309   : > { %1659 = vmatpush.msrb.mxu1 %v7203_v10  ;;  %1700 = vmatpush.msrb.mxu0 %v7190_v1  ;;  %v843_v10 = vadd.f32 %v842_v0, %v841_v53  ;;  %v5321_v1 = vsub.f32 %v986_v29, %v5287_v47  ;;  %v809_v0 = vadd.f32 %v808_v22, %v807_v15  ;;  %v7210_v29 = vand.u32 4294901760, %v5131_v56 }
 0x30a   : > { %1598 = vmatpush.msra.mxu3 %v5014_v44  ;;  %1547 = vmatpush.msra.mxu2 %v7191_v6  ;;  %v5331_v6 = vand.u32 4294901760, %v982_v12  ;;  %v5337_v2 = vsub.f32 %v984_v30, %v5305_v9  ;;  %v7211_v15 = vand.u32 4294901760, %v5276_v33  ;;  %v791_v30 = vadd.f32 %v790_v13, %v789_v60 }
 0x30b   : > { %1663 = vmatpush.msrb.mxu1 %v7205_v24  ;;  %1702 = vmatpush.msrb.mxu0 %v7193_v37  ;;  %v1765_v24 = vand.u32 4294901760, %v1764_v31  ;;  %v5342_v37 = vsel %vm862_vm1, %v5208_v25, %v861_v55  ;;  %v5350_v31 = vand.u32 4294901760, %v980_v42  ;;  %v1771_v53 = vand.u32 4294901760, %v1770_v39  ;;  %v976_v55 = vld [vmem:[#allocation5 + $0x240] sm:$0xff] }
 0x30c   : > { %1600 = vmatpush.msra.mxu3 %v5030_v20  ;;  %1550 = vmatpush.msra.mxu2 %v7194_v19  ;;  %v1776_v19 = vsub.f32 %v5276_v33, %v7211_v15  ;;  %v7214_v15 = vand.u32 4294901760, %v5297_v36  ;;  %v5362_v13 = vsub.f32 %v982_v12, %v5331_v6  ;;  %v5364_v60 = vand.u32 4294901760, %v978_v43 }
 0x30d   : > { %1667 = vmatpush.msrb.mxu1 %v7210_v29  ;;  %1704 = vmatpush.msrb.mxu0 %v7201_v50  ;;  %v844_v29 = vrot.slane %v843_v10, 2  ;;  %v7212_v50 = vld [vmem:[#allocation33_spill] sm:$0xff]  ;;  %v810_v25 = vrot.slane %v809_v0, 1  ;;  %v827_v38 = vadd.f32 %v826_v34, %v825_v57  ;;  %v7217_v12 = vand.u32 4294901760, %v5312_v49 }
 0x30e   : > { %1604 = vmatmul.f32.vlgmr.msra.gmra.mxu3 %v5166_v28  ;;  %1553 = vmatpush.msra.mxu2 %v7202_v46  ;;  %v813_v61 = vadd.f32 %v812_v18, %v7212_v50  ;;  %v1782_v22 = vsub.f32 %v5297_v36, %v7214_v15  ;;  %v7215_v46 = vld [vmem:[#allocation41_spill] sm:$0xff]  ;;  %v1777_v18 = vand.u32 4294901760, %v1776_v19  ;;  %v5376_v50 = vsub.f32 %v980_v42, %v5350_v31  ;;  %v972_v19 = vld [vmem:[#allocation5 + $0x220] sm:$0xff] }
 0x30f   : > { %1760 = vmatpush.msrb.mxu3 %v1759_v54  ;;  %1671 = vmatpush.msrb.mxu1 %v7213_v52  ;;  %v7216_v54 = vld [vmem:[#allocation39_spill] sm:$0xff]  ;;  %v1788_v15 = vsub.f32 %v5312_v49, %v7217_v12  ;;  %v7218_v57 = vld [vmem:[#allocation49_spill] sm:$0xff]  ;;  %v7219_v52 = vand.u32 4294901760, %v5321_v1  ;;  %v5389_v63 = vsub.f32 %v978_v43, %v5364_v60 }
 0x310   : > { %1706 = vmatpush.msrb.mxu0 %v5014_v44  ;;  %v848_v39 = vadd.f32 %v7216_v54, %v7215_v46  ;;  %1673 = vmatmul.f32.vlgmr.msrb.gmra.mxu1 %v5145_v41  ;;  %v974_v44 = vld [vmem:[#allocation5 + $0x230] sm:$0xff]  ;;  %v5378_v54 = vand.u32 4294901760, %v976_v55  ;;  %v831_v34 = vadd.f32 %v830_v51, %v7218_v57  ;;  %v845_v46 = vadd.f32 %v844_v29, %v843_v10  ;;  %v1024_v28 = vld [vmem:[#allocation5 + $0x3c0] sm:$0xff] }
 0x311   : > { %1766 = vmatpush.msrb.mxu3 %v1765_v24  ;;  %1858 = vmatpush.msra.mxu1 %v5238_v62  ;;  %v792_v24 = vrot.slane %v791_v30, 1  ;;  %v1783_v42 = vand.u32 4294901760, %v1782_v22  ;;  %v5391_v51 = vand.u32 4294901760, %v974_v44  ;;  %v811_v10 = vadd.f32 %v810_v25, %v809_v0  ;;  %v970_v22 = vld [vmem:[#allocation5 + $0x210] sm:$0xff] }
 0x312   : > { %1556 = vmatpush.msra.mxu2 %v5118_v3  ;;  %1708 = vmatpush.msrb.mxu0 %v5030_v20  ;;  %v1794_v3 = vsub.f32 %v5321_v1, %v7219_v52  ;;  %v7220_v20 = vld [vmem:[#allocation45_spill] sm:$0xff]  ;;  %v828_v29 = vrot.slane %v827_v38, 1  ;;  %v7221_v52 = vand.u32 4294901760, %v5337_v2  ;;  %v1789_v43 = vand.u32 4294901760, %v1788_v15 }
 0x313   : > { %1772 = vmatpush.msrb.mxu3 %v1771_v53  ;;  %1710 = vmatmul.f32.vlgmr.msrb.gmra.mxu0 %v5145_v41  ;;  %v849_v53 = vadd.f32 %v848_v39, %v7220_v20  ;;  %v5402_v0 = vsub.f32 %v976_v55, %v5378_v54  ;;  %v5404_v25 = vand.u32 4294901760, %v972_v19  ;;  %v7222_v39 = vld [vmem:[#allocation36_spill] sm:$0xff]  ;;  %v793_v40 = vadd.f32 %v792_v24, %v791_v30  ;;  %v7224_v24 = vld [vmem:[#allocation37_spill] sm:$0xff] }
 0x314   : > { %1861 = vmatpush.msra.mxu1 %v5250_v35  ;;  %1911 = vmatpush.msra.mxu0 %v5214_v23  ;;  %v1800_v57 = vsub.f32 %v5337_v2, %v7221_v52  ;;  %v814_v20 = vadd.f32 %v813_v61, %v7222_v39  ;;  %v1795_v52 = vand.u32 4294901760, %v1794_v3  ;;  %v7223_v15 = vand.u32 4294901760, %v5362_v13  ;;  %v1022_v41 = vld [vmem:[#allocation5 + $0x3b0] sm:$0xff] }
 0x315   : > { %1559 = vmatpush.msra.mxu2 %v5131_v56  ;;  %1778 = vmatpush.msrb.mxu3 %v1777_v18  ;;  %v846_v56 = vrot.slane %v845_v46, 1  ;;  %v968_v18 = vld [vmem:[#allocation5 + $0x200] sm:$0xff]  ;;  %v5415_v11 = vsub.f32 %v974_v44, %v5391_v51  ;;  %v5417_v61 = vand.u32 4294901760, %v970_v22  ;;  %v866_v30 = vmul.f32 %v5342_v37, %v811_v10 }
 0x316   : > { %1864 = vmatpush.msra.mxu1 %v5262_v21  ;;  %1913 = vmatpush.msra.mxu0 %v5227_v58  ;;  %v1806_v55 = vsub.f32 %v5362_v13, %v7223_v15  ;;  %v829_v3 = vadd.f32 %v828_v29, %v827_v38  ;;  %v7225_v15 = vand.u32 4294901760, %v5376_v50  ;;  %v5430_v10 = vsub.f32 %v972_v19, %v5404_v25 }
 0x317   : > { %1562 = vmatpush.msra.mxu2 %v5135_v14  ;;  %1784 = vmatpush.msrb.mxu3 %v1783_v42  ;;  %v796_v14 = vadd.f32 %v5326_v4, %v7224_v24  ;;  %v1801_v42 = vand.u32 4294901760, %v1800_v57  ;;  %v5432_v39 = vand.u32 4294901760, %v968_v18  ;;  %v815_v4 = vrot.slane %v814_v20, 4  ;;  %v7227_v24 = vld [vmem:[#allocation53_spill] sm:$0xff] }
 0x318   : > { %1565 = vmatmul.f32.vlgmr.msra.gmra.mxu2 %v5158_v45  ;;  %1867 = vmatpush.msra.mxu1 %v5276_v33  ;;  %v1812_v44 = vsub.f32 %v5376_v50, %v7225_v15  ;;  %7226 = vst [vmem:[#allocation11_spill] sm:$0xff] %v5430_v10  ;;  %v864_v38 = vmul.f32 %v5342_v37, %v793_v40  ;;  %v7228_v15 = vand.u32 4294901760, %v5389_v63 }
 0x319   : > { %1715 = vmatpush.msrb.mxu2 %v5214_v23  ;;  %1915 = vmatpush.msra.mxu0 %v5240_v48  ;;  %v847_v29 = vadd.f32 %v846_v56, %v845_v46  ;;  %v832_v57 = vadd.f32 %v831_v34, %v7227_v24  ;;  %v5444_v59 = vsub.f32 %v970_v22, %v5417_v61  ;;  %v797_v40 = vrot.slane %v796_v14, 4  ;;  %v7230_v46 = vld [vmem:[#allocation51_spill] sm:$0xff] }
 0x31a   : > { %1790 = vmatpush.msrb.mxu3 %v1789_v43  ;;  %1870 = vmatpush.msra.mxu1 %v5297_v36  ;;  %v1807_v43 = vand.u32 4294901760, %v1806_v55  ;;  %v1818_v19 = vsub.f32 %v5389_v63, %v7228_v15  ;;  %v850_v34 = vadd.f32 %v849_v53, %v7230_v46  ;;  %v868_v56 = vmul.f32 %v5342_v37, %v829_v3 }
 0x31b   : > { %1717 = vmatpush.msrb.mxu2 %v5227_v58  ;;  %1917 = vmatpush.msra.mxu0 %v5254_v7  ;;  %7229 = vst [vmem:[#allocation12_spill] sm:$0xff] %v5444_v59  ;;  %v7231_v55 = vand.u32 4294901760, %v5402_v0  ;;  %v5456_v12 = vsub.f32 %v968_v18, %v5432_v39  ;;  %v816_v53 = vadd.f32 %v815_v4, %v814_v20  ;;  %v833_v46 = vrot.slane %v832_v57, 4  ;;  %v1030_v20 = vld [vmem:[#allocation5 + $0x3f0] sm:$0xff]  ;;  %v1028_v18 = vld [vmem:[#allocation5 + $0x3e0] sm:$0xff] }
 0x31c   : > { %1796 = vmatpush.msrb.mxu3 %v1795_v52  ;;  %1873 = vmatpush.msra.mxu1 %v5312_v49  ;;  %v1813_v52 = vand.u32 4294901760, %v1812_v44  ;;  %v896_v3 = vsel %vm441_vm6, %v866_v30, %v864_v38  ;;  %v1819_v44 = vand.u32 4294901760, %v1818_v19  ;;  %v798_v4 = vadd.f32 %v797_v40, %v796_v14 }
 0x31d   : > { %1719 = vmatpush.msrb.mxu2 %v5240_v48  ;;  %1919 = vmatpush.msra.mxu0 %v5266_v8  ;;  %v1824_v15 = vsub.f32 %v5402_v0, %v7231_v55  ;;  %7232 = vst [vmem:[#allocation13_spill] sm:$0xff] %v5456_v12  ;;  %v7233_v55 = vand.u32 4294901760, %v5415_v11  ;;  %v897_v30 = vsel %vm443_vm7, %v868_v56, %v896_v3  ;;  %v851_v38 = vrot.slane %v850_v34, 4 }
 0x31e   : > { %1802 = vmatpush.msrb.mxu3 %v1801_v42  ;;  %1876 = vmatpush.msra.mxu1 %v5321_v1  ;;  %v870_v42 = vmul.f32 %v5342_v37, %v847_v29  ;;  %v834_v24 = vadd.f32 %v833_v46, %v832_v57  ;;  %v5477_v14 = vand.u32 4294901760, %v1030_v20  ;;  %v817_v40 = vrot.slane %v816_v53, 2  ;;  %v1026_v46 = vld [vmem:[#allocation5 + $0x3d0] sm:$0xff] }
 0x31f   : > { %1721 = vmatpush.msrb.mxu2 %v5254_v7  ;;  %1921 = vmatpush.msra.mxu0 %v5278_v27  ;;  %v1830_v22 = vsub.f32 %v5415_v11, %v7233_v55  ;;  %v1825_v29 = vand.u32 4294901760, %v1824_v15  ;;  %v7235_v15 = vand.u32 4294901760, %v5444_v59  ;;  %v5486_v57 = vand.u32 4294901760, %v1028_v18 }
 0x320   : > { %1808 = vmatpush.msrb.mxu3 %v1807_v43  ;;  %1879 = vmatpush.msra.mxu1 %v5337_v2  ;;  %v7234_v43 = vand.u32 4294901760, %v5430_v10  ;;  %v898_v56 = vsel %vm445_vm9, %v870_v42, %v897_v30  ;;  %v852_v55 = vadd.f32 %v851_v38, %v850_v34  ;;  %v835_v30 = vrot.slane %v834_v24, 2 }
 0x321   : > { %1723 = vmatpush.msrb.mxu2 %v5266_v8  ;;  %1923 = vmatpush.msra.mxu0 %v5287_v47  ;;  %v1842_v3 = vsub.f32 %v5444_v59, %v7235_v15  ;;  %v5492_v45 = vand.u32 4294901760, %v898_v56  ;;  %v5497_v15 = vsub.f32 %v1030_v20, %v5477_v14  ;;  %v818_v34 = vadd.f32 %v817_v40, %v816_v53  ;;  %v1020_v40 = vld [vmem:[#allocation5 + $0x3a0] sm:$0xff] }
 0x322   : > { %1814 = vmatpush.msrb.mxu3 %v1813_v52  ;;  %v1836_v19 = vsub.f32 %v5430_v10, %v7234_v43  ;;  %1882 = vmatpush.msra.mxu1 %v5362_v13  ;;  %v1831_v52 = vand.u32 4294901760, %v1830_v22  ;;  %v799_v43 = vrot.slane %v798_v4, 2  ;;  %v853_v16 = vrot.slane %v852_v55, 2 }
 0x323   : > { %1725 = vmatpush.msrb.mxu2 %v5278_v27  ;;  %1925 = vmatpush.msra.mxu0 %v5305_v9  ;;  %7237 = vst [vmem:[#allocation14_spill] sm:$0xff] %v5492_v45  ;;  %v1843_v38 = vand.u32 4294901760, %v1842_v3  ;;  %v5508_v20 = vand.u32 4294901760, %v1024_v28  ;;  %v819_v3 = vrot.slane %v818_v34, 1  ;;  %v7243_v26 = vand.u32 4294901760, %v5497_v15 }
 0x324   : > { %1820 = vmatpush.msrb.mxu3 %v1819_v44  ;;  %1885 = vmatpush.msra.mxu1 %v5376_v50  ;;  %v1837_v42 = vand.u32 4294901760, %v1836_v19  ;;  %v7236_v44 = vand.u32 4294901760, %v5456_v12  ;;  %v800_v19 = vadd.f32 %v799_v43, %v798_v4  ;;  %v5513_v4 = vsub.f32 %v898_v56, %v5492_v45 }
 0x325   : > { %1727 = vmatpush.msrb.mxu2 %v5287_v47  ;;  %1927 = vmatpush.msra.mxu0 %v5331_v6  ;;  %v2099_v56 = vsub.f32 %v5497_v15, %v7243_v26 }
 0x326   : > { %1826 = vmatpush.msrb.mxu3 %v1825_v29  ;;  %v1848_v22 = vsub.f32 %v5456_v12, %v7236_v44  ;;  %1888 = vmatpush.msra.mxu1 %v5389_v63  ;;  %v5500_v29 = vand.u32 4294901760, %v1026_v46  ;;  %v5505_v44 = vsub.f32 %v1028_v18, %v5486_v57  ;;  %7239 = vst [vmem:[#allocation16_spill] sm:$0xff] %v5513_v4  ;;  %v5534_v5 = vand.u32 4294901760, %v5513_v4 }
 0x327   : > { %1729 = vmatpush.msrb.mxu2 %v5305_v9  ;;  %1929 = vmatpush.msra.mxu0 %v5350_v31  ;;  %v854_v18 = vadd.f32 %v853_v16, %v852_v55  ;;  %v1016_v16 = vld [vmem:[#allocation5 + $0x380] sm:$0xff]  ;;  %v820_v55 = vadd.f32 %v819_v3, %v818_v34  ;;  %v1014_v3 = vld [vmem:[#allocation5 + $0x370] sm:$0xff] }
 0x328   : > { %1832 = vmatpush.msrb.mxu3 %v1831_v52  ;;  %1891 = vmatpush.msra.mxu1 %v5402_v0  ;;  %7238 = vst [vmem:[#allocation15_spill] sm:$0xff] %v5505_v44  ;;  %v1849_v53 = vand.u32 4294901760, %v1848_v22  ;;  %v836_v52 = vadd.f32 %v835_v30, %v834_v24  ;;  %v5518_v43 = vsub.f32 %v1026_v46, %v5500_v29  ;;  %v1018_v22 = vld [vmem:[#allocation5 + $0x390] sm:$0xff]  ;;  %v801_v24 = vrot.slane %v800_v19, 1 }
 0x329   : > { %1731 = vmatpush.msrb.mxu2 %v5331_v6  ;;  %1931 = vmatpush.msra.mxu0 %v5364_v60  ;;  %v5525_v30 = vand.u32 4294901760, %v1020_v40  ;;  %7242 = vst [vmem:[#allocation25_spill] sm:$0xff] %v5534_v5  ;;  %v5539_v17 = vand.u32 4294901760, %v1018_v22  ;;  %v7244_v26 = vand.u32 4294901760, %v5505_v44 }
 0x32a   : > { %1838 = vmatpush.msrb.mxu3 %v1837_v42  ;;  %1894 = vmatpush.msra.mxu1 %v5415_v11  ;;  %7240 = vst [vmem:[#allocation17_spill] sm:$0xff] %v5518_v43  ;;  %v5520_v42 = vand.u32 4294901760, %v1022_v41  ;;  %v837_v46 = vrot.slane %v836_v52, 1  ;;  %v802_v32 = vadd.f32 %v801_v24, %v800_v19  ;;  %v5558_v19 = vand.u32 4294901760, %v1016_v16 }
 0x32b   : > { %1733 = vmatpush.msrb.mxu2 %v5350_v31  ;;  %1933 = vmatpush.msra.mxu0 %v5378_v54  ;;  %v5553_v34 = vsub.f32 %v1020_v40, %v5525_v30  ;;  %v2100_v24 = vand.u32 4294901760, %v2099_v56  ;;  %v1749_v40 = vsub.f32 %v5513_v4, %v5534_v5 }
 0x32c   : > { %1844 = vmatpush.msrb.mxu3 %v1843_v38  ;;  %1897 = vmatpush.msra.mxu1 %v5430_v10  ;;  %v5529_v38 = vsub.f32 %v1024_v28, %v5508_v20  ;;  %v855_v10 = vrot.slane %v854_v18, 1  ;;  %v1012_v28 = vld [vmem:[#allocation5 + $0x360] sm:$0xff]  ;;  %v865_v56 = vmul.f32 %v5342_v37, %v802_v32 }
 0x32d   : > { %1735 = vmatpush.msrb.mxu2 %v5364_v60  ;;  %1935 = vmatpush.msra.mxu0 %v5391_v51  ;;  %v5588_v32 = vand.u32 4294901760, %v1012_v28 }
 0x32e   : > { %1850 = vmatpush.msrb.mxu3 %v1849_v53  ;;  %7241 = vst [vmem:[#allocation20_spill] sm:$0xff] %v5529_v38  ;;  %1900 = vmatpush.msra.mxu1 %v5444_v59  ;;  %v5545_v53 = vsub.f32 %v1022_v41, %v5520_v42  ;;  %v2105_v59 = vsub.f32 %v5505_v44, %v7244_v26  ;;  %v7245_v41 = vand.u32 4294901760, %v5518_v43  ;;  %v1010_v44 = vld [vmem:[#allocation5 + $0x350] sm:$0xff] }
 0x32f   : > { %1737 = vmatpush.msrb.mxu2 %v5378_v54  ;;  %1937 = vmatpush.msra.mxu0 %v5404_v25  ;;  %v5565_v26 = vsub.f32 %v1018_v22, %v5539_v17 }
 0x330   : > { %1852 = vmatmul.f32.vlgmr.msrb.gmra.mxu3 %v5492_v45  ;;  %1903 = vmatpush.msra.mxu1 %v5456_v12  ;;  %v5573_v12 = vand.u32 4294901760, %v1014_v3  ;;  %v2106_v22 = vand.u32 4294901760, %v2105_v59  ;;  %v5592_v59 = vand.u32 4294901760, %v1749_v40  ;;  %v1006_v40 = vld [vmem:[#allocation5 + $0x330] sm:$0xff] }
 0x331   : > { %2019 = vmatpush.msra.mxu3 %v5214_v23  ;;  %1739 = vmatpush.msrb.mxu2 %v5391_v51  ;;  %v838_v23 = vadd.f32 %v837_v46, %v836_v52  ;;  %v2111_v52 = vsub.f32 %v5518_v43, %v7245_v41  ;;  %v7246_v41 = vand.u32 4294901760, %v5529_v38  ;;  %v856_v43 = vadd.f32 %v855_v10, %v854_v18 }
 0x332   : > { %1939 = vmatpush.msra.mxu0 %v5417_v61  ;;  %1906 = vmatmul.f32.vlgmr.msra.gmra.mxu1 %v5513_v4  ;;  %7247 = vst [vmem:[#allocation22_spill] sm:$0xff] %v5592_v59  ;;  %v5601_v10 = vsub.f32 %v1014_v3, %v5573_v12  ;;  %v5603_v18 = vand.u32 4294901760, %v1010_v44 }
 0x333   : > { %2021 = vmatpush.msra.mxu3 %v5227_v58  ;;  %2056 = vmatpush.msrb.mxu1 %v5477_v14  ;;  %v867_v58 = vmul.f32 %v5342_v37, %v820_v55  ;;  %v2117_v46 = vsub.f32 %v5529_v38, %v7246_v41  ;;  %v5586_v55 = vsub.f32 %v1016_v16, %v5558_v19  ;;  %v2112_v41 = vand.u32 4294901760, %v2111_v52 }
 0x334   : > { %1741 = vmatpush.msrb.mxu2 %v5404_v25  ;;  %1941 = vmatpush.msra.mxu0 %v5432_v39  ;;  %v7248_v16 = vand.u32 4294901760, %v5545_v53  ;;  %v2146_v3 = vand.u32 4294901760, %v5601_v10 }
 0x335   : > { %2023 = vmatpush.msra.mxu3 %v5240_v48  ;;  %1945 = vmatmul.f32.vlgmr.msra.gmra.mxu0 %v5534_v5  ;;  %v869_v48 = vmul.f32 %v5342_v37, %v838_v23  ;;  %v1008_v5 = vld [vmem:[#allocation5 + $0x340] sm:$0xff]  ;;  %v899_v23 = vsel %vm441_vm6, %v867_v58, %v865_v56  ;;  %v2118_v52 = vand.u32 4294901760, %v2117_v46  ;;  %v871_v58 = vmul.f32 %v5342_v37, %v856_v43 }
 0x336   : > { %2058 = vmatpush.msrb.mxu1 %v5486_v57  ;;  %2101 = vmatpush.msrb.mxu0 %v2100_v24  ;;  %v2123_v38 = vsub.f32 %v5545_v53, %v7248_v16  ;;  %v7249_v24 = vand.u32 4294901760, %v5553_v34  ;;  %v5614_v16 = vsub.f32 %v1012_v28, %v5588_v32  ;;  %v5616_v4 = vand.u32 4294901760, %v1008_v5  ;;  %v1004_v46 = vld [vmem:[#allocation5 + $0x320] sm:$0xff] }
 0x337   : > { %1743 = vmatpush.msrb.mxu2 %v5417_v61  ;;  %2025 = vmatpush.msra.mxu3 %v5254_v7  ;;  %v900_v56 = vsel %vm443_vm7, %v869_v48, %v899_v23  ;;  %v5629_v37 = vsub.f32 %v1010_v44, %v5603_v18  ;;  %v5631_v43 = vand.u32 4294901760, %v1006_v40  ;;  %v1002_v23 = vld [vmem:[#allocation5 + $0x310] sm:$0xff] }
 0x338   : > { %2060 = vmatpush.msrb.mxu1 %v5500_v29  ;;  %2107 = vmatpush.msrb.mxu0 %v2106_v22  ;;  %v2129_v7 = vsub.f32 %v5553_v34, %v7249_v24  ;;  %v7250_v22 = vand.u32 4294901760, %v5238_v62  ;;  %v7251_v24 = vand.u32 4294901760, %v5565_v26  ;;  %v2124_v28 = vand.u32 4294901760, %v2123_v38 }
 0x339   : > { %1745 = vmatpush.msrb.mxu2 %v5432_v39  ;;  %2027 = vmatpush.msra.mxu3 %v5266_v8  ;;  %v7252_v62 = vand.u32 4294901760, %v5250_v35  ;;  %v5642_v44 = vsub.f32 %v1008_v5, %v5616_v4  ;;  %v7254_v35 = vand.u32 4294901760, %v5262_v21  ;;  %v2158_v5 = vand.u32 4294901760, %v5629_v37  ;;  %v1000_v21 = vld [vmem:[#allocation5 + $0x300] sm:$0xff] }
 0x33a   : > { %1751 = vmatmul.f32.vlgmr.msrb.gmra.mxu2 %v5592_v59  ;;  %2062 = vmatpush.msrb.mxu1 %v5508_v20  ;;  %v2135_v8 = vsub.f32 %v5565_v26, %v7251_v24  ;;  %v2130_v48 = vand.u32 4294901760, %v2129_v7  ;;  %v5656_v24 = vsub.f32 %v1006_v40, %v5631_v43  ;;  %v7294_v59 = vld [vmem:[#allocation61_spill] sm:$0xff] }
 0x33b   : > { %1952 = vmatpush.msra.mxu2 %v7250_v22  ;;  %2113 = vmatpush.msrb.mxu0 %v2112_v41  ;;  %v2152_v41 = vand.u32 4294901760, %v5614_v16  ;;  %v5644_v22 = vand.u32 4294901760, %v1004_v46 }
 0x33c   : > { %2029 = vmatpush.msra.mxu3 %v5278_v27  ;;  %2064 = vmatpush.msrb.mxu1 %v5520_v42  ;;  %v7253_v27 = vand.u32 4294901760, %v5586_v55  ;;  %v2136_v7 = vand.u32 4294901760, %v2135_v8  ;;  %v7256_v8 = vand.u32 4294901760, %v5297_v36  ;;  %v7258_v36 = vand.u32 4294901760, %v5312_v49 }
 0x33d   : > { %1956 = vmatpush.msra.mxu2 %v7252_v62  ;;  %2119 = vmatpush.msrb.mxu0 %v2118_v52  ;;  %v901_v52 = vsel %vm445_vm9, %v871_v58, %v900_v56  ;;  %v5658_v62 = vand.u32 4294901760, %v1002_v23  ;;  %v2153_v58 = vsub.f32 %v5614_v16, %v2152_v41  ;;  %v2164_v56 = vand.u32 4294901760, %v5642_v44 }
 0x33e   : > { %2031 = vmatpush.msra.mxu3 %v5287_v47  ;;  %v2141_v38 = vsub.f32 %v5586_v55, %v7253_v27  ;;  %2066 = vmatpush.msrb.mxu1 %v5525_v30  ;;  %v2147_v47 = vsub.f32 %v5601_v10, %v2146_v3  ;;  %v7255_v27 = vand.u32 4294901760, %v5276_v33  ;;  %v5669_v40 = vsub.f32 %v1004_v46, %v5644_v22 }
 0x33f   : > { %1960 = vmatpush.msra.mxu2 %v7254_v35  ;;  %2125 = vmatpush.msrb.mxu0 %v2124_v28  ;;  %v5674_v33 = vand.u32 4294901760, %v1000_v21  ;;  %v5676_v28 = vand.u32 4294901760, %v901_v52  ;;  %v2170_v46 = vand.u32 4294901760, %v5656_v24  ;;  %v2154_v35 = vand.u32 4294901760, %v2153_v58 }
 0x340   : > { %2033 = vmatpush.msra.mxu3 %v5305_v9  ;;  %2068 = vmatpush.msrb.mxu1 %v5539_v17  ;;  %v2142_v9 = vand.u32 4294901760, %v2141_v38  ;;  %v5684_v38 = vsub.f32 %v1002_v23, %v5658_v62 }
 0x341   : > { %1964 = vmatpush.msra.mxu2 %v7255_v27  ;;  %2131 = vmatpush.msrb.mxu0 %v2130_v48  ;;  %7257 = vst [vmem:[#allocation29_spill] sm:$0xff] %v5676_v28  ;;  %v2159_v48 = vsub.f32 %v5629_v37, %v2158_v5  ;;  %v5698_v49 = vsub.f32 %v901_v52, %v5676_v28 }
 0x342   : > { %2035 = vmatpush.msra.mxu3 %v5331_v6  ;;  %2070 = vmatpush.msrb.mxu1 %v5558_v19  ;;  %v2148_v6 = vand.u32 4294901760, %v2147_v47  ;;  %v7259_v47 = vand.u32 4294901760, %v5321_v1  ;;  %v5701_v23 = vsub.f32 %v1000_v21, %v5674_v33  ;;  %v2171_v27 = vsub.f32 %v5656_v24, %v2170_v46 }
 0x343   : > { %1968 = vmatpush.msra.mxu2 %v7256_v8  ;;  %2137 = vmatpush.msrb.mxu0 %v2136_v7  ;;  %v2176_v7 = vand.u32 4294901760, %v5669_v40  ;;  %7260 = vst [vmem:[#allocation54_spill] sm:$0xff] %v5698_v49  ;;  %v7261_v1 = vand.u32 4294901760, %v5337_v2  ;;  %v7262_v21 = vand.u32 4294901760, %v5362_v13  ;;  %v5719_v58 = vand.u32 4294901760, %v5698_v49 }
 0x344   : > { %2037 = vmatpush.msra.mxu3 %v5350_v31  ;;  %2072 = vmatpush.msrb.mxu1 %v5573_v12  ;;  %v2165_v31 = vsub.f32 %v5642_v44, %v2164_v56  ;;  %v2188_v2 = vand.u32 4294901760, %v5701_v23  ;;  %v2172_v8 = vand.u32 4294901760, %v2171_v27  ;;  %v7274_v27 = vld [vmem:[#allocation12_spill] sm:$0xff] }
 0x345   : > { %1972 = vmatpush.msra.mxu2 %v7258_v36  ;;  %2143 = vmatpush.msrb.mxu0 %v2142_v9  ;;  %v2182_v9 = vand.u32 4294901760, %v5684_v38  ;;  %7263 = vst [vmem:[#allocation63_spill] sm:$0xff] %v5719_v58 }
 0x346   : > { %2039 = vmatpush.msra.mxu3 %v5364_v60  ;;  %2074 = vmatpush.msrb.mxu1 %v5588_v32  ;;  %v2160_v60 = vand.u32 4294901760, %v2159_v48  ;;  %v2166_v52 = vand.u32 4294901760, %v2165_v31  ;;  %v7265_v48 = vand.u32 4294901760, %v5389_v63  ;;  %v2189_v36 = vsub.f32 %v5701_v23, %v2188_v2 }
 0x347   : > { %1976 = vmatpush.msra.mxu2 %v7259_v47  ;;  %2149 = vmatpush.msrb.mxu0 %v2148_v6  ;;  %v7264_v6 = vand.u32 4294901760, %v5376_v50  ;;  %v7267_v63 = vand.u32 4294901760, %v5415_v11  ;;  %v7272_v11 = vld [vmem:[#allocation15_spill] sm:$0xff] }
 0x348   : > { %2041 = vmatpush.msra.mxu3 %v5378_v54  ;;  %2076 = vmatpush.msrb.mxu1 %v5603_v18  ;;  %v2177_v54 = vsub.f32 %v5669_v40, %v2176_v7  ;;  %v2190_v31 = vand.u32 4294901760, %v2189_v36  ;;  %v7285_v36 = vand.u32 4294901760, %v5586_v55 }
 0x349   : > { %1980 = vmatpush.msra.mxu2 %v7261_v1  ;;  %2155 = vmatpush.msrb.mxu0 %v2154_v35  ;;  %v7266_v35 = vand.u32 4294901760, %v5402_v0  ;;  %v7269_v0 = vand.u32 4294901760, %v5497_v15  ;;  %v7275_v1 = vand.u32 4294901760, %v7274_v27 }
 0x34a   : > { %2043 = vmatpush.msra.mxu3 %v5391_v51  ;;  %2078 = vmatpush.msrb.mxu1 %v5616_v4  ;;  %v2183_v51 = vsub.f32 %v5684_v38, %v2182_v9  ;;  %v2178_v13 = vand.u32 4294901760, %v2177_v54 }
 0x34b   : > { %1984 = vmatpush.msra.mxu2 %v7262_v21  ;;  %2161 = vmatpush.msrb.mxu0 %v2160_v60  ;;  %v7273_v60 = vand.u32 4294901760, %v7272_v11  ;;  %v7278_v21 = vld [vmem:[#allocation13_spill] sm:$0xff] }
 0x34c   : > { %2045 = vmatpush.msra.mxu3 %v5404_v25  ;;  %2080 = vmatpush.msrb.mxu1 %v5631_v43  ;;  %v2090_v25 = vsub.f32 %v5698_v49, %v5719_v58  ;;  %v2184_v50 = vand.u32 4294901760, %v2183_v51 }
 0x34d   : > { %1988 = vmatpush.msra.mxu2 %v7264_v6  ;;  %2167 = vmatpush.msrb.mxu0 %v2166_v52  ;;  %v7276_v52 = vld [vmem:[#allocation17_spill] sm:$0xff]  ;;  %v935_v6 = vld [vmem:[#allocation5 + $0xf8] sm:$0xff] }
 0x34e   : > { %2047 = vmatpush.msra.mxu3 %v5417_v61  ;;  %2082 = vmatpush.msrb.mxu1 %v5644_v22  ;;  %v5746_v61 = vand.u32 4294901760, %v2090_v25  ;;  %v7277_v54 = vand.u32 4294901760, %v7276_v52  ;;  %v7284_v25 = vand.u32 4294901760, %v5565_v26 }
 0x34f   : > { %1992 = vmatpush.msra.mxu2 %v7265_v48  ;;  %2173 = vmatpush.msrb.mxu0 %v2172_v8  ;;  %v7279_v8 = vand.u32 4294901760, %v7278_v21  ;;  %v5783_v48 = vand.u32 4294901760, %v935_v6 }
 0x350   : > { %2049 = vmatpush.msra.mxu3 %v5432_v39  ;;  %2084 = vmatpush.msrb.mxu1 %v5658_v62  ;;  %7268 = vst [vmem:[#allocation64_spill] sm:$0xff] %v5746_v61  ;;  %v7270_v39 = vld [vmem:[#allocation11_spill] sm:$0xff] }
 0x351   : > { %1996 = vmatpush.msra.mxu2 %v7266_v35  ;;  %2179 = vmatpush.msrb.mxu0 %v2178_v13  ;;  %v7271_v47 = vand.u32 4294901760, %v7270_v39  ;;  %v933_v13 = vld [vmem:[#allocation5 + $0xe8] sm:$0xff] }
 0x352   : > { %2051 = vmatmul.f32.vlgmr.msra.gmra.mxu3 %v5492_v45  ;;  %2086 = vmatpush.msrb.mxu1 %v5674_v33  ;;  %v929_v35 = vld [vmem:[#allocation5 + $0xc8] sm:$0xff] }
 0x353   : > { %2252 = vmatpush.msrb.mxu3 %v5477_v14  ;;  %2000 = vmatpush.msra.mxu2 %v7267_v63  ;;  %v5812_v63 = vand.u32 4294901760, %v929_v35 }
 0x354   : > { %2185 = vmatpush.msrb.mxu0 %v2184_v50  ;;  %2092 = vmatmul.f32.vlgmr.msrb.gmra.mxu1 %v5746_v61 }
 0x355   : > { %2254 = vmatpush.msrb.mxu3 %v5486_v57  ;;  %2293 = vmatpush.msra.mxu1 %v7269_v0  ;;  %v921_v0 = vld [vmem:[#allocation5 + $0x88] sm:$0xff] }
 0x356   : > { %2004 = vmatpush.msra.mxu2 %v7271_v47  ;;  %2191 = vmatpush.msrb.mxu0 %v2190_v31  ;;  %v923_v31 = vld [vmem:[#allocation5 + $0x98] sm:$0xff] }
 0x357   : > { %2256 = vmatpush.msrb.mxu3 %v5500_v29  ;;  %2193 = vmatmul.f32.vlgmr.msrb.gmra.mxu0 %v5676_v28  ;;  %v919_v47 = vld [vmem:[#allocation5 + $0x78] sm:$0xff] }
 0x358   : > { %2297 = vmatpush.msra.mxu1 %v7273_v60  ;;  %2360 = vmatpush.msra.mxu0 %v5477_v14  ;;  %v7280_v14 = vld [vmem:[#allocation20_spill] sm:$0xff] }
 0x359   : > { %2008 = vmatpush.msra.mxu2 %v7275_v1  ;;  %2258 = vmatpush.msrb.mxu3 %v5508_v20  ;;  %v7281_v51 = vand.u32 4294901760, %v7280_v14  ;;  %v5876_v1 = vand.u32 4294901760, %v919_v47 }
 0x35a   : > { %2301 = vmatpush.msra.mxu1 %v7277_v54  ;;  %2362 = vmatpush.msra.mxu0 %v5486_v57  ;;  %v7282_v57 = vand.u32 4294901760, %v5545_v53 }
 0x35b   : > { %2012 = vmatpush.msra.mxu2 %v7279_v8  ;;  %2260 = vmatpush.msrb.mxu3 %v5520_v42  ;;  %v913_v8 = vld [vmem:[#allocation5 + $0x48] sm:$0xff] }
 0x35c   : > { %2014 = vmatmul.f32.vlgmr.msra.gmra.mxu2 %v5492_v45  ;;  %2305 = vmatpush.msra.mxu1 %v7281_v51 }
 0x35d   : > { %2199 = vmatpush.msrb.mxu2 %v5497_v15  ;;  %2364 = vmatpush.msra.mxu0 %v5500_v29  ;;  %v7283_v15 = vand.u32 4294901760, %v5553_v34  ;;  %v931_v29 = vld [vmem:[#allocation5 + $0xd8] sm:$0xff] }
 0x35e   : > { %2262 = vmatpush.msrb.mxu3 %v5525_v30  ;;  %2309 = vmatpush.msra.mxu1 %v7282_v57  ;;  %v5800_v50 = vand.u32 4294901760, %v931_v29 }
 0x35f   : > { %2202 = vmatpush.msrb.mxu2 %v7272_v11  ;;  %2366 = vmatpush.msra.mxu0 %v5508_v20  ;;  %v5790_v20 = vand.u32 4294901760, %v933_v13 }
 0x360   : > { %2264 = vmatpush.msrb.mxu3 %v5539_v17  ;;  %2313 = vmatpush.msra.mxu1 %v7283_v15 }
 0x361   : > { %2205 = vmatpush.msrb.mxu2 %v7276_v52  ;;  %2368 = vmatpush.msra.mxu0 %v5520_v42  ;;  %v5798_v42 = vsub.f32 %v935_v6, %v5783_v48  ;;  %v915_v52 = vld [vmem:[#allocation5 + $0x58] sm:$0xff] }
 0x362   : > { %2266 = vmatpush.msrb.mxu3 %v5558_v19  ;;  %2317 = vmatpush.msra.mxu1 %v7284_v25  ;;  %v5903_v51 = vand.u32 4294901760, %v915_v52  ;;  %v911_v6 = vld [vmem:[#allocation5 + $0x38] sm:$0xff] }
 0x363   : > { %2208 = vmatpush.msrb.mxu2 %v7280_v14  ;;  %2370 = vmatpush.msra.mxu0 %v5525_v30  ;;  %v5808_v30 = vsub.f32 %v933_v13, %v5790_v20  ;;  %v5901_v14 = vsub.f32 %v919_v47, %v5876_v1  ;;  %v5915_v13 = vand.u32 4294901760, %v913_v8 }
 0x364   : > { %2268 = vmatpush.msrb.mxu3 %v5573_v12  ;;  %2321 = vmatpush.msra.mxu1 %v7285_v36  ;;  %v5925_v36 = vsub.f32 %v915_v52, %v5903_v51 }
 0x365   : > { %2211 = vmatpush.msrb.mxu2 %v5545_v53  ;;  %2372 = vmatpush.msra.mxu0 %v5539_v17  ;;  %v927_v53 = vld [vmem:[#allocation5 + $0xb8] sm:$0xff]  ;;  %v7068_v17 = vand.u32 4294901760, %v5798_v42  ;;  %v7059_v25 = vand.u32 4294901760, %v5901_v14 }
 0x366   : > { %2270 = vmatpush.msrb.mxu3 %v5588_v32  ;;  %2325 = vmatpush.msra.mxu1 %v2146_v3  ;;  %v925_v3 = vld [vmem:[#allocation5 + $0xa8] sm:$0xff] }
 0x367   : > { %2214 = vmatpush.msrb.mxu2 %v5553_v34  ;;  %2374 = vmatpush.msra.mxu0 %v5558_v19  ;;  %v5819_v34 = vsub.f32 %v931_v29, %v5800_v50  ;;  %v5823_v19 = vand.u32 4294901760, %v927_v53  ;;  %v909_v29 = vld [vmem:[#allocation5 + $0x28] sm:$0xff]  ;;  %v2488_v47 = vsub.f32 %v5901_v14, %v7059_v25  ;;  %v955_v25 = vld [vmem:[#allocation5 + $0x198] sm:$0xff] }
 0x368   : > { %2272 = vmatpush.msrb.mxu3 %v5603_v18  ;;  %2329 = vmatpush.msra.mxu1 %v2152_v41  ;;  %v5832_v41 = vsub.f32 %v929_v35, %v5812_v63  ;;  %v5927_v35 = vand.u32 4294901760, %v911_v6 }
 0x369   : > { %2217 = vmatpush.msrb.mxu2 %v5565_v26  ;;  %2376 = vmatpush.msra.mxu0 %v5573_v12  ;;  %v7067_v26 = vand.u32 4294901760, %v5808_v30  ;;  %v5834_v12 = vand.u32 4294901760, %v925_v3  ;;  %v5848_v39 = vsub.f32 %v927_v53, %v5823_v19  ;;  %v907_v53 = vld [vmem:[#allocation5 + $0x18] sm:$0xff] }
 0x36a   : > { %2274 = vmatpush.msrb.mxu3 %v5616_v4  ;;  %2333 = vmatpush.msra.mxu1 %v2158_v5  ;;  %v7066_v5 = vand.u32 4294901760, %v5819_v34 }
 0x36b   : > { %2220 = vmatpush.msrb.mxu2 %v5586_v55  ;;  %2378 = vmatpush.msra.mxu0 %v5588_v32  ;;  %v2440_v55 = vsub.f32 %v5798_v42, %v7068_v17  ;;  %v5843_v32 = vand.u32 4294901760, %v923_v31  ;;  %v5862_v11 = vsub.f32 %v925_v3, %v5834_v12  ;;  %v7064_v27 = vand.u32 4294901760, %v5848_v39 }
 0x36c   : > { %2276 = vmatpush.msrb.mxu3 %v5631_v43  ;;  %2337 = vmatpush.msra.mxu1 %v2164_v56  ;;  %v5856_v56 = vand.u32 4294901760, %v921_v0 }
 0x36d   : > { %2223 = vmatpush.msrb.mxu2 %v5601_v10  ;;  %2380 = vmatpush.msra.mxu0 %v5603_v18  ;;  %v2446_v10 = vsub.f32 %v5808_v30, %v7067_v26  ;;  %v7065_v18 = vand.u32 4294901760, %v5832_v41  ;;  %v5871_v60 = vsub.f32 %v923_v31, %v5843_v32  ;;  %v7062_v54 = vand.u32 4294901760, %v5862_v11  ;;  %v7289_v26 = vld [vmem:[#allocation57_spill] sm:$0xff] }
 0x36e   : > { %2278 = vmatpush.msrb.mxu3 %v5644_v22  ;;  %2341 = vmatpush.msra.mxu1 %v2170_v46  ;;  %v2452_v46 = vsub.f32 %v5819_v34, %v7066_v5 }
 0x36f   : > { %2226 = vmatpush.msrb.mxu2 %v5614_v16  ;;  %2382 = vmatpush.msra.mxu0 %v5616_v4  ;;  %v2441_v16 = vand.u32 4294901760, %v2440_v55  ;;  %v917_v4 = vld [vmem:[#allocation5 + $0x68] sm:$0xff]  ;;  %v5939_v55 = vand.u32 4294901760, %v909_v29 }
 0x370   : > { %2280 = vmatpush.msrb.mxu3 %v5658_v62  ;;  %2345 = vmatpush.msra.mxu1 %v2176_v7  ;;  %v5882_v7 = vsub.f32 %v921_v0, %v5856_v56  ;;  %v5890_v21 = vand.u32 4294901760, %v917_v4  ;;  %v5937_v0 = vsub.f32 %v913_v8, %v5915_v13  ;;  %v2489_v8 = vand.u32 4294901760, %v2488_v47 }
 0x371   : > { %2229 = vmatpush.msrb.mxu2 %v5629_v37  ;;  %2384 = vmatpush.msra.mxu0 %v5631_v43  ;;  %v2447_v37 = vand.u32 4294901760, %v2446_v10  ;;  %v2458_v43 = vsub.f32 %v5832_v41, %v7065_v18  ;;  %v905_v10 = vld [vmem:[#allocation5 + $0x8] sm:$0xff]  ;;  %v951_v18 = vld [vmem:[#allocation5 + $0x178] sm:$0xff] }
 0x372   : > { %2282 = vmatpush.msrb.mxu3 %v5674_v33  ;;  %2349 = vmatpush.msra.mxu1 %v2182_v9  ;;  %v7061_v9 = vand.u32 4294901760, %v5871_v60  ;;  %v5913_v57 = vsub.f32 %v917_v4, %v5890_v21  ;;  %v5951_v4 = vand.u32 4294901760, %v907_v53  ;;  %v7055_v52 = vand.u32 4294901760, %v5937_v0 }
 0x373   : > { %2232 = vmatpush.msrb.mxu2 %v5642_v44  ;;  %2386 = vmatpush.msra.mxu0 %v5644_v22  ;;  %v2453_v44 = vand.u32 4294901760, %v2452_v46  ;;  %v2464_v22 = vsub.f32 %v5848_v39, %v7064_v27  ;;  %v5949_v46 = vsub.f32 %v911_v6, %v5927_v35 }
 0x374   : > { %2286 = vmatmul.f32.vlgmr.msrb.gmra.mxu3 %v5719_v58  ;;  %2353 = vmatpush.msra.mxu1 %v2188_v2  ;;  %v2470_v2 = vsub.f32 %v5862_v11, %v7062_v54  ;;  %v2476_v15 = vsub.f32 %v5871_v60, %v7061_v9  ;;  %v7058_v31 = vand.u32 4294901760, %v5913_v57  ;;  %v953_v9 = vld [vmem:[#allocation5 + $0x188] sm:$0xff]  ;;  %v7286_v54 = vld [vmem:[#allocation55_spill] sm:$0xff] }
 0x375   : > { %2442 = vmatpush.msra.mxu3 %v2441_v16  ;;  %2235 = vmatpush.msrb.mxu2 %v5656_v24  ;;  %v7060_v24 = vand.u32 4294901760, %v5882_v7  ;;  %v7056_v16 = vand.u32 4294901760, %v5925_v36  ;;  %v7053_v6 = vand.u32 4294901760, %v5949_v46 }
 0x376   : > { %2388 = vmatpush.msra.mxu0 %v5658_v62  ;;  %2355 = vmatmul.f32.vlgmr.msra.gmra.mxu1 %v5676_v28  ;;  %v2459_v62 = vand.u32 4294901760, %v2458_v43  ;;  %v2471_v3 = vand.u32 4294901760, %v2470_v2  ;;  %v5961_v43 = vsub.f32 %v909_v29, %v5939_v55 }
 0x377   : > { %2448 = vmatpush.msra.mxu3 %v2447_v37  ;;  %2540 = vmatpush.msrb.mxu1 %v5798_v42  ;;  %v2494_v37 = vsub.f32 %v5913_v57, %v7058_v31  ;;  %v957_v31 = vld [vmem:[#allocation5 + $0x1a8] sm:$0xff] }
 0x378   : > { %2238 = vmatpush.msrb.mxu2 %v5669_v40  ;;  %2390 = vmatpush.msra.mxu0 %v5674_v33  ;;  %v2465_v40 = vand.u32 4294901760, %v2464_v22  ;;  %v2482_v33 = vsub.f32 %v5882_v7, %v7060_v24  ;;  %v2500_v22 = vsub.f32 %v5925_v36, %v7056_v16  ;;  %v7052_v29 = vand.u32 4294901760, %v5961_v43 }
 0x379   : > { %2454 = vmatpush.msra.mxu3 %v2453_v44  ;;  %2392 = vmatmul.f32.vlgmr.msra.gmra.mxu0 %v5676_v28  ;;  %v5963_v44 = vand.u32 4294901760, %v905_v10  ;;  %v2495_v2 = vand.u32 4294901760, %v2494_v37  ;;  %v965_v37 = vld [vmem:[#allocation5 + $0x1e8] sm:$0xff] }
 0x37a   : > { %2543 = vmatpush.msrb.mxu1 %v5808_v30  ;;  %2593 = vmatpush.msrb.mxu0 %v5783_v48  ;;  %v2518_v47 = vsub.f32 %v5961_v43, %v7052_v29  ;;  %v963_v29 = vld [vmem:[#allocation5 + $0x1d8] sm:$0xff] }
 0x37b   : > { %2241 = vmatpush.msrb.mxu2 %v5684_v38  ;;  %2460 = vmatpush.msra.mxu3 %v2459_v62  ;;  %v2477_v38 = vand.u32 4294901760, %v2476_v15  ;;  %v5973_v62 = vsub.f32 %v907_v53, %v5951_v4  ;;  %v2506_v15 = vsub.f32 %v5937_v0, %v7055_v52  ;;  %v2512_v53 = vsub.f32 %v5949_v46, %v7053_v6 }
 0x37c   : > { %2546 = vmatpush.msrb.mxu1 %v5819_v34  ;;  %2595 = vmatpush.msrb.mxu0 %v5790_v20  ;;  %v2519_v6 = vand.u32 4294901760, %v2518_v47  ;;  %v6021_v16 = vand.u32 4294901760, %v963_v29  ;;  %v959_v47 = vld [vmem:[#allocation5 + $0x1b8] sm:$0xff] }
 0x37d   : > { %2244 = vmatpush.msrb.mxu2 %v5701_v23  ;;  %2466 = vmatpush.msra.mxu3 %v2465_v40  ;;  %v2483_v23 = vand.u32 4294901760, %v2482_v33  ;;  %v5983_v40 = vsub.f32 %v905_v10, %v5963_v44  ;;  %v2501_v33 = vand.u32 4294901760, %v2500_v22  ;;  %v2507_v10 = vand.u32 4294901760, %v2506_v15 }
 0x37e   : > { %2247 = vmatmul.f32.vlgmr.msrb.gmra.mxu2 %v5698_v49  ;;  %2549 = vmatpush.msrb.mxu1 %v5832_v41  ;;  %v2513_v22 = vand.u32 4294901760, %v2512_v53  ;;  %v6009_v15 = vand.u32 4294901760, %v965_v37  ;;  %v6086_v49 = vand.u32 4294901760, %v951_v18 }
 0x37f   : > { %2397 = vmatpush.msra.mxu2 %v5783_v48  ;;  %2597 = vmatpush.msrb.mxu0 %v5800_v50 }
 0x380   : > { %2472 = vmatpush.msra.mxu3 %v2471_v3  ;;  %2552 = vmatpush.msrb.mxu1 %v5848_v39  ;;  %v7054_v3 = vand.u32 4294901760, %v5973_v62 }
 0x381   : > { %2399 = vmatpush.msra.mxu2 %v5790_v20  ;;  %2599 = vmatpush.msrb.mxu0 %v5812_v63 }
 0x382   : > { %2478 = vmatpush.msra.mxu3 %v2477_v38  ;;  %2555 = vmatpush.msrb.mxu1 %v5862_v11  ;;  %v967_v38 = vld [vmem:[#allocation5 + $0x1f8] sm:$0xff] }
 0x383   : > { %2401 = vmatpush.msra.mxu2 %v5800_v50  ;;  %2601 = vmatpush.msrb.mxu0 %v5823_v19 }
 0x384   : > { %2484 = vmatpush.msra.mxu3 %v2483_v23  ;;  %2558 = vmatpush.msrb.mxu1 %v5871_v60  ;;  %v7057_v23 = vand.u32 4294901760, %v5983_v40 }
 0x385   : > { %2403 = vmatpush.msra.mxu2 %v5812_v63  ;;  %2603 = vmatpush.msrb.mxu0 %v5834_v12 }
 0x386   : > { %2490 = vmatpush.msra.mxu3 %v2489_v8  ;;  %2561 = vmatpush.msrb.mxu1 %v5882_v7  ;;  %v6001_v8 = vand.u32 4294901760, %v967_v38 }
 0x387   : > { %2405 = vmatpush.msra.mxu2 %v5823_v19  ;;  %2605 = vmatpush.msrb.mxu0 %v5843_v32 }
 0x388   : > { %2496 = vmatpush.msra.mxu3 %v2495_v2  ;;  %2564 = vmatpush.msrb.mxu1 %v5901_v14  ;;  %v2524_v2 = vsub.f32 %v5973_v62, %v7054_v3  ;;  %v6018_v53 = vsub.f32 %v967_v38, %v6001_v8  ;;  %v961_v3 = vld [vmem:[#allocation5 + $0x1c8] sm:$0xff] }
 0x389   : > { %2407 = vmatpush.msra.mxu2 %v5834_v12  ;;  %2607 = vmatpush.msrb.mxu0 %v5856_v56 }
 0x38a   : > { %2502 = vmatpush.msra.mxu3 %v2501_v33  ;;  %2567 = vmatpush.msrb.mxu1 %v5913_v57  ;;  %v2530_v33 = vsub.f32 %v5983_v40, %v7057_v23  ;;  %v2525_v52 = vand.u32 4294901760, %v2524_v2  ;;  %v6029_v23 = vand.u32 4294901760, %v961_v3  ;;  %v6038_v2 = vand.u32 4294901760, %v959_v47 }
 0x38b   : > { %2409 = vmatpush.msra.mxu2 %v5843_v32  ;;  %2609 = vmatpush.msrb.mxu0 %v5876_v1 }
 0x38c   : > { %2508 = vmatpush.msra.mxu3 %v2507_v10  ;;  %2570 = vmatpush.msrb.mxu1 %v5925_v36  ;;  %v6026_v10 = vsub.f32 %v965_v37, %v6009_v15  ;;  %v2531_v38 = vand.u32 4294901760, %v2530_v33  ;;  %v6036_v37 = vsub.f32 %v963_v29, %v6021_v16  ;;  %v6043_v33 = vand.u32 4294901760, %v957_v31 }
 0x38d   : > { %2411 = vmatpush.msra.mxu2 %v5856_v56  ;;  %2611 = vmatpush.msrb.mxu0 %v5890_v21  ;;  %v6047_v24 = vsub.f32 %v961_v3, %v6029_v23  ;;  %v6054_v29 = vand.u32 4294901760, %v955_v25  ;;  %v6060_v3 = vsub.f32 %v959_v47, %v6038_v2  ;;  %v6073_v47 = vand.u32 4294901760, %v953_v9 }
 0x38e   : > { %2514 = vmatpush.msra.mxu3 %v2513_v22  ;;  %2573 = vmatpush.msrb.mxu1 %v5937_v0  ;;  %v7063_v22 = vand.u32 4294901760, %v6018_v53  ;;  %v6068_v27 = vsub.f32 %v957_v31, %v6043_v33 }
 0x38f   : > { %2413 = vmatpush.msra.mxu2 %v5876_v1  ;;  %2613 = vmatpush.msrb.mxu0 %v5903_v51  ;;  %7287 = vst [vmem:[#allocation11_spill] sm:$0xff] %v6060_v3  ;;  %v6078_v17 = vsub.f32 %v955_v25, %v6054_v29  ;;  %v947_v25 = vld [vmem:[#allocation5 + $0x158] sm:$0xff]  ;;  %v7291_v58 = vand.u32 4294901760, %v6047_v24  ;;  %v6097_v5 = vsub.f32 %v953_v9, %v6073_v47 }
 0x390   : > { %2520 = vmatpush.msra.mxu3 %v2519_v6  ;;  %2576 = vmatpush.msrb.mxu1 %v5949_v46  ;;  %v7069_v6 = vand.u32 4294901760, %v6026_v10  ;;  %7288 = vst [vmem:[#allocation15_spill] sm:$0xff] %v6068_v27  ;;  %v6109_v9 = vsub.f32 %v951_v18, %v6086_v49  ;;  %v6111_v61 = vand.u32 4294901760, %v947_v25 }
 0x391   : > { %2415 = vmatpush.msra.mxu2 %v5890_v21  ;;  %2615 = vmatpush.msrb.mxu0 %v5915_v13 }
 0x392   : > { %2526 = vmatpush.msra.mxu3 %v2525_v52  ;;  %2579 = vmatpush.msrb.mxu1 %v5961_v43  ;;  %v2781_v52 = vsub.f32 %v6018_v53, %v7063_v22  ;;  %v2787_v22 = vsub.f32 %v6026_v10, %v7069_v6  ;;  %v949_v6 = vld [vmem:[#allocation5 + $0x168] sm:$0xff] }
 0x393   : > { %2417 = vmatpush.msra.mxu2 %v5903_v51  ;;  %2617 = vmatpush.msrb.mxu0 %v5927_v35  ;;  %v6099_v28 = vand.u32 4294901760, %v949_v6 }
 0x394   : > { %2532 = vmatpush.msra.mxu3 %v2531_v38  ;;  %2582 = vmatpush.msrb.mxu1 %v5973_v62  ;;  %v7072_v38 = vand.u32 4294901760, %v6036_v37 }
 0x395   : > { %2419 = vmatpush.msra.mxu2 %v5915_v13  ;;  %2619 = vmatpush.msrb.mxu0 %v5939_v55  ;;  %v6121_v18 = vsub.f32 %v949_v6, %v6099_v28  ;;  %v6134_v6 = vsub.f32 %v947_v25, %v6111_v61 }
 0x396   : > { %2534 = vmatmul.f32.vlgmr.msra.gmra.mxu3 %v7286_v54  ;;  %2585 = vmatpush.msrb.mxu1 %v5983_v40  ;;  %v2793_v31 = vsub.f32 %v6036_v37, %v7072_v38  ;;  %v2799_v38 = vsub.f32 %v6047_v24, %v7291_v58 }
 0x397   : > { %2701 = vmatpush.msrb.mxu3 %v5783_v48  ;;  %2421 = vmatpush.msra.mxu2 %v5927_v35  ;;  %v2782_v48 = vand.u32 4294901760, %v2781_v52  ;;  %v7290_v52 = vld [vmem:[#allocation59_spill] sm:$0xff] }
 0x398   : > { %2621 = vmatpush.msrb.mxu0 %v5951_v4  ;;  %2588 = vmatmul.f32.vlgmr.msrb.gmra.mxu1 %v7289_v26  ;;  %v7292_v26 = vand.u32 4294901760, %v6060_v3 }
 0x399   : > { %2703 = vmatpush.msrb.mxu3 %v5790_v20  ;;  %2738 = vmatpush.msra.mxu1 %v6001_v8  ;;  %v2788_v20 = vand.u32 4294901760, %v2787_v22  ;;  %v945_v22 = vld [vmem:[#allocation5 + $0x148] sm:$0xff] }
 0x39a   : > { %2423 = vmatpush.msra.mxu2 %v5939_v55  ;;  %2623 = vmatpush.msrb.mxu0 %v5963_v44  ;;  %v2805_v58 = vsub.f32 %v6060_v3, %v7292_v26  ;;  %v6123_v45 = vand.u32 4294901760, %v945_v22  ;;  %v939_v3 = vld [vmem:[#allocation5 + $0x118] sm:$0xff] }
 0x39b   : > { %2705 = vmatpush.msrb.mxu3 %v5800_v50  ;;  %2627 = vmatmul.f32.vlgmr.msrb.gmra.mxu0 %v7290_v52  ;;  %v2794_v52 = vand.u32 4294901760, %v2793_v31  ;;  %v2800_v31 = vand.u32 4294901760, %v2799_v38  ;;  %v2828_v38 = vand.u32 4294901760, %v6109_v9 }
 0x39c   : > { %2740 = vmatpush.msra.mxu1 %v6009_v15  ;;  %2783 = vmatpush.msra.mxu0 %v2782_v48  ;;  %v7293_v48 = vand.u32 4294901760, %v6068_v27  ;;  %v6147_v25 = vsub.f32 %v945_v22, %v6123_v45 }
 0x39d   : > { %2425 = vmatpush.msra.mxu2 %v5951_v4  ;;  %2707 = vmatpush.msrb.mxu3 %v5812_v63  ;;  %v943_v63 = vld [vmem:[#allocation5 + $0x138] sm:$0xff] }
 0x39e   : > { %2742 = vmatpush.msra.mxu1 %v6021_v16  ;;  %2789 = vmatpush.msra.mxu0 %v2788_v20  ;;  %v2811_v50 = vsub.f32 %v6068_v27, %v7293_v48  ;;  %v7295_v20 = vand.u32 4294901760, %v5798_v42  ;;  %v7296_v48 = vand.u32 4294901760, %v6078_v17  ;;  %v6136_v26 = vand.u32 4294901760, %v943_v63 }
 0x39f   : > { %2427 = vmatpush.msra.mxu2 %v5963_v44  ;;  %2709 = vmatpush.msrb.mxu3 %v5823_v19  ;;  %v2806_v19 = vand.u32 4294901760, %v2805_v58  ;;  %v7297_v42 = vand.u32 4294901760, %v5808_v30  ;;  %v2834_v58 = vand.u32 4294901760, %v6121_v18  ;;  %v7299_v30 = vand.u32 4294901760, %v5819_v34 }
 0x3a0   : > { %2433 = vmatmul.f32.vlgmr.msra.gmra.mxu2 %v7294_v59  ;;  %2744 = vmatpush.msra.mxu1 %v6029_v23  ;;  %v2817_v27 = vsub.f32 %v6078_v17, %v7296_v48  ;;  %v941_v59 = vld [vmem:[#allocation5 + $0x128] sm:$0xff]  ;;  %v6160_v22 = vsub.f32 %v943_v63, %v6136_v26  ;;  %v7300_v34 = vand.u32 4294901760, %v5832_v41 }
 0x3a1   : > { %2634 = vmatpush.msrb.mxu2 %v7295_v20  ;;  %2795 = vmatpush.msra.mxu0 %v2794_v52  ;;  %v2812_v20 = vand.u32 4294901760, %v2811_v50  ;;  %v6149_v48 = vand.u32 4294901760, %v941_v59 }
 0x3a2   : > { %2711 = vmatpush.msrb.mxu3 %v5834_v12  ;;  %2746 = vmatpush.msra.mxu1 %v6038_v2  ;;  %v7298_v12 = vand.u32 4294901760, %v6097_v5  ;;  %v2818_v50 = vand.u32 4294901760, %v2817_v27  ;;  %v2835_v27 = vsub.f32 %v6121_v18, %v2834_v58 }
 0x3a3   : > { %2638 = vmatpush.msrb.mxu2 %v7297_v42  ;;  %2801 = vmatpush.msra.mxu0 %v2800_v31  ;;  %v2840_v31 = vand.u32 4294901760, %v6134_v6  ;;  %v6162_v42 = vand.u32 4294901760, %v939_v3  ;;  %v6173_v63 = vsub.f32 %v941_v59, %v6149_v48 }
 0x3a4   : > { %2713 = vmatpush.msrb.mxu3 %v5843_v32  ;;  %v2823_v52 = vsub.f32 %v6097_v5, %v7298_v12  ;;  %2748 = vmatpush.msra.mxu1 %v6043_v33  ;;  %v2829_v32 = vsub.f32 %v6109_v9, %v2828_v38  ;;  %v937_v12 = vld [vmem:[#allocation5 + $0x108] sm:$0xff] }
 0x3a5   : > { %2642 = vmatpush.msrb.mxu2 %v7299_v30  ;;  %2807 = vmatpush.msra.mxu0 %v2806_v19  ;;  %v2846_v19 = vand.u32 4294901760, %v6147_v25  ;;  %v7301_v30 = vand.u32 4294901760, %v5848_v39  ;;  %v6178_v41 = vand.u32 4294901760, %v937_v12  ;;  %v6186_v59 = vsub.f32 %v939_v3, %v6162_v42 }
 0x3a6   : > { %2715 = vmatpush.msrb.mxu3 %v5856_v56  ;;  %2750 = vmatpush.msra.mxu1 %v6054_v29  ;;  %v2824_v56 = vand.u32 4294901760, %v2823_v52  ;;  %v2852_v52 = vand.u32 4294901760, %v6160_v22  ;;  %v7302_v39 = vand.u32 4294901760, %v5862_v11 }
 0x3a7   : > { %2646 = vmatpush.msrb.mxu2 %v7300_v34  ;;  %2813 = vmatpush.msra.mxu0 %v2812_v20  ;;  %v2841_v20 = vsub.f32 %v6134_v6, %v2840_v31  ;;  %v7303_v34 = vand.u32 4294901760, %v5871_v60  ;;  %v6200_v11 = vsub.f32 %v937_v12, %v6178_v41  ;;  %v7305_v12 = vand.u32 4294901760, %v5901_v14 }
 0x3a8   : > { %2717 = vmatpush.msrb.mxu3 %v5876_v1  ;;  %2752 = vmatpush.msra.mxu1 %v6073_v47  ;;  %v2830_v1 = vand.u32 4294901760, %v2829_v32  ;;  %v2858_v32 = vand.u32 4294901760, %v6173_v63 }
 0x3a9   : > { %2650 = vmatpush.msrb.mxu2 %v7301_v30  ;;  %2819 = vmatpush.msra.mxu0 %v2818_v50  ;;  %v2836_v50 = vand.u32 4294901760, %v2835_v27  ;;  %v2842_v3 = vand.u32 4294901760, %v2841_v20  ;;  %v7304_v27 = vand.u32 4294901760, %v5882_v7  ;;  %v2870_v30 = vand.u32 4294901760, %v6200_v11 }
 0x3aa   : > { %2719 = vmatpush.msrb.mxu3 %v5890_v21  ;;  %2754 = vmatpush.msra.mxu1 %v6086_v49  ;;  %v2847_v21 = vsub.f32 %v6147_v25, %v2846_v19  ;;  %v7307_v20 = vand.u32 4294901760, %v5925_v36  ;;  %v7309_v36 = vand.u32 4294901760, %v5949_v46  ;;  %v7314_v46 = vand.u32 4294901760, %v6026_v10 }
 0x3ab   : > { %2654 = vmatpush.msrb.mxu2 %v7302_v39  ;;  %2825 = vmatpush.msra.mxu0 %v2824_v56  ;;  %v2864_v56 = vand.u32 4294901760, %v6186_v59  ;;  %v7308_v39 = vand.u32 4294901760, %v5937_v0  ;;  %v7311_v0 = vand.u32 4294901760, %v6018_v53 }
 0x3ac   : > { %2721 = vmatpush.msrb.mxu3 %v5903_v51  ;;  %2756 = vmatpush.msra.mxu1 %v6099_v28  ;;  %v2853_v51 = vsub.f32 %v6160_v22, %v2852_v52  ;;  %v2848_v60 = vand.u32 4294901760, %v2847_v21  ;;  %v7313_v21 = vld [vmem:[#allocation56_spill] sm:$0xff] }
 0x3ad   : > { %2658 = vmatpush.msrb.mxu2 %v7303_v34  ;;  %2831 = vmatpush.msra.mxu0 %v2830_v1  ;;  %v7306_v1 = vand.u32 4294901760, %v5913_v57  ;;  %v7315_v34 = vand.u32 4294901760, %v5973_v62  ;;  %v999_v62 = vld [vmem:[#allocation5 + $0x2f8] sm:$0xff] }
 0x3ae   : > { %2723 = vmatpush.msrb.mxu3 %v5915_v13  ;;  %2758 = vmatpush.msra.mxu1 %v6111_v61  ;;  %v2859_v13 = vsub.f32 %v6173_v63, %v2858_v32  ;;  %v2854_v7 = vand.u32 4294901760, %v2853_v51 }
 0x3af   : > { %2662 = vmatpush.msrb.mxu2 %v7304_v27  ;;  %2837 = vmatpush.msra.mxu0 %v2836_v50  ;;  %v7310_v50 = vld [vmem:[#allocation62_spill] sm:$0xff]  ;;  %v6275_v27 = vand.u32 4294901760, %v999_v62 }
 0x3b0   : > { %2725 = vmatpush.msrb.mxu3 %v5927_v35  ;;  %2760 = vmatpush.msra.mxu1 %v6123_v45  ;;  %v2865_v35 = vsub.f32 %v6186_v59, %v2864_v56  ;;  %v2860_v14 = vand.u32 4294901760, %v2859_v13  ;;  %v991_v13 = vld [vmem:[#allocation5 + $0x2b8] sm:$0xff] }
 0x3b1   : > { %2666 = vmatpush.msrb.mxu2 %v7305_v12  ;;  %2843 = vmatpush.msra.mxu0 %v2842_v3  ;;  %v7316_v3 = vand.u32 4294901760, %v6036_v37 }
 0x3b2   : > { %2727 = vmatpush.msrb.mxu3 %v5939_v55  ;;  %2762 = vmatpush.msra.mxu1 %v6136_v26  ;;  %v2871_v55 = vsub.f32 %v6200_v11, %v2870_v30  ;;  %v2866_v57 = vand.u32 4294901760, %v2865_v35  ;;  %v987_v35 = vld [vmem:[#allocation5 + $0x298] sm:$0xff] }
 0x3b3   : > { %2670 = vmatpush.msrb.mxu2 %v7306_v1  ;;  %2849 = vmatpush.msra.mxu0 %v2848_v60  ;;  %v985_v1 = vld [vmem:[#allocation5 + $0x288] sm:$0xff] }
 0x3b4   : > { %2729 = vmatpush.msrb.mxu3 %v5951_v4  ;;  %2764 = vmatpush.msra.mxu1 %v6149_v48  ;;  %v2872_v4 = vand.u32 4294901760, %v2871_v55 }
 0x3b5   : > { %2674 = vmatpush.msrb.mxu2 %v7307_v20  ;;  %2855 = vmatpush.msra.mxu0 %v2854_v7  ;;  %v983_v20 = vld [vmem:[#allocation5 + $0x278] sm:$0xff] }
 0x3b6   : > { %2731 = vmatpush.msrb.mxu3 %v5963_v44  ;;  %2766 = vmatpush.msra.mxu1 %v6162_v42  ;;  %v7312_v44 = vand.u32 4294901760, %v5961_v43  ;;  %v7317_v43 = vand.u32 4294901760, %v5983_v40  ;;  %v7321_v40 = vld [vmem:[#allocation15_spill] sm:$0xff] }
 0x3b7   : > { %2678 = vmatpush.msrb.mxu2 %v7308_v39  ;;  %2861 = vmatpush.msra.mxu0 %v2860_v14 }
 0x3b8   : > { %2733 = vmatmul.f32.vlgmr.msrb.gmra.mxu3 %v7286_v54  ;;  %2768 = vmatpush.msra.mxu1 %v6178_v41 }
 0x3b9   : > { %2934 = vmatpush.msra.mxu3 %v6001_v8  ;;  %2682 = vmatpush.msrb.mxu2 %v7309_v36  ;;  %v6368_v36 = vand.u32 4294901760, %v983_v20 }
 0x3ba   : > { %2867 = vmatpush.msra.mxu0 %v2866_v57  ;;  %2774 = vmatmul.f32.vlgmr.msra.gmra.mxu1 %v7310_v50  ;;  %v7325_v50 = vld [vmem:[#allocation60_spill] sm:$0xff] }
 0x3bb   : > { %2936 = vmatpush.msra.mxu3 %v6009_v15  ;;  %2975 = vmatpush.msrb.mxu1 %v7311_v0 }
 0x3bc   : > { %2686 = vmatpush.msrb.mxu2 %v7312_v44  ;;  %2873 = vmatpush.msra.mxu0 %v2872_v4  ;;  %v979_v4 = vld [vmem:[#allocation5 + $0x258] sm:$0xff] }
 0x3bd   : > { %2938 = vmatpush.msra.mxu3 %v6021_v16  ;;  %2875 = vmatmul.f32.vlgmr.msra.gmra.mxu0 %v7313_v21 }
 0x3be   : > { %2979 = vmatpush.msrb.mxu1 %v7314_v46  ;;  %3042 = vmatpush.msrb.mxu0 %v6001_v8  ;;  %v7318_v8 = vand.u32 4294901760, %v6047_v24  ;;  %v977_v46 = vld [vmem:[#allocation5 + $0x248] sm:$0xff] }
 0x3bf   : > { %2690 = vmatpush.msrb.mxu2 %v7315_v34  ;;  %2940 = vmatpush.msra.mxu3 %v6029_v23  ;;  %v6393_v34 = vsub.f32 %v983_v20, %v6368_v36 }
 0x3c0   : > { %2983 = vmatpush.msrb.mxu1 %v7316_v3  ;;  %3044 = vmatpush.msrb.mxu0 %v6009_v15  ;;  %v7319_v15 = vld [vmem:[#allocation11_spill] sm:$0xff]  ;;  %v6395_v3 = vand.u32 4294901760, %v979_v4 }
 0x3c1   : > { %2694 = vmatpush.msrb.mxu2 %v7317_v43  ;;  %2942 = vmatpush.msra.mxu3 %v6038_v2  ;;  %v7320_v51 = vand.u32 4294901760, %v7319_v15  ;;  %v975_v43 = vld [vmem:[#allocation5 + $0x238] sm:$0xff] }
 0x3c2   : > { %2696 = vmatmul.f32.vlgmr.msrb.gmra.mxu2 %v7286_v54  ;;  %2987 = vmatpush.msrb.mxu1 %v7318_v8  ;;  %v997_v54 = vld [vmem:[#allocation5 + $0x2e8] sm:$0xff] }
 0x3c3   : > { %2881 = vmatpush.msra.mxu2 %v6018_v53  ;;  %3046 = vmatpush.msrb.mxu0 %v6021_v16  ;;  %v7322_v53 = vand.u32 4294901760, %v7321_v40  ;;  %v995_v16 = vld [vmem:[#allocation5 + $0x2d8] sm:$0xff] }
 0x3c4   : > { %2944 = vmatpush.msra.mxu3 %v6043_v33  ;;  %2991 = vmatpush.msrb.mxu1 %v7320_v51  ;;  %v6292_v60 = vand.u32 4294901760, %v995_v16  ;;  %v973_v51 = vld [vmem:[#allocation5 + $0x228] sm:$0xff] }
 0x3c5   : > { %2884 = vmatpush.msra.mxu2 %v6026_v10  ;;  %3048 = vmatpush.msrb.mxu0 %v6029_v23  ;;  %v7323_v10 = vand.u32 4294901760, %v6078_v17  ;;  %v6282_v23 = vand.u32 4294901760, %v997_v54 }
 0x3c6   : > { %2946 = vmatpush.msra.mxu3 %v6054_v29  ;;  %2995 = vmatpush.msrb.mxu1 %v7322_v53  ;;  %v6311_v7 = vsub.f32 %v995_v16, %v6292_v60  ;;  %v6419_v53 = vand.u32 4294901760, %v975_v43  ;;  %v971_v16 = vld [vmem:[#allocation5 + $0x218] sm:$0xff] }
 0x3c7   : > { %2887 = vmatpush.msra.mxu2 %v6036_v37  ;;  %3050 = vmatpush.msrb.mxu0 %v6038_v2  ;;  %v7324_v37 = vand.u32 4294901760, %v6097_v5  ;;  %v6290_v2 = vsub.f32 %v999_v62, %v6275_v27  ;;  %v6407_v62 = vand.u32 4294901760, %v977_v46 }
 0x3c8   : > { %2948 = vmatpush.msra.mxu3 %v6073_v47  ;;  %2999 = vmatpush.msrb.mxu1 %v7323_v10 }
 0x3c9   : > { %2890 = vmatpush.msra.mxu2 %v6047_v24  ;;  %3052 = vmatpush.msrb.mxu0 %v6043_v33  ;;  %v993_v24 = vld [vmem:[#allocation5 + $0x2c8] sm:$0xff]  ;;  %v6300_v33 = vsub.f32 %v997_v54, %v6282_v23  ;;  %v7091_v54 = vand.u32 4294901760, %v6393_v34 }
 0x3ca   : > { %2950 = vmatpush.msra.mxu3 %v6086_v49  ;;  %3003 = vmatpush.msrb.mxu1 %v7324_v37  ;;  %v6304_v12 = vand.u32 4294901760, %v993_v24  ;;  %v6429_v37 = vsub.f32 %v977_v46, %v6407_v62 }
 0x3cb   : > { %2893 = vmatpush.msra.mxu2 %v7319_v15  ;;  %3054 = vmatpush.msrb.mxu0 %v6054_v29  ;;  %v7103_v29 = vand.u32 4294901760, %v6290_v2 }
 0x3cc   : > { %2952 = vmatpush.msra.mxu3 %v6099_v28  ;;  %3007 = vmatpush.msrb.mxu1 %v2828_v38  ;;  %v989_v38 = vld [vmem:[#allocation5 + $0x2a8] sm:$0xff] }
 0x3cd   : > { %2896 = vmatpush.msra.mxu2 %v7321_v40  ;;  %3056 = vmatpush.msrb.mxu0 %v6073_v47  ;;  %v6315_v47 = vand.u32 4294901760, %v991_v13  ;;  %v6417_v40 = vsub.f32 %v979_v4, %v6395_v3 }
 0x3ce   : > { %2954 = vmatpush.msra.mxu3 %v6111_v61  ;;  %3011 = vmatpush.msrb.mxu1 %v2834_v58  ;;  %v6324_v58 = vsub.f32 %v993_v24, %v6304_v12  ;;  %v6431_v24 = vand.u32 4294901760, %v973_v51 }
 0x3cf   : > { %2899 = vmatpush.msra.mxu2 %v6078_v17  ;;  %3058 = vmatpush.msrb.mxu0 %v6086_v49  ;;  %v7101_v17 = vand.u32 4294901760, %v6300_v33  ;;  %v6326_v49 = vand.u32 4294901760, %v989_v38  ;;  %v6340_v14 = vsub.f32 %v991_v13, %v6315_v47  ;;  %v969_v13 = vld [vmem:[#allocation5 + $0x208] sm:$0xff] }
 0x3d0   : > { %2956 = vmatpush.msra.mxu3 %v6123_v45  ;;  %3015 = vmatpush.msrb.mxu1 %v2840_v31  ;;  %v7099_v31 = vand.u32 4294901760, %v6311_v7 }
 0x3d1   : > { %2902 = vmatpush.msra.mxu2 %v6097_v5  ;;  %3060 = vmatpush.msrb.mxu0 %v6099_v28  ;;  %v3122_v5 = vsub.f32 %v6290_v2, %v7103_v29  ;;  %v6335_v28 = vand.u32 4294901760, %v987_v35  ;;  %v6354_v55 = vsub.f32 %v989_v38, %v6326_v49  ;;  %v7096_v39 = vand.u32 4294901760, %v6340_v14  ;;  %v7326_v38 = vld [vmem:[#allocation58_spill] sm:$0xff] }
 0x3d2   : > { %2958 = vmatpush.msra.mxu3 %v6136_v26  ;;  %3019 = vmatpush.msrb.mxu1 %v2846_v19  ;;  %v6348_v19 = vand.u32 4294901760, %v985_v1 }
 0x3d3   : > { %2905 = vmatpush.msra.mxu2 %v6109_v9  ;;  %3062 = vmatpush.msrb.mxu0 %v6111_v61  ;;  %v3128_v9 = vsub.f32 %v6300_v33, %v7101_v17  ;;  %v7098_v61 = vand.u32 4294901760, %v6324_v58  ;;  %v6363_v57 = vsub.f32 %v987_v35, %v6335_v28  ;;  %v7095_v0 = vand.u32 4294901760, %v6354_v55 }
 0x3d4   : > { %2960 = vmatpush.msra.mxu3 %v6149_v48  ;;  %3023 = vmatpush.msrb.mxu1 %v2852_v52  ;;  %v3134_v52 = vsub.f32 %v6311_v7, %v7099_v31  ;;  %v3170_v35 = vsub.f32 %v6393_v34, %v7091_v54 }
 0x3d5   : > { %2908 = vmatpush.msra.mxu2 %v6121_v18  ;;  %3064 = vmatpush.msrb.mxu0 %v6123_v45  ;;  %v3123_v18 = vand.u32 4294901760, %v3122_v5  ;;  %v981_v45 = vld [vmem:[#allocation5 + $0x268] sm:$0xff]  ;;  %v6441_v5 = vsub.f32 %v975_v43, %v6419_v53 }
 0x3d6   : > { %2962 = vmatpush.msra.mxu3 %v6162_v42  ;;  %3027 = vmatpush.msrb.mxu1 %v2858_v32  ;;  %v6374_v32 = vsub.f32 %v985_v1, %v6348_v19  ;;  %v6382_v44 = vand.u32 4294901760, %v981_v45  ;;  %v7089_v1 = vand.u32 4294901760, %v6417_v40 }
 0x3d7   : > { %2911 = vmatpush.msra.mxu2 %v6134_v6  ;;  %3066 = vmatpush.msrb.mxu0 %v6136_v26  ;;  %v3129_v6 = vand.u32 4294901760, %v3128_v9  ;;  %v3140_v26 = vsub.f32 %v6324_v58, %v7098_v61  ;;  %v6443_v9 = vand.u32 4294901760, %v971_v16 }
 0x3d8   : > { %2964 = vmatpush.msra.mxu3 %v6178_v41  ;;  %3031 = vmatpush.msrb.mxu1 %v2864_v56  ;;  %v7093_v56 = vand.u32 4294901760, %v6363_v57  ;;  %v6405_v8 = vsub.f32 %v981_v45, %v6382_v44  ;;  %v6455_v45 = vand.u32 4294901760, %v969_v13  ;;  %v3182_v4 = vsub.f32 %v6417_v40, %v7089_v1 }
 0x3d9   : > { %2914 = vmatpush.msra.mxu2 %v6147_v25  ;;  %3068 = vmatpush.msrb.mxu0 %v6149_v48  ;;  %v3135_v25 = vand.u32 4294901760, %v3134_v52  ;;  %v3146_v48 = vsub.f32 %v6340_v14, %v7096_v39  ;;  %v6453_v52 = vsub.f32 %v973_v51, %v6431_v24  ;;  %v1031_v51 = vld [vmem:[#allocation5 + $0x3f8] sm:$0xff] }
 0x3da   : > { %2968 = vmatmul.f32.vlgmr.msra.gmra.mxu3 %v7325_v50  ;;  %3035 = vmatpush.msrb.mxu1 %v2870_v30  ;;  %v3152_v30 = vsub.f32 %v6354_v55, %v7095_v0  ;;  %v3158_v15 = vsub.f32 %v6363_v57, %v7093_v56  ;;  %v7090_v10 = vand.u32 4294901760, %v6405_v8  ;;  %v7086_v50 = vand.u32 4294901760, %v6441_v5 }
 0x3db   : > { %3124 = vmatpush.msrb.mxu3 %v3123_v18  ;;  %2917 = vmatpush.msra.mxu2 %v6160_v22  ;;  %v7092_v22 = vand.u32 4294901760, %v6374_v32  ;;  %v7087_v18 = vand.u32 4294901760, %v6429_v37  ;;  %v6475_v43 = vsub.f32 %v969_v13, %v6455_v45 }
 0x3dc   : > { %3070 = vmatpush.msrb.mxu0 %v6162_v42  ;;  %3037 = vmatmul.f32.vlgmr.msrb.gmra.mxu1 %v7313_v21  ;;  %v3141_v42 = vand.u32 4294901760, %v3140_v26  ;;  %v3176_v20 = vsub.f32 %v6405_v8, %v7090_v10  ;;  %v6465_v26 = vsub.f32 %v971_v16, %v6443_v9  ;;  %v1015_v10 = vld [vmem:[#allocation5 + $0x378] sm:$0xff] }
 0x3dd   : > { %3130 = vmatpush.msrb.mxu3 %v3129_v6  ;;  %3222 = vmatpush.msra.mxu1 %v6290_v2  ;;  %v3171_v6 = vand.u32 4294901760, %v3170_v35  ;;  %v3188_v46 = vsub.f32 %v6429_v37, %v7087_v18  ;;  %v7083_v16 = vand.u32 4294901760, %v6475_v43  ;;  %v7327_v18 = vld [vmem:[#allocation14_spill] sm:$0xff]  ;;  %v6578_v39 = vand.u32 4294901760, %v1015_v10 }
 0x3de   : > { %2920 = vmatpush.msra.mxu2 %v6173_v63  ;;  %3072 = vmatpush.msrb.mxu0 %v6178_v41  ;;  %v3147_v63 = vand.u32 4294901760, %v3146_v48  ;;  %v3164_v41 = vsub.f32 %v6374_v32, %v7092_v22  ;;  %v7085_v48 = vand.u32 4294901760, %v6453_v52  ;;  %v7330_v22 = vld [vmem:[#allocation16_spill] sm:$0xff] }
 0x3df   : > { %3136 = vmatpush.msrb.mxu3 %v3135_v25  ;;  %3074 = vmatmul.f32.vlgmr.msrb.gmra.mxu0 %v7313_v21  ;;  %v3153_v21 = vand.u32 4294901760, %v3152_v30  ;;  %v3177_v25 = vand.u32 4294901760, %v3176_v20  ;;  %v3194_v30 = vsub.f32 %v6441_v5, %v7086_v50  ;;  %v1017_v50 = vld [vmem:[#allocation5 + $0x388] sm:$0xff] }
 0x3e0   : > { %3225 = vmatpush.msra.mxu1 %v6300_v33  ;;  %3275 = vmatpush.msra.mxu0 %v6275_v27 }
 0x3e1   : > { %2923 = vmatpush.msra.mxu2 %v6186_v59  ;;  %3142 = vmatpush.msrb.mxu3 %v3141_v42  ;;  %v3159_v59 = vand.u32 4294901760, %v3158_v15  ;;  %v3183_v42 = vand.u32 4294901760, %v3182_v4  ;;  %v7084_v15 = vand.u32 4294901760, %v6465_v26  ;;  %v3195_v13 = vand.u32 4294901760, %v3194_v30 }
 0x3e2   : > { %3228 = vmatpush.msra.mxu1 %v6311_v7  ;;  %3277 = vmatpush.msra.mxu0 %v6282_v23 }
 0x3e3   : > { %2926 = vmatpush.msra.mxu2 %v6200_v11  ;;  %3148 = vmatpush.msrb.mxu3 %v3147_v63  ;;  %v3165_v11 = vand.u32 4294901760, %v3164_v41  ;;  %v3189_v63 = vand.u32 4294901760, %v3188_v46  ;;  %v3200_v41 = vsub.f32 %v6453_v52, %v7085_v48 }
 0x3e4   : > { %2929 = vmatmul.f32.vlgmr.msra.gmra.mxu2 %v7326_v38  ;;  %3231 = vmatpush.msra.mxu1 %v6324_v58  ;;  %v3206_v38 = vsub.f32 %v6465_v26, %v7084_v15  ;;  %v1019_v15 = vld [vmem:[#allocation5 + $0x398] sm:$0xff] }
 0x3e5   : > { %3079 = vmatpush.msrb.mxu2 %v6275_v27  ;;  %3279 = vmatpush.msra.mxu0 %v6292_v60  ;;  %v3201_v20 = vand.u32 4294901760, %v3200_v41 }
 0x3e6   : > { %3154 = vmatpush.msrb.mxu3 %v3153_v21  ;;  %3234 = vmatpush.msra.mxu1 %v6340_v14  ;;  %v1029_v21 = vld [vmem:[#allocation5 + $0x3e8] sm:$0xff]  ;;  %v3207_v46 = vand.u32 4294901760, %v3206_v38 }
 0x3e7   : > { %3081 = vmatpush.msrb.mxu2 %v6282_v23  ;;  %3281 = vmatpush.msra.mxu0 %v6304_v12  ;;  %v6501_v35 = vand.u32 4294901760, %v1029_v21 }
 0x3e8   : > { %3160 = vmatpush.msrb.mxu3 %v3159_v59  ;;  %3237 = vmatpush.msra.mxu1 %v6354_v55  ;;  %v6493_v59 = vand.u32 4294901760, %v1031_v51 }
 0x3e9   : > { %3083 = vmatpush.msrb.mxu2 %v6292_v60  ;;  %3283 = vmatpush.msra.mxu0 %v6315_v47  ;;  %v6518_v30 = vsub.f32 %v1029_v21, %v6501_v35 }
 0x3ea   : > { %3166 = vmatpush.msrb.mxu3 %v3165_v11  ;;  %3240 = vmatpush.msra.mxu1 %v6363_v57  ;;  %v1027_v11 = vld [vmem:[#allocation5 + $0x3d8] sm:$0xff]  ;;  %v6510_v4 = vsub.f32 %v1031_v51, %v6493_v59 }
 0x3eb   : > { %3085 = vmatpush.msrb.mxu2 %v6304_v12  ;;  %3285 = vmatpush.msra.mxu0 %v6326_v49 }
 0x3ec   : > { %3172 = vmatpush.msrb.mxu3 %v3171_v6  ;;  %3243 = vmatpush.msra.mxu1 %v6374_v32  ;;  %v3212_v6 = vsub.f32 %v6475_v43, %v7083_v16  ;;  %v1021_v16 = vld [vmem:[#allocation5 + $0x3a8] sm:$0xff] }
 0x3ed   : > { %3087 = vmatpush.msrb.mxu2 %v6315_v47  ;;  %3287 = vmatpush.msra.mxu0 %v6335_v28 }
 0x3ee   : > { %3178 = vmatpush.msrb.mxu3 %v3177_v25  ;;  %3246 = vmatpush.msra.mxu1 %v6393_v34  ;;  %v1025_v25 = vld [vmem:[#allocation5 + $0x3c8] sm:$0xff]  ;;  %v3213_v51 = vand.u32 4294901760, %v3212_v6  ;;  %v6535_v6 = vand.u32 4294901760, %v1021_v16 }
 0x3ef   : > { %3089 = vmatpush.msrb.mxu2 %v6326_v49  ;;  %3289 = vmatpush.msra.mxu0 %v6348_v19  ;;  %v6521_v41 = vand.u32 4294901760, %v1025_v25 }
 0x3f0   : > { %3184 = vmatpush.msrb.mxu3 %v3183_v42  ;;  %3249 = vmatpush.msra.mxu1 %v6405_v8  ;;  %v6513_v42 = vand.u32 4294901760, %v1027_v11  ;;  %v6560_v1 = vsub.f32 %v1021_v16, %v6535_v6 }
 0x3f1   : > { %3091 = vmatpush.msrb.mxu2 %v6335_v28  ;;  %3291 = vmatpush.msra.mxu0 %v6368_v36  ;;  %v6539_v48 = vsub.f32 %v1025_v25, %v6521_v41 }
 0x3f2   : > { %3190 = vmatpush.msrb.mxu3 %v3189_v63  ;;  %3252 = vmatpush.msra.mxu1 %v6417_v40  ;;  %v1023_v63 = vld [vmem:[#allocation5 + $0x3b8] sm:$0xff]  ;;  %v6528_v21 = vsub.f32 %v1027_v11, %v6513_v42  ;;  %7329 = vst [vmem:[#allocation17_spill] sm:$0xff] %v6560_v1 }
 0x3f3   : > { %3093 = vmatpush.msrb.mxu2 %v6348_v19  ;;  %3293 = vmatpush.msra.mxu0 %v6382_v44  ;;  %v6530_v38 = vand.u32 4294901760, %v1023_v63  ;;  %v7100_v54 = vand.u32 4294901760, %v6539_v48 }
 0x3f4   : > { %3196 = vmatpush.msrb.mxu3 %v3195_v13  ;;  %3255 = vmatpush.msra.mxu1 %v6429_v37  ;;  %v7088_v13 = vand.u32 4294901760, %v6510_v4 }
 0x3f5   : > { %3095 = vmatpush.msrb.mxu2 %v6368_v36  ;;  %3295 = vmatpush.msra.mxu0 %v6395_v3  ;;  %v6552_v25 = vsub.f32 %v1023_v63, %v6530_v38  ;;  %v6565_v63 = vand.u32 4294901760, %v1017_v50 }
 0x3f6   : > { %3202 = vmatpush.msrb.mxu3 %v3201_v20  ;;  %3258 = vmatpush.msra.mxu1 %v6441_v5  ;;  %v7094_v20 = vand.u32 4294901760, %v6518_v30  ;;  %v3463_v11 = vsub.f32 %v6510_v4, %v7088_v13 }
 0x3f7   : > { %3097 = vmatpush.msrb.mxu2 %v6382_v44  ;;  %3297 = vmatpush.msra.mxu0 %v6407_v62  ;;  %7328 = vst [vmem:[#allocation12_spill] sm:$0xff] %v6552_v25  ;;  %v7102_v0 = vand.u32 4294901760, %v6552_v25  ;;  %v6589_v61 = vsub.f32 %v1017_v50, %v6565_v63  ;;  %v6601_v50 = vsub.f32 %v1015_v10, %v6578_v39 }
 0x3f8   : > { %3208 = vmatpush.msrb.mxu3 %v3207_v46  ;;  %3261 = vmatpush.msra.mxu1 %v6453_v52  ;;  %v6546_v46 = vand.u32 4294901760, %v1019_v15  ;;  %v3469_v13 = vsub.f32 %v6518_v30, %v7094_v20  ;;  %v1013_v20 = vld [vmem:[#allocation5 + $0x368] sm:$0xff] }
 0x3f9   : > { %3099 = vmatpush.msrb.mxu2 %v6395_v3  ;;  %3299 = vmatpush.msra.mxu0 %v6419_v53  ;;  %v6591_v31 = vand.u32 4294901760, %v1013_v20 }
 0x3fa   : > { %3214 = vmatpush.msrb.mxu3 %v3213_v51  ;;  %3264 = vmatpush.msra.mxu1 %v6465_v26  ;;  %v7097_v51 = vand.u32 4294901760, %v6528_v21  ;;  %v6570_v56 = vsub.f32 %v1019_v15, %v6546_v46  ;;  %v1011_v15 = vld [vmem:[#allocation5 + $0x358] sm:$0xff] }
 0x3fb   : > { %3101 = vmatpush.msrb.mxu2 %v6407_v62  ;;  %3301 = vmatpush.msra.mxu0 %v6431_v24  ;;  %v6603_v17 = vand.u32 4294901760, %v1011_v15  ;;  %v6613_v10 = vsub.f32 %v1013_v20, %v6591_v31 }
 0x3fc   : > { %3216 = vmatmul.f32.vlgmr.msrb.gmra.mxu3 %v7327_v18  ;;  %3267 = vmatpush.msra.mxu1 %v6475_v43  ;;  %v3475_v16 = vsub.f32 %v6528_v21, %v7097_v51  ;;  %v3481_v51 = vsub.f32 %v6539_v48, %v7100_v54  ;;  %v3487_v54 = vsub.f32 %v6552_v25, %v7102_v0  ;;  %v1003_v25 = vld [vmem:[#allocation5 + $0x318] sm:$0xff] }
 0x3fd   : > { %3383 = vmatpush.msra.mxu3 %v6275_v27  ;;  %3103 = vmatpush.msrb.mxu2 %v6419_v53  ;;  %v3464_v27 = vand.u32 4294901760, %v3463_v11  ;;  %v7331_v11 = vld [vmem:[#allocation25_spill] sm:$0xff]  ;;  %v6626_v20 = vsub.f32 %v1011_v15, %v6603_v17 }
 0x3fe   : > { %3303 = vmatpush.msra.mxu0 %v6443_v9  ;;  %3270 = vmatmul.f32.vlgmr.msra.gmra.mxu1 %v7330_v22  ;;  %v7104_v22 = vand.u32 4294901760, %v6560_v1 }
 0x3ff   : > { %3385 = vmatpush.msra.mxu3 %v6282_v23  ;;  %3420 = vmatpush.msrb.mxu1 %v6493_v59  ;;  %v3470_v23 = vand.u32 4294901760, %v3469_v13  ;;  %v1009_v13 = vld [vmem:[#allocation5 + $0x348] sm:$0xff] }
 0x400   : > { %3105 = vmatpush.msrb.mxu2 %v6431_v24  ;;  %3305 = vmatpush.msra.mxu0 %v6455_v45  ;;  %v6615_v29 = vand.u32 4294901760, %v1009_v13 }
 0x401   : > { %3387 = vmatpush.msra.mxu3 %v6292_v60  ;;  %3309 = vmatmul.f32.vlgmr.msra.gmra.mxu0 %v7331_v11  ;;  %v3476_v11 = vand.u32 4294901760, %v3475_v16  ;;  %v7332_v60 = vld [vmem:[#allocation22_spill] sm:$0xff]  ;;  %v3482_v16 = vand.u32 4294901760, %v3481_v51  ;;  %v3510_v51 = vand.u32 4294901760, %v6601_v50 }
 0x402   : > { %3422 = vmatpush.msrb.mxu1 %v6501_v35  ;;  %3465 = vmatpush.msrb.mxu0 %v3464_v27  ;;  %v3493_v27 = vsub.f32 %v6560_v1, %v7104_v22  ;;  %v7334_v22 = vand.u32 4294901760, %v6570_v56  ;;  %v6639_v15 = vsub.f32 %v1009_v13, %v6615_v29 }
 0x403   : > { %3107 = vmatpush.msrb.mxu2 %v6443_v9  ;;  %3389 = vmatpush.msra.mxu3 %v6304_v12  ;;  %v1007_v12 = vld [vmem:[#allocation5 + $0x338] sm:$0xff] }
 0x404   : > { %3424 = vmatpush.msrb.mxu1 %v6513_v42  ;;  %3471 = vmatpush.msrb.mxu0 %v3470_v23  ;;  %v7333_v23 = vand.u32 4294901760, %v6290_v2  ;;  %v3499_v1 = vsub.f32 %v6570_v56, %v7334_v22  ;;  %v6628_v0 = vand.u32 4294901760, %v1007_v12  ;;  %v7335_v2 = vand.u32 4294901760, %v6300_v33 }
 0x405   : > { %3109 = vmatpush.msrb.mxu2 %v6455_v45  ;;  %3391 = vmatpush.msra.mxu3 %v6315_v47  ;;  %v3488_v47 = vand.u32 4294901760, %v3487_v54  ;;  %v3516_v22 = vand.u32 4294901760, %v6613_v10  ;;  %v7337_v33 = vand.u32 4294901760, %v6311_v7  ;;  %v7338_v7 = vand.u32 4294901760, %v6324_v58 }
 0x406   : > { %3115 = vmatmul.f32.vlgmr.msrb.gmra.mxu2 %v7332_v60  ;;  %3426 = vmatpush.msrb.mxu1 %v6521_v41  ;;  %v1005_v60 = vld [vmem:[#allocation5 + $0x328] sm:$0xff]  ;;  %v6652_v13 = vsub.f32 %v1007_v12, %v6628_v0 }
 0x407   : > { %3316 = vmatpush.msra.mxu2 %v7333_v23  ;;  %3477 = vmatpush.msrb.mxu0 %v3476_v11  ;;  %v3494_v23 = vand.u32 4294901760, %v3493_v27  ;;  %v6641_v11 = vand.u32 4294901760, %v1005_v60  ;;  %v3500_v27 = vand.u32 4294901760, %v3499_v1  ;;  %v3517_v1 = vsub.f32 %v6613_v10, %v3516_v22 }
 0x408   : > { %3393 = vmatpush.msra.mxu3 %v6326_v49  ;;  %3428 = vmatpush.msrb.mxu1 %v6530_v38  ;;  %v7336_v49 = vand.u32 4294901760, %v6589_v61 }
 0x409   : > { %3320 = vmatpush.msra.mxu2 %v7335_v2  ;;  %3483 = vmatpush.msrb.mxu0 %v3482_v16  ;;  %v3522_v16 = vand.u32 4294901760, %v6626_v20  ;;  %v6654_v2 = vand.u32 4294901760, %v1003_v25  ;;  %v6665_v12 = vsub.f32 %v1005_v60, %v6641_v11 }
 0x40a   : > { %3395 = vmatpush.msra.mxu3 %v6335_v28  ;;  %v3505_v54 = vsub.f32 %v6589_v61, %v7336_v49  ;;  %3430 = vmatpush.msrb.mxu1 %v6535_v6  ;;  %v3511_v28 = vsub.f32 %v6601_v50, %v3510_v51  ;;  %v1001_v49 = vld [vmem:[#allocation5 + $0x308] sm:$0xff] }
 0x40b   : > { %3324 = vmatpush.msra.mxu2 %v7337_v33  ;;  %3489 = vmatpush.msrb.mxu0 %v3488_v47  ;;  %v3528_v47 = vand.u32 4294901760, %v6639_v15  ;;  %v7339_v33 = vand.u32 4294901760, %v6340_v14  ;;  %v6670_v58 = vand.u32 4294901760, %v1001_v49  ;;  %v6678_v60 = vsub.f32 %v1003_v25, %v6654_v2 }
 0x40c   : > { %3397 = vmatpush.msra.mxu3 %v6348_v19  ;;  %3432 = vmatpush.msrb.mxu1 %v6546_v46  ;;  %v3506_v19 = vand.u32 4294901760, %v3505_v54  ;;  %v3534_v54 = vand.u32 4294901760, %v6652_v13  ;;  %v7340_v14 = vand.u32 4294901760, %v6354_v55 }
 0x40d   : > { %3328 = vmatpush.msra.mxu2 %v7338_v7  ;;  %3495 = vmatpush.msrb.mxu0 %v3494_v23  ;;  %v3523_v23 = vsub.f32 %v6626_v20, %v3522_v16  ;;  %v7341_v7 = vand.u32 4294901760, %v6363_v57  ;;  %v6692_v55 = vsub.f32 %v1001_v49, %v6670_v58  ;;  %v7343_v49 = vand.u32 4294901760, %v6393_v34 }
 0x40e   : > { %3399 = vmatpush.msra.mxu3 %v6368_v36  ;;  %3434 = vmatpush.msrb.mxu1 %v6565_v63  ;;  %v3512_v36 = vand.u32 4294901760, %v3511_v28  ;;  %v3540_v28 = vand.u32 4294901760, %v6665_v12 }
 0x40f   : > { %3332 = vmatpush.msra.mxu2 %v7339_v33  ;;  %3501 = vmatpush.msrb.mxu0 %v3500_v27  ;;  %v3518_v27 = vand.u32 4294901760, %v3517_v1  ;;  %v3524_v25 = vand.u32 4294901760, %v3523_v23  ;;  %v7342_v1 = vand.u32 4294901760, %v6374_v32  ;;  %v3552_v33 = vand.u32 4294901760, %v6692_v55 }
 0x410   : > { %3401 = vmatpush.msra.mxu3 %v6382_v44  ;;  %3436 = vmatpush.msrb.mxu1 %v6578_v39  ;;  %v3529_v44 = vsub.f32 %v6639_v15, %v3528_v47  ;;  %v7345_v23 = vand.u32 4294901760, %v6417_v40  ;;  %v7347_v40 = vand.u32 4294901760, %v6441_v5  ;;  %v7352_v5 = vand.u32 4294901760, %v6518_v30 }
 0x411   : > { %3336 = vmatpush.msra.mxu2 %v7340_v14  ;;  %3507 = vmatpush.msrb.mxu0 %v3506_v19  ;;  %v3546_v19 = vand.u32 4294901760, %v6678_v60  ;;  %v7346_v14 = vand.u32 4294901760, %v6429_v37  ;;  %v7349_v37 = vand.u32 4294901760, %v6510_v4 }
 0x412   : > { %3403 = vmatpush.msra.mxu3 %v6395_v3  ;;  %3438 = vmatpush.msrb.mxu1 %v6591_v31  ;;  %v3535_v3 = vsub.f32 %v6652_v13, %v3534_v54  ;;  %v3530_v57 = vand.u32 4294901760, %v3529_v44  ;;  %v7351_v44 = vld [vmem:[#allocation29_spill] sm:$0xff] }
 0x413   : > { %3340 = vmatpush.msra.mxu2 %v7341_v7  ;;  %3513 = vmatpush.msrb.mxu0 %v3512_v36  ;;  %v7344_v36 = vand.u32 4294901760, %v6405_v8  ;;  %v7353_v7 = vand.u32 4294901760, %v6465_v26  ;;  %v7357_v26 = vld [vmem:[#allocation12_spill] sm:$0xff] }
 0x414   : > { %3405 = vmatpush.msra.mxu3 %v6407_v62  ;;  %3440 = vmatpush.msrb.mxu1 %v6603_v17  ;;  %v3541_v62 = vsub.f32 %v6665_v12, %v3540_v28  ;;  %v3536_v32 = vand.u32 4294901760, %v3535_v3 }
 0x415   : > { %3344 = vmatpush.msra.mxu2 %v7342_v1  ;;  %3519 = vmatpush.msrb.mxu0 %v3518_v27  ;;  %v7348_v27 = vld [vmem:[#allocation64_spill] sm:$0xff] }
 0x416   : > { %3407 = vmatpush.msra.mxu3 %v6419_v53  ;;  %3442 = vmatpush.msrb.mxu1 %v6615_v29  ;;  %v3547_v53 = vsub.f32 %v6678_v60, %v3546_v19  ;;  %v3542_v34 = vand.u32 4294901760, %v3541_v62 }
 0x417   : > { %3348 = vmatpush.msra.mxu2 %v7343_v49  ;;  %3525 = vmatpush.msrb.mxu0 %v3524_v25  ;;  %v7354_v25 = vand.u32 4294901760, %v6528_v21 }
 0x418   : > { %3409 = vmatpush.msra.mxu3 %v6431_v24  ;;  %3444 = vmatpush.msrb.mxu1 %v6628_v0  ;;  %v3553_v24 = vsub.f32 %v6692_v55, %v3552_v33  ;;  %v3548_v8 = vand.u32 4294901760, %v3547_v53 }
 0x419   : > { %3352 = vmatpush.msra.mxu2 %v7344_v36  ;;  %3531 = vmatpush.msrb.mxu0 %v3530_v57 }
 0x41a   : > { %3411 = vmatpush.msra.mxu3 %v6443_v9  ;;  %3446 = vmatpush.msrb.mxu1 %v6641_v11  ;;  %v3554_v9 = vand.u32 4294901760, %v3553_v24 }
 0x41b   : > { %3356 = vmatpush.msra.mxu2 %v7345_v23  ;;  %3537 = vmatpush.msrb.mxu0 %v3536_v32 }
 0x41c   : > { %3413 = vmatpush.msra.mxu3 %v6455_v45  ;;  %3448 = vmatpush.msrb.mxu1 %v6654_v2  ;;  %v7350_v45 = vand.u32 4294901760, %v6453_v52  ;;  %v7355_v52 = vand.u32 4294901760, %v6475_v43 }
 0x41d   : > { %3360 = vmatpush.msra.mxu2 %v7346_v14  ;;  %3543 = vmatpush.msrb.mxu0 %v3542_v34 }
 0x41e   : > { %3415 = vmatmul.f32.vlgmr.msra.gmra.mxu3 %v7327_v18  ;;  %3450 = vmatpush.msrb.mxu1 %v6670_v58 }
 0x41f   : > { %3616 = vmatpush.msrb.mxu3 %v6493_v59  ;;  %3364 = vmatpush.msra.mxu2 %v7347_v40 }
 0x420   : > { %3549 = vmatpush.msrb.mxu0 %v3548_v8  ;;  %3456 = vmatmul.f32.vlgmr.msrb.gmra.mxu1 %v7348_v27 }
 0x421   : > { %3618 = vmatpush.msrb.mxu3 %v6501_v35  ;;  %3657 = vmatpush.msra.mxu1 %v7349_v37 }
 0x422   : > { %3368 = vmatpush.msra.mxu2 %v7350_v45  ;;  %3555 = vmatpush.msrb.mxu0 %v3554_v9 }
 0x423   : > { %3620 = vmatpush.msrb.mxu3 %v6513_v42  ;;  %3557 = vmatmul.f32.vlgmr.msrb.gmra.mxu0 %v7351_v44 }
 0x424   : > { %3661 = vmatpush.msra.mxu1 %v7352_v5  ;;  %3724 = vmatpush.msra.mxu0 %v6493_v59  ;;  %v7356_v59 = vand.u32 4294901760, %v6539_v48 }
 0x425   : > { %3372 = vmatpush.msra.mxu2 %v7353_v7  ;;  %3622 = vmatpush.msrb.mxu3 %v6521_v41 }
 0x426   : > { %3665 = vmatpush.msra.mxu1 %v7354_v25  ;;  %3726 = vmatpush.msra.mxu0 %v6501_v35  ;;  %v7358_v35 = vand.u32 4294901760, %v7357_v26 }
 0x427   : > { %3376 = vmatpush.msra.mxu2 %v7355_v52  ;;  %3624 = vmatpush.msrb.mxu3 %v6530_v38 }
 0x428   : > { %3378 = vmatmul.f32.vlgmr.msra.gmra.mxu2 %v7327_v18  ;;  %3669 = vmatpush.msra.mxu1 %v7356_v59  ;;  %v7359_v18 = vld [vmem:[#allocation17_spill] sm:$0xff] }
 0x429   : > { %3563 = vmatpush.msrb.mxu2 %v6510_v4  ;;  %3728 = vmatpush.msra.mxu0 %v6513_v42  ;;  %v7360_v43 = vand.u32 4294901760, %v7359_v18  ;;  %v7361_v4 = vand.u32 4294901760, %v6570_v56  ;;  %v7362_v42 = vand.u32 4294901760, %v6589_v61 }
 0x42a   : > { %3626 = vmatpush.msrb.mxu3 %v6535_v6  ;;  %3673 = vmatpush.msra.mxu1 %v7358_v35 }
 0x42b   : > { %3566 = vmatpush.msrb.mxu2 %v6518_v30  ;;  %3730 = vmatpush.msra.mxu0 %v6521_v41 }
 0x42c   : > { %3628 = vmatpush.msrb.mxu3 %v6546_v46  ;;  %3677 = vmatpush.msra.mxu1 %v7360_v43 }
 0x42d   : > { %3569 = vmatpush.msrb.mxu2 %v6528_v21  ;;  %3732 = vmatpush.msra.mxu0 %v6530_v38 }
 0x42e   : > { %3630 = vmatpush.msrb.mxu3 %v6565_v63  ;;  %3681 = vmatpush.msra.mxu1 %v7361_v4 }
 0x42f   : > { %3572 = vmatpush.msrb.mxu2 %v6539_v48  ;;  %3734 = vmatpush.msra.mxu0 %v6535_v6 }
 0x430   : > { %3632 = vmatpush.msrb.mxu3 %v6578_v39  ;;  %3685 = vmatpush.msra.mxu1 %v7362_v42 }
 0x431   : > { %3575 = vmatpush.msrb.mxu2 %v7357_v26  ;;  %3736 = vmatpush.msra.mxu0 %v6546_v46 }
 0x432   : > { %3634 = vmatpush.msrb.mxu3 %v6591_v31  ;;  %3689 = vmatpush.msra.mxu1 %v3510_v51 }
 0x433   : > { %3578 = vmatpush.msrb.mxu2 %v7359_v18  ;;  %3738 = vmatpush.msra.mxu0 %v6565_v63 }
 0x434   : > { %3636 = vmatpush.msrb.mxu3 %v6603_v17  ;;  %3693 = vmatpush.msra.mxu1 %v3516_v22 }
 0x435   : > { %3581 = vmatpush.msrb.mxu2 %v6570_v56  ;;  %3740 = vmatpush.msra.mxu0 %v6578_v39  ;;  %v1225_v39 = vpop.f32.mrf.mxu1 }
 0x436   : > { %3638 = vmatpush.msrb.mxu3 %v6615_v29  ;;  %3697 = vmatpush.msra.mxu1 %v3522_v16 }
 0x437   : > { %3584 = vmatpush.msrb.mxu2 %v6589_v61  ;;  %3742 = vmatpush.msra.mxu0 %v6591_v31  ;;  %v1070_v31 = vpop.f32.mrf.mxu2  ;;  %v1171_v61 = vpop.f32.mrf.mxu3 }
 0x438   : > { %3640 = vmatpush.msrb.mxu3 %v6628_v0  ;;  %3701 = vmatpush.msra.mxu1 %v3528_v47 }
 0x439   : > { %3587 = vmatpush.msrb.mxu2 %v6601_v50  ;;  %3744 = vmatpush.msra.mxu0 %v6603_v17  ;;  %v7363_v17 = vld [vmem:[#allocation63_spill] sm:$0xff] }
 0x43a   : > { %3642 = vmatpush.msrb.mxu3 %v6641_v11  ;;  %3705 = vmatpush.msra.mxu1 %v3534_v54 }
 0x43b   : > { %3590 = vmatpush.msrb.mxu2 %v6613_v10  ;;  %3746 = vmatpush.msra.mxu0 %v6615_v29  ;;  %v7364_v29 = vld [vmem:[#allocation54_spill] sm:$0xff]  ;;  %v1172_v10 = vadd.f32 %v1171_v61, %v1070_v31 }
 0x43c   : > { %3644 = vmatpush.msrb.mxu3 %v6654_v2  ;;  %3709 = vmatpush.msra.mxu1 %v3540_v28 }
 0x43d   : > { %3593 = vmatpush.msrb.mxu2 %v6626_v20  ;;  %3748 = vmatpush.msra.mxu0 %v6628_v0  ;;  %v1264_v0 = vpop.f32.mrf.mxu0  ;;  %v1411_v30 = vpop.f32.mrf.mxu1  ;;  %v1226_v20 = vadd.f32 %v1225_v39, %v1172_v10 }
 0x43e   : > { %3646 = vmatpush.msrb.mxu3 %v6670_v58  ;;  %3713 = vmatpush.msra.mxu1 %v3546_v19 }
 0x43f   : > { %3596 = vmatpush.msrb.mxu2 %v6639_v15  ;;  %3750 = vmatpush.msra.mxu0 %v6641_v11  ;;  %v1333_v56 = vpop.f32.mrf.mxu2  ;;  %v1370_v48 = vpop.f32.mrf.mxu3  ;;  %v1265_v16 = vadd.f32 %v1264_v0, %v1226_v20 }
 0x440   : > { %3650 = vmatmul.f32.vlgmr.msrb.gmra.mxu3 %v7363_v17  ;;  %3717 = vmatpush.msra.mxu1 %v3552_v33 }
 0x441   : > { %3599 = vmatpush.msrb.mxu2 %v6652_v13  ;;  %3752 = vmatpush.msra.mxu0 %v6654_v2  ;;  %v1334_v13 = vadd.f32 %v1333_v56, %v1265_v16 }
 0x442   : > { %3719 = vmatmul.f32.vlgmr.msra.gmra.mxu1 %v7351_v44 }
 0x443   : > { %3602 = vmatpush.msrb.mxu2 %v6665_v12  ;;  %3754 = vmatpush.msra.mxu0 %v6670_v58  ;;  %v1371_v12 = vadd.f32 %v1370_v48, %v1334_v13 }
 0x444   : > { %3756 = vmatmul.f32.vlgmr.msra.gmra.mxu0 %v7351_v44 }
 0x445   : > { %3605 = vmatpush.msrb.mxu2 %v6678_v60  ;;  %v1512_v21 = vpop.f32.mrf.mxu0  ;;  %v1674_v6 = vpop.f32.mrf.mxu1  ;;  %v1412_v60 = vadd.f32 %v1411_v30, %v1371_v12 }
 0x447   : > { %3608 = vmatpush.msrb.mxu2 %v6692_v55  ;;  %v1566_v41 = vpop.f32.mrf.mxu2  ;;  %v1605_v38 = vpop.f32.mrf.mxu3  ;;  %v1513_v3 = vadd.f32 %v1512_v21, %v1412_v60 }
 0x448   : > { %3611 = vmatmul.f32.vlgmr.msrb.gmra.mxu2 %v7364_v29 }
 0x449   : > { %v1567_v57 = vadd.f32 %v1566_v41, %v1513_v3 }
 0x44b   : > { %v1606_v33 = vadd.f32 %v1605_v38, %v1567_v57 }
 0x44d   : > { %v1711_v63 = vpop.f32.mrf.mxu0  ;;  %v1907_v51 = vpop.f32.mrf.mxu1  ;;  %v1675_v34 = vadd.f32 %v1674_v6, %v1606_v33 }
 0x44f   : > { %v1752_v46 = vpop.f32.mrf.mxu2  ;;  %v1853_v50 = vpop.f32.mrf.mxu3  ;;  %v1712_v8 = vadd.f32 %v1711_v63, %v1675_v34 }
 0x451   : > { %v1753_v40 = vadd.f32 %v1752_v46, %v1712_v8 }
 0x453   : > { %v1854_v37 = vadd.f32 %v1853_v50, %v1753_v40 }
 0x455   : > { %v1946_v15 = vpop.f32.mrf.mxu0  ;;  %v2093_v2 = vpop.f32.mrf.mxu1  ;;  %v1908_v7 = vadd.f32 %v1907_v51, %v1854_v37 }
 0x457   : > { %v2015_v22 = vpop.f32.mrf.mxu2  ;;  %v2052_v11 = vpop.f32.mrf.mxu3  ;;  %v1947_v59 = vadd.f32 %v1946_v15, %v1908_v7 }
 0x459   : > { %v2016_v35 = vadd.f32 %v2015_v22, %v1947_v59 }
 0x45b   : > { %v2053_v4 = vadd.f32 %v2052_v11, %v2016_v35 }
 0x45d   : > { %v2194_v58 = vpop.f32.mrf.mxu0  ;;  %v2356_v28 = vpop.f32.mrf.mxu1  ;;  %v2094_v31 = vadd.f32 %v2093_v2, %v2053_v4 }
 0x45f   : > { %v2248_v47 = vpop.f32.mrf.mxu2  ;;  %v2287_v54 = vpop.f32.mrf.mxu3  ;;  %v2195_v0 = vadd.f32 %v2194_v58, %v2094_v31  ;;  %v7366_v31 = vld [vmem:[#allocation19_spill] sm:$0xff] }
 0x461   : > { %v2249_v48 = vadd.f32 %v2248_v47, %v2195_v0 }
 0x463   : > { %v2288_v21 = vadd.f32 %v2287_v54, %v2249_v48 }
 0x465   : > { %v2393_v19 = vpop.f32.mrf.mxu0  ;;  %v2589_v49 = vpop.f32.mrf.mxu1  ;;  %v2357_v63 = vadd.f32 %v2356_v28, %v2288_v21 }
 0x467   : > { %v2434_v55 = vpop.f32.mrf.mxu2  ;;  %v2535_v1 = vpop.f32.mrf.mxu3  ;;  %v2394_v51 = vadd.f32 %v2393_v19, %v2357_v63 }
 0x468   : > { %v2536_v62 = vadd.f32 %v2535_v1, %v2434_v55 }
 0x469   : > { %v4005_v15 = vmul.f32 -1.442695, %v2394_v51  ;;  %v7372_v51 = vld [vmem:[#allocation37_spill] sm:$0xff] }
 0x46a   : > { %v2590_v32 = vadd.f32 %v2589_v49, %v2536_v62 }
 0x46b   : > { %4102 = vpow2.f32 %v4005_v15  ;;  %v7373_v15 = vld [vmem:[#allocation23_spill] sm:$0xff] }
 0x46d   : > { %v2628_v53 = vpop.f32.mrf.mxu0  ;;  %v2775_v27 = vpop.f32.mrf.mxu1 }
 0x46e   : > { %v2629_v23 = vadd.f32 %v2628_v53, %v2590_v32 }
 0x46f   : > { %v2697_v36 = vpop.f32.mrf.mxu2  ;;  %v2734_v14 = vpop.f32.mrf.mxu3 }
 0x470   : > { %v2698_v24 = vadd.f32 %v2697_v36, %v2629_v23 }
 0x471   : > { %v4103_v60 = vpop.eup %4102 }
 0x472   : > { %v2735_v9 = vadd.f32 %v2734_v14, %v2698_v24  ;;  %v3766_v1 = vadd.f32 1.0, %v4103_v60 }
 0x474   : > { %v2776_v45 = vadd.f32 %v2775_v27, %v2735_v9  ;;  %4104 = vrcp.f32 %v3766_v1  ;;  %vm3773_vm4 = vweird.f32 %v3766_v1  ;;  %v3779_v27 = vand.u32 2147483648, %v3766_v1 }
 0x475   : > { %v2876_v44 = vpop.f32.mrf.mxu0  ;;  %v3038_v43 = vpop.f32.mrf.mxu1  ;;  %v3777_v37 = vand.u32 2147483647, %v3766_v1 }
 0x476   : > { %v2877_v25 = vadd.f32 %v2876_v44, %v2776_v45 }
 0x477   : > { %v2930_v5 = vpop.f32.mrf.mxu2  ;;  %v2969_v26 = vpop.f32.mrf.mxu3  ;;  %vm3778_vm13 = vcmp.eq.f32.partialorder %v3777_v37, 8.507059e+37 }
 0x478   : > { %v2931_v52 = vadd.f32 %v2930_v5, %v2877_v25  ;;  %v3780_v25 = vor.u32 1.1754944e-38, %v3779_v27  ;;  %v7385_v27 = vld [vmem:[#allocation48_spill] sm:$0xff] }
 0x47a   : > { %v2970_v18 = vadd.f32 %v2969_v26, %v2931_v52  ;;  %v4105_v19 = vpop.eup %4104 }
 0x47b   : > { %v3769_v32 = vmul.f32 %v4105_v19, %v3766_v1  ;;  %vm3774_vm2 = vweird.f32 %v4105_v19 }
 0x47c   : > { %v3039_v42 = vadd.f32 %v3038_v43, %v2970_v18  ;;  %vm3775_vm5 = vmor %vm3773_vm4, %vm3774_vm2 }
 0x47d   : > { %v3075_v17 = vpop.f32.mrf.mxu0  ;;  %v3271_v41 = vpop.f32.mrf.mxu1  ;;  %v3770_v53 = vsub.f32 1.0, %v3769_v32 }
 0x47e   : > { %v3076_v61 = vadd.f32 %v3075_v17, %v3039_v42  ;;  %v7365_v17 = vld [vmem:[#allocation18_spill] sm:$0xff] }
 0x47f   : > { %v3217_v56 = vpop.f32.mrf.mxu3  ;;  %v3771_v34 = vmul.f32 %v4105_v19, %v3770_v53  ;;  %v7381_v53 = vld [vmem:[#allocation46_spill] sm:$0xff] }
 0x481   : > { %v3772_v14 = vadd.f32 %v4105_v19, %v3771_v34  ;;  %v7382_v34 = vld [vmem:[#allocation47_spill] sm:$0xff] }
 0x483   : > { %v3776_v5 = vsel %vm3775_vm5, %v4105_v19, %v3772_v14  ;;  %v7384_v14 = vld [vmem:[#allocation43_spill] sm:$0xff] }
 0x484   : > { %v3781_v26 = vsel %vm3778_vm13, %v3780_v25, %v3776_v5 }
 0x485   : > { %v3310_v6 = vpop.f32.mrf.mxu0 }
 0x489   : > { %v3116_v29 = vpop.f32.mrf.mxu2 }
 0x48a   : > { %v3117_v39 = vadd.f32 %v3116_v29, %v3076_v61 }
 0x48c   : > { %v3218_v30 = vadd.f32 %v3217_v56, %v3117_v39  ;;  %v7367_v39 = vld [vmem:[#allocation27_spill] sm:$0xff]  ;;  %v7368_v56 = vld [vmem:[#allocation28_spill] sm:$0xff] }
 0x48e   : > { %v3272_v38 = vadd.f32 %v3271_v41, %v3218_v30  ;;  %v7369_v41 = vld [vmem:[#allocation30_spill] sm:$0xff] }
 0x490   : > { %v3311_v50 = vadd.f32 %v3310_v6, %v3272_v38 }
 0x49d   : > { %v3457_v11 = vpop.f32.mrf.mxu1 }
 0x4a0   : > { %v3558_v13 = vpop.f32.mrf.mxu0 }
 0x4a1   : > { %v3416_v20 = vpop.f32.mrf.mxu3 }
 0x4ab   : > { %v3379_v46 = vpop.f32.mrf.mxu2 }
 0x4ac   : > { %v3380_v10 = vadd.f32 %v3379_v46, %v3311_v50  ;;  %v7370_v46 = vld [vmem:[#allocation32_spill] sm:$0xff]  ;;  %v7371_v50 = vld [vmem:[#allocation35_spill] sm:$0xff] }
 0x4ae   : > { %v3417_v22 = vadd.f32 %v3416_v20, %v3380_v10 }
 0x4b0   : > { %v3458_v16 = vadd.f32 %v3457_v11, %v3417_v22 }
 0x4b2   : > { %v3559_v2 = vadd.f32 %v3558_v13, %v3458_v16  ;;  %v7374_v16 = vld [vmem:[#allocation24_spill] sm:$0xff] }
 0x4bf   : > { %v3720_v55 = vpop.f32.mrf.mxu1 }
 0x4c1   : > { %v3757_v28 = vpop.f32.mrf.mxu0 }
 0x4c3   : > { %v3651_v58 = vpop.f32.mrf.mxu3 }
 0x4cb   : > { %v3612_v12 = vpop.f32.mrf.mxu2 }
 0x4cc   : > { %v3613_v47 = vadd.f32 %v3612_v12, %v3559_v2  ;;  %v7375_v2 = vld [vmem:[#allocation21_spill] sm:$0xff] }
 0x4ce   : > { %v3652_v54 = vadd.f32 %v3651_v58, %v3613_v47  ;;  %v7376_v47 = vld [vmem:[#allocation26_spill] sm:$0xff] }
 0x4d0   : > { %v3721_v3 = vadd.f32 %v3720_v55, %v3652_v54  ;;  %v7377_v54 = vld [vmem:[#allocation31_spill] sm:$0xff] }
 0x4d2   : > { %v3758_v57 = vadd.f32 %v3757_v28, %v3721_v3  ;;  %v7378_v28 = vld [vmem:[#allocation33_spill] sm:$0xff] }
 0x4d4   : > { %v4006_v62 = vmul.f32 -1.442695, %v3758_v57 }
 0x4d6   : > { %4106 = vpow2.f32 %v4006_v62  ;;  %v7379_v62 = vld [vmem:[#allocation34_spill] sm:$0xff] }
 0x4dc   : > { %v4107_v49 = vpop.eup %4106 }
 0x4dd   : > { %v3767_v33 = vadd.f32 1.0, %v4107_v49  ;;  %v7380_v49 = vld [vmem:[#allocation36_spill] sm:$0xff] }
 0x4df   : > { %4108 = vrcp.f32 %v3767_v33  ;;  %v3794_v8 = vand.u32 2147483648, %v3767_v33  ;;  %v3792_v9 = vand.u32 2147483647, %v3767_v33  ;;  %vm3788_vm8 = vweird.f32 %v3767_v33 }
 0x4e1   : > { %v3795_v44 = vor.u32 1.1754944e-38, %v3794_v8  ;;  %vm3793_vm11 = vcmp.eq.f32.partialorder %v3792_v9, 8.507059e+37 }
 0x4e5   : > { %v4109_v36 = vpop.eup %4108 }
 0x4e6   : > { %v3784_v23 = vmul.f32 %v4109_v36, %v3767_v33  ;;  %vm3789_vm3 = vweird.f32 %v4109_v36 }
 0x4e7   : > { %vm3790_vm10 = vmor %vm3788_vm8, %vm3789_vm3 }
 0x4e8   : > { %v3785_v24 = vsub.f32 1.0, %v3784_v23 }
 0x4ea   : > { %v3786_v40 = vmul.f32 %v4109_v36, %v3785_v24  ;;  %v7383_v24 = vld [vmem:[#allocation42_spill] sm:$0xff] }
 0x4ec   : > { %v3787_v45 = vadd.f32 %v4109_v36, %v3786_v40 }
 0x4ee   : > { %v3791_v7 = vsel %vm3790_vm10, %v4109_v36, %v3787_v45 }
 0x4ef   : > { %v3796_v52 = vsel %vm3793_vm11, %v3795_v44, %v3791_v7  ;;  %v7386_v44 = vld [vmem:[#allocation49_spill] sm:$0xff]  ;;  %v7387_v7 = vld [vmem:[#allocation52_spill] sm:$0xff] }
 0x4f0   : > { %v3800_v59 = vrot.slane %v3796_v52, 7  ;;  %v7388_v52 = vld [vmem:[#allocation53_spill] sm:$0xff] }
 0x4f2   : > { %v3802_v35 = vsel %vm3801_vm12, %v3781_v26, %v3800_v59  ;;  %v3803_v18 = vsel %vm441_vm6, %v3781_v26, %v3800_v59  ;;  %v3805_v38 = vsel %vm443_vm7, %v3781_v26, %v3800_v59  ;;  %v3807_v3 = vsel %vm445_vm9, %v3781_v26, %v3800_v59  ;;  %v7389_v26 = vld [vmem:[#allocation40_spill] sm:$0xff] }
 0x4f3   : > { %v3809_v43 = vperm.slane %v3802_v35, 0  ;;  %v3804_v4 = vrot.slane %v3803_v18, 1  ;;  %v3810_v42 = vperm.slane %v3802_v35, 1  ;;  %v3806_v22 = vrot.slane %v3805_v38, 2  ;;  %v7390_v18 = vld [vmem:[#allocation41_spill] sm:$0xff] }
 0x4f4   : > { %v3808_v32 = vrot.slane %v3807_v3, 3 }
 0x4f5   : > { %v3825_v29 = vmul.f32 %v3809_v43, %v7365_v17  ;;  %v3826_v61 = vmul.f32 %v3810_v42, %v7366_v31  ;;  %v3827_v0 = vmul.f32 %v3809_v43, %v7367_v39  ;;  %v3828_v48 = vmul.f32 %v3810_v42, %v7368_v56  ;;  %v7392_v17 = vld [vmem:[#allocation39_spill] sm:$0xff]  ;;  %v7393_v31 = vld [vmem:[#allocation44_spill] sm:$0xff]  ;;  %v7394_v39 = vld [vmem:[#allocation45_spill] sm:$0xff] }
 0x4f6   : > { %v3811_v30 = vperm.slane %v3804_v4, 0  ;;  %v3829_v21 = vmul.f32 %v3809_v43, %v7369_v41  ;;  %v3812_v6 = vperm.slane %v3804_v4, 1  ;;  %v3830_v63 = vmul.f32 %v3810_v42, %v7370_v46  ;;  %v7391_v4 = vld [vmem:[#allocation38_spill] sm:$0xff] }
 0x4f7   : > { %3857 = vst [vmem:[%s6833_s12] sm:$0xff] %v3825_v29  ;;  %v3831_v10 = vmul.f32 %v3809_v43, %v7371_v50  ;;  %v3832_v20 = vmul.f32 %v3810_v42, %v7372_v51  ;;  %v3813_v60 = vperm.slane %v3806_v22, 0  ;;  %v3814_v1 = vperm.slane %v3806_v22, 1  ;;  %v7395_v56 = vld [vmem:[#allocation50_spill] sm:$0xff] }
 0x4f8   : > { %3858 = vst [vmem:[%s6833_s12 + $0x8] sm:$0xff] %v3826_v61  ;;  %v3833_v11 = vmul.f32 %v3811_v30, %v7373_v15  ;;  %v3834_v13 = vmul.f32 %v3812_v6, %v7374_v16  ;;  %v3835_v12 = vmul.f32 %v3811_v30, %v7375_v2  ;;  %v3836_v58 = vmul.f32 %v3812_v6, %v7376_v47 }
 0x4f9   : > { %3859 = vst [vmem:[%s6833_s12 + $0x10] sm:$0xff] %v3827_v0  ;;  %v3837_v55 = vmul.f32 %v3811_v30, %v7377_v54  ;;  %v3838_v57 = vmul.f32 %v3812_v6, %v7378_v28  ;;  %v3839_v19 = vmul.f32 %v3811_v30, %v7379_v62  ;;  %v3840_v33 = vmul.f32 %v3812_v6, %v7380_v49  ;;  %v7396_v30 = vld [vmem:[#allocation51_spill] sm:$0xff] }
 0x4fa   : > { %3860 = vst [vmem:[%s6833_s12 + $0x18] sm:$0xff] %v3828_v48  ;;  %v3841_v36 = vmul.f32 %v3813_v60, %v7381_v53  ;;  %v3842_v23 = vmul.f32 %v3814_v1, %v7382_v34  ;;  %v3843_v8 = vmul.f32 %v3813_v60, %v7383_v24  ;;  %v3844_v40 = vmul.f32 %v3814_v1, %v7384_v14 }
 0x4fb   : > { %3861 = vst [vmem:[%s6833_s12 + $0x20] sm:$0xff] %v3829_v21  ;;  %v3815_v9 = vperm.slane %v3808_v32, 0  ;;  %v3845_v37 = vmul.f32 %v3813_v60, %v7385_v27  ;;  %v3816_v45 = vperm.slane %v3808_v32, 1  ;;  %v3846_v5 = vmul.f32 %v3814_v1, %v7386_v44 }
 0x4fc   : > { %3862 = vst [vmem:[%s6833_s12 + $0x28] sm:$0xff] %v3830_v63  ;;  %v3847_v25 = vmul.f32 %v3813_v60, %v7387_v7  ;;  %v3848_v59 = vmul.f32 %v3814_v1, %v7388_v52 }
 0x4fd   : > { %3863 = vst [vmem:[%s6833_s12 + $0x30] sm:$0xff] %v3831_v10  ;;  %v3849_v35 = vmul.f32 %v3815_v9, %v7389_v26  ;;  %v3850_v43 = vmul.f32 %v3816_v45, %v7390_v18  ;;  %v3851_v42 = vmul.f32 %v3815_v9, %v7391_v4  ;;  %v3852_v29 = vmul.f32 %v3816_v45, %v7392_v17 }
 0x4fe   : > { %3864 = vst [vmem:[%s6833_s12 + $0x38] sm:$0xff] %v3832_v20  ;;  %v3853_v61 = vmul.f32 %v3815_v9, %v7393_v31  ;;  %v3854_v0 = vmul.f32 %v3816_v45, %v7394_v39  ;;  %v3855_v48 = vmul.f32 %v3815_v9, %v7395_v56  ;;  %v3856_v41 = vmul.f32 %v3816_v45, %v7396_v30 }
 0x4ff   : > { %3865 = vst [vmem:[%s6833_s12 + $0x40] sm:$0xff] %v3833_v11 }
 0x500   : > { %3866 = vst [vmem:[%s6833_s12 + $0x48] sm:$0xff] %v3834_v13 }
 0x501   : > { %3867 = vst [vmem:[%s6833_s12 + $0x50] sm:$0xff] %v3835_v12 }
 0x502   : > { %3868 = vst [vmem:[%s6833_s12 + $0x58] sm:$0xff] %v3836_v58 }
 0x503   : > { %3869 = vst [vmem:[%s6833_s12 + $0x60] sm:$0xff] %v3837_v55 }
 0x504   : > { %3870 = vst [vmem:[%s6833_s12 + $0x68] sm:$0xff] %v3838_v57 }
 0x505   : > { %3871 = vst [vmem:[%s6833_s12 + $0x70] sm:$0xff] %v3839_v19 }
 0x506   : > { %3872 = vst [vmem:[%s6833_s12 + $0x78] sm:$0xff] %v3840_v33 }
 0x507   : > { %3873 = vst [vmem:[%s6833_s12 + $0x80] sm:$0xff] %v3841_v36 }
 0x508   : > { %3874 = vst [vmem:[%s6833_s12 + $0x88] sm:$0xff] %v3842_v23 }
 0x509   : > { %3875 = vst [vmem:[%s6833_s12 + $0x90] sm:$0xff] %v3843_v8 }
 0x50a   : > { %3876 = vst [vmem:[%s6833_s12 + $0x98] sm:$0xff] %v3844_v40 }
 0x50b   : > { %3877 = vst [vmem:[%s6833_s12 + $0xa0] sm:$0xff] %v3845_v37 }
 0x50c   : > { %3878 = vst [vmem:[%s6833_s12 + $0xa8] sm:$0xff] %v3846_v5 }
 0x50d   : > { %3879 = vst [vmem:[%s6833_s12 + $0xb0] sm:$0xff] %v3847_v25 }
 0x50e   : > { %3880 = vst [vmem:[%s6833_s12 + $0xb8] sm:$0xff] %v3848_v59 }
 0x50f   : > { %3881 = vst [vmem:[%s6833_s12 + $0xc0] sm:$0xff] %v3849_v35 }
 0x510   : > { %3882 = vst [vmem:[%s6833_s12 + $0xc8] sm:$0xff] %v3850_v43 }
 0x511   : > { %3883 = vst [vmem:[%s6833_s12 + $0xd0] sm:$0xff] %v3851_v42 }
 0x512   : > { %3884 = vst [vmem:[%s6833_s12 + $0xd8] sm:$0xff] %v3852_v29 }
 0x513   : > { %3885 = vst [vmem:[%s6833_s12 + $0xe0] sm:$0xff] %v3853_v61 }
 0x514   : > { %3886 = vst [vmem:[%s6833_s12 + $0xe8] sm:$0xff] %v3854_v0 }
 0x515   : > { %3887 = vst [vmem:[%s6833_s12 + $0xf0] sm:$0xff] %v3855_v48 }
 0x516   : > { %3888 = vst [vmem:[%s6833_s12 + $0xf8] sm:$0xff] %v3856_v41 }
 0x517   : > { %4229 = shalt.err (!%p4226_p10)
}
 0x518   : > { %s4279_s10 = smov 256   ;;  %s4280_s11 = smov 16  }
 0x519   : > { %4023 = dma.vmem_to_hbm [thread:$0]  (%p4375_p3), %s3904_s19, 4096, %s3906_s7, %s3890_s21, %s4279_s10, %s4279_s10, %s4280_s11  }
 0x51a PF: > { %s3920_s13 = sand.u32 1, %s4260_s15   ;;  %p7397_p12 = scmp.ge.s32.totalorder %s4272_s18, 2 }
 0x51b   : > { %s3921_s12 = scalar_lea.sflag [#allocation4], %s3920_s13 }
 0x51c   : > { %p4034_p13 = pnand %p7397_p12, %p4341_p6 }
 0x51e   : > { %p4035_p0 = pneg %p4034_p13 }
 0x520   : > { %4255 = dma.done.wait (%p4035_p0), %s3921_s12, 4096  }
 0x521   : > { %4257 = vsyncadd (%p4035_p0), %s3921_s12, 4294963200  ;;  %p18_p5 = scmp.ge.s32.totalorder %s4359_s29, 4   ;;  %s7398_s15 = smov %s4264_s16 }
 0x522   : > { %s7399_s16 = smov %s4268_s17  ;;  %s7400_s17 = smov %s4371_s8 }
 0x523   : > { %s7401_s18 = smov %s4359_s29  ;;  %20 = sbr.rel (!%p18_p5) target bundleno = 6 (0x6), region = 85 }
 0x528   :  { %3927 = vsyncpa [#allocation3], 1 }
 0x529   :  { %3929 = vsyncpa [#allocation3 + $0x1], 1 }
 0x52a   :  { %3930 = vsyncpa [#allocation6], 1 }
 0x52b   :  { %3931 = vsyncpa [#allocation4], 1 }
 0x52c   :  { %3933 = vsyncpa [#allocation4 + $0x1], 1 }

</bundles_post_ra>
